<compile_context>
chip_gen: v5e
topology: v5e:2x2
jax: 0.10.0
libtpu: 0.0.40
codegen_flags: <defaults>
</compile_context>

<pallas_src>
import numpy as np

import jax
import jax.numpy as jnp
from jax.experimental import pallas as pl
from jax.experimental.pallas import tpu as pltpu


# ----------------------------- fused forward kernel ----------------------------- #

def _lenet_kernel(x_ref, sel1_ref, g1_ref, b1_ref, ph1_ref, pw1_ref,
                  sel2_ref, g2_ref, b2_ref, ph2_ref, pw2_ref,
                  sel3_ref, g3_ref, b3_ref, w4_ref, b4_ref, w5_ref, b5_ref,
                  o_ref):
    """Whole LeNet forward for one TB-image batch chunk, fully resident in VMEM."""

    def mm(a, b):  # bf16 operands, f32 MXU accumulation
        return jnp.dot(a.astype(jnp.bfloat16), b.astype(jnp.bfloat16),
                       preferred_element_type=jnp.float32)

    x = x_ref[...]                                     # (TB*28, 28) f32, rows=(img,y)

    # conv1 (1->6, 5x5) + ReLU ; wide layout: rows=(img, y_out), cols = x_out*6 + c_out
    h = mm(mm(sel1_ref[0], x), g1_ref[0])
    for i in range(1, 5):
        h = h + mm(mm(sel1_ref[i], x), g1_ref[i])      # (TB*24, 144)
    h = jnp.maximum(h + b1_ref[...], 0.0)

    # 2x2/2 avg pool: block-diagonal row-pool matmul + channel-interleaved col-pool matmul
    h = mm(mm(ph1_ref[...], h), pw1_ref[...])          # (TB*12, 72)

    # conv2 (6->16, 5x5) + ReLU ; cols = x_out*16 + c_out
    h2 = mm(mm(sel2_ref[0], h), g2_ref[0])
    for i in range(1, 5):
        h2 = h2 + mm(mm(sel2_ref[i], h), g2_ref[i])    # (TB*8, 128)
    h2 = jnp.maximum(h2 + b2_ref[...], 0.0)
    h2 = mm(mm(ph2_ref[...], h2), pw2_ref[...])        # (TB*4, 64)

    # nn.Dropout(0.25): identity in eval/inference mode.
    # TODO(synk): training-mode dropout mask (pltpu.prng_random_bits) not implemented.

    # conv3 (16->120, 4x4 over the 4x4 map == dense layer) + ReLU -> (TB, 120)
    h3 = mm(mm(sel3_ref[0], h2), g3_ref[0])
    for i in range(1, 4):
        h3 = h3 + mm(mm(sel3_ref[i], h2), g3_ref[i])
    h3 = jnp.maximum(h3 + b3_ref[...], 0.0)

    # fc1 + ReLU, fc2
    h4 = jnp.maximum(mm(h3, w4_ref[...]) + b4_ref[...], 0.0)      # (TB, 84)
    o_ref[...] = (mm(h4, w5_ref[...]) + b5_ref[...]).astype(o_ref.dtype)


# --------------------------------- parameters ----------------------------------- #

def init_params(key):
    """PyTorch-default-style uniform(-1/sqrt(fan_in), 1/sqrt(fan_in)) init."""
    def uni(k, shape, fan_in):
        bound = 1.0 / float(fan_in) ** 0.5
        return jax.random.uniform(k, shape, jnp.float32, -bound, bound)

    ks = jax.random.split(key, 10)
    return {
        "conv1_w": uni(ks[0], (6, 1, 5, 5), 1 * 5 * 5),
        "conv1_b": uni(ks[1], (6,), 1 * 5 * 5),
        "conv2_w": uni(ks[2], (16, 6, 5, 5), 6 * 5 * 5),
        "conv2_b": uni(ks[3], (16,), 6 * 5 * 5),
        "conv3_w": uni(ks[4], (120, 16, 4, 4), 16 * 4 * 4),
        "conv3_b": uni(ks[5], (120,), 16 * 4 * 4),
        "fc1_w": uni(ks[6], (84, 120), 120),
        "fc1_b": uni(ks[7], (84,), 120),
        "fc2_w": uni(ks[8], (10, 84), 84),
        "fc2_b": uni(ks[9], (10,), 84),
    }


def prepare_params(params, tb=8):
    """One-time (off the hot path) conversion of PyTorch-layout weights into the
    matmul-friendly matrices used by the fused kernel.  `tb` = images per grid step."""
    f32 = np.float32

    def band(w, out_w):
        # (Cout,Cin,KH,KW) conv kernel -> per-kernel-row banded matrices:
        # G_i[(x_in*Cin + ci), (x_out*Cout + co)] = w[co, ci, i, x_in - x_out]
        w = np.asarray(w, f32)
        cout, cin, kh, kw = w.shape
        in_w = out_w + kw - 1
        g = np.zeros((kh, in_w * cin, out_w * cout), f32)
        for i in range(kh):
            for xo in range(out_w):
                for j in range(kw):
                    for ci in range(cin):
                        g[i, (xo + j) * cin + ci, xo * cout:(xo + 1) * cout] = w[:, ci, i, j]
        return g

    def row_select(rows_out, rows_in, offsets):
        # Block-diagonal 0/1 matrices: output row (b, y) <- input row (b, y + off).
        s = np.zeros((len(offsets), tb * rows_out, tb * rows_in), f32)
        for k, off in enumerate(offsets):
            for b in range(tb):
                for y in range(rows_out):
                    s[k, b * rows_out + y, b * rows_in + y + off] = 1.0
        return s

    def pool_rows(rows_out):
        # Block-diagonal row averaging: out row (b, y) = mean(in rows (b,2y), (b,2y+1)).
        m = np.zeros((tb * rows_out, tb * 2 * rows_out), f32)
        for b in range(tb):
            for y in range(rows_out):
                m[b * rows_out + y, b * 2 * rows_out + 2 * y] = 0.5
                m[b * rows_out + y, b * 2 * rows_out + 2 * y + 1] = 0.5
        return m

    def pool_cols(cols_out, c):
        # Channel-interleaved column averaging: out col x*c+ch = mean of cols (2x)*c+ch, (2x+1)*c+ch.
        m = np.zeros((2 * cols_out * c, cols_out * c), f32)
        eye = 0.5 * np.eye(c, dtype=f32)
        for x in range(cols_out):
            m[(2 * x) * c:(2 * x + 1) * c, x * c:(x + 1) * c] = eye
            m[(2 * x + 1) * c:(2 * x + 2) * c, x * c:(x + 1) * c] = eye
        return m

    bf = jnp.bfloat16
    b1 = np.asarray(params["conv1_b"], f32)
    b2 = np.asarray(params["conv2_b"], f32)
    b3 = np.asarray(params["conv3_b"], f32)

    return {
        # conv1: 28x28x1 -> 24x24x6
        "sel1": jnp.asarray(row_select(24, 28, range(5)), bf),   # (5, tb*24, tb*28)
        "g1":   jnp.asarray(band(params["conv1_w"], 24), bf),    # (5, 28, 144)
        "b1":   jnp.asarray(np.tile(b1, 24)[None, :], jnp.float32),
        "ph1":  jnp.asarray(pool_rows(12), bf),                  # (tb*12, tb*24)
        "pw1":  jnp.asarray(pool_cols(12, 6), bf),               # (144, 72)
        # conv2: 12x12x6 -> 8x8x16
        "sel2": jnp.asarray(row_select(8, 12, range(5)), bf),    # (5, tb*8, tb*12)
        "g2":   jnp.asarray(band(params["conv2_w"], 8), bf),     # (5, 72, 128)
        "b2":   jnp.asarray(np.tile(b2, 8)[None, :], jnp.float32),
        "ph2":  jnp.asarray(pool_rows(4), bf),                   # (tb*4, tb*8)
        "pw2":  jnp.asarray(pool_cols(4, 16), bf),               # (128, 64)
        # conv3 (== dense): 4x4x16 -> 120
        "sel3": jnp.asarray(row_select(1, 4, range(4)), bf),     # (4, tb, tb*4)
        "g3":   jnp.asarray(band(params["conv3_w"], 1), bf),     # (4, 64, 120)
        "b3":   jnp.asarray(b3[None, :], jnp.float32),
        # fc1 / fc2
        "w4":   jnp.asarray(np.asarray(params["fc1_w"], f32).T, bf),   # (120, 84)
        "b4":   jnp.asarray(np.asarray(params["fc1_b"], f32)[None, :], jnp.float32),
        "w5":   jnp.asarray(np.asarray(params["fc2_w"], f32).T, bf),   # (84, 10)
        "b5":   jnp.asarray(np.asarray(params["fc2_b"], f32)[None, :], jnp.float32),
    }


# ----------------------------------- forward ------------------------------------ #

def network_forward(p, x):
    """x: (B, 1, 28, 28) f32 (PyTorch NCHW).  Returns (B, 10) f32 logits."""
    B, C, H, W = x.shape
    if (C, H, W) != (1, 28, 28):
        raise ValueError("Network requires (B, 1, 28, 28) inputs (28->24->12->8->4->1).")

    TB = p["sel3"].shape[1]                    # images per grid step (static)
    Bp = (B + TB - 1) // TB * TB               # pad batch to a multiple of TB
    xi = x.reshape(B, 28, 28)
    if Bp != B:
        xi = jnp.concatenate([xi, jnp.zeros((Bp - B, 28, 28), xi.dtype)], axis=0)
    x2d = xi.reshape(Bp * 28, 28)              # rows = (img, y); free contiguous reshape

    const2 = lambda a: pl.BlockSpec(a.shape, lambda g: (0, 0))
    const3 = lambda a: pl.BlockSpec(a.shape, lambda g: (0, 0, 0))

    ops = (p["sel1"], p["g1"], p["b1"], p["ph1"], p["pw1"],
           p["sel2"], p["g2"], p["b2"], p["ph2"], p["pw2"],
           p["sel3"], p["g3"], p["b3"], p["w4"], p["b4"], p["w5"], p["b5"])
    const_specs = [const3(a) if a.ndim == 3 else const2(a) for a in ops]

    # Advisory cost hint: true conv/fc flops and total bytes touched.
    flops = 2 * Bp * (576 * 25 * 6 + 64 * 150 * 16 + 256 * 120 + 120 * 84 + 84 * 10)
    bytes_accessed = (x2d.size * 4 + Bp * 10 * 4
                      + sum(int(np.prod(a.shape)) * a.dtype.itemsize for a in ops))

    out = pl.pallas_call(
        _lenet_kernel,
        out_shape=jax.ShapeDtypeStruct((Bp, 10), jnp.float32),
        grid=(Bp // TB,),
        in_specs=[pl.BlockSpec((TB * 28, 28), lambda g: (g, 0))] + const_specs,
        out_specs=pl.BlockSpec((TB, 10), lambda g: (g, 0)),
        compiler_params=pltpu.CompilerParams(dimension_semantics=("parallel",)),
        cost_estimate=pl.CostEstimate(flops=flops, transcendentals=0,
                                      bytes_accessed=bytes_accessed),
    )(x2d, *ops)
    return out[:B]


# ------------------------------ pure-JAX reference ------------------------------ #

def reference_forward(params, x):
    """Independent f32 XLA reference with PyTorch Conv2d/AvgPool2d semantics."""
    def conv(h, w, b):
        y = jax.lax.conv_general_dilated(h, w, window_strides=(1, 1), padding="VALID",
                                         dimension_numbers=("NCHW", "OIHW", "NCHW"))
        return y + b[None, :, None, None]

    def avg_pool(h):
        B, C, H, W = h.shape
        return h.reshape(B, C, H // 2, 2, W // 2, 2).mean(axis=(3, 5))

    h = jax.nn.relu(conv(x, params["conv1_w"], params["conv1_b"]))
    h = avg_pool(h)
    h = jax.nn.relu(conv(h, params["conv2_w"], params["conv2_b"]))
    h = avg_pool(h)
    # dropout: identity (eval mode)
    h = jax.nn.relu(conv(h, params["conv3_w"], params["conv3_b"]))
    h = h.reshape(-1, 120)
    h = jax.nn.relu(h @ params["fc1_w"].T + params["fc1_b"])
    return h @ params["fc2_w"].T + params["fc2_b"]


# ------------------------------------- main -------------------------------------- #

if __name__ == "__main__":
    key = jax.random.PRNGKey(0)
    k_params, k_x = jax.random.split(key)
    params = init_params(k_params)
    prepared = prepare_params(params)      # one-time weight re-layout, off the hot path
    # MNIST-like input: the architecture requires 28x28 (28->24->12->8->4->1).
    x = jax.random.normal(k_x, (2, 1, 28, 28), jnp.float32)

    logits = jax.block_until_ready(jax.jit(network_forward)(prepared, x))
    assert logits.shape == (2, 10) and logits.dtype == jnp.float32

    # Sanity-check against an f32 reference (loose tolerance: bf16 MXU operands).
    ref = jax.block_until_ready(reference_forward(params, x))
    max_err = float(jnp.max(jnp.abs(logits - ref)))
    assert max_err < 5e-2, f"kernel/reference mismatch: max abs err = {max_err}"
    print("KERNEL_OK")
</pallas_src>

<mosaic_0001>
module attributes {stable_mosaic.version = 11 : i64} {
  func.func @_lenet_kernel(%arg0: i32, %arg1: memref<224x28xf32, #tpu.memory_space<vmem>>, %arg2: memref<5x192x224xbf16, #tpu.memory_space<vmem>>, %arg3: memref<5x28x144xbf16, #tpu.memory_space<vmem>>, %arg4: memref<1x144xf32, #tpu.memory_space<vmem>>, %arg5: memref<96x192xbf16, #tpu.memory_space<vmem>>, %arg6: memref<144x72xbf16, #tpu.memory_space<vmem>>, %arg7: memref<5x64x96xbf16, #tpu.memory_space<vmem>>, %arg8: memref<5x72x128xbf16, #tpu.memory_space<vmem>>, %arg9: memref<1x128xf32, #tpu.memory_space<vmem>>, %arg10: memref<32x64xbf16, #tpu.memory_space<vmem>>, %arg11: memref<128x64xbf16, #tpu.memory_space<vmem>>, %arg12: memref<4x8x32xbf16, #tpu.memory_space<vmem>>, %arg13: memref<4x64x120xbf16, #tpu.memory_space<vmem>>, %arg14: memref<1x120xf32, #tpu.memory_space<vmem>>, %arg15: memref<120x84xbf16, #tpu.memory_space<vmem>>, %arg16: memref<1x84xf32, #tpu.memory_space<vmem>>, %arg17: memref<84x10xbf16, #tpu.memory_space<vmem>>, %arg18: memref<1x10xf32, #tpu.memory_space<vmem>>, %arg19: memref<8x10xf32, #tpu.memory_space<vmem>>) attributes {dimension_semantics = [#tpu.dimension_semantics<parallel>], iteration_bounds = array<i64: 1>, scalar_prefetch = 0 : i64, scratch_operands = 0 : i64, tpu.core_type = #tpu.core_type<tc>, window_params = [{transform_indices = @transform_0, window_bounds = array<i64: 224, 28>}, {pipeline_mode = #tpu.pipeline_mode<synchronous>, transform_indices = @transform_1, window_bounds = array<i64: 5, 192, 224>}, {pipeline_mode = #tpu.pipeline_mode<synchronous>, transform_indices = @transform_2, window_bounds = array<i64: 5, 28, 144>}, {pipeline_mode = #tpu.pipeline_mode<synchronous>, transform_indices = @transform_3, window_bounds = array<i64: 1, 144>}, {pipeline_mode = #tpu.pipeline_mode<synchronous>, transform_indices = @transform_4, window_bounds = array<i64: 96, 192>}, {pipeline_mode = #tpu.pipeline_mode<synchronous>, transform_indices = @transform_5, window_bounds = array<i64: 144, 72>}, {pipeline_mode = #tpu.pipeline_mode<synchronous>, transform_indices = @transform_6, window_bounds = array<i64: 5, 64, 96>}, {pipeline_mode = #tpu.pipeline_mode<synchronous>, transform_indices = @transform_7, window_bounds = array<i64: 5, 72, 128>}, {pipeline_mode = #tpu.pipeline_mode<synchronous>, transform_indices = @transform_8, window_bounds = array<i64: 1, 128>}, {pipeline_mode = #tpu.pipeline_mode<synchronous>, transform_indices = @transform_9, window_bounds = array<i64: 32, 64>}, {pipeline_mode = #tpu.pipeline_mode<synchronous>, transform_indices = @transform_10, window_bounds = array<i64: 128, 64>}, {pipeline_mode = #tpu.pipeline_mode<synchronous>, transform_indices = @transform_11, window_bounds = array<i64: 4, 8, 32>}, {pipeline_mode = #tpu.pipeline_mode<synchronous>, transform_indices = @transform_12, window_bounds = array<i64: 4, 64, 120>}, {pipeline_mode = #tpu.pipeline_mode<synchronous>, transform_indices = @transform_13, window_bounds = array<i64: 1, 120>}, {pipeline_mode = #tpu.pipeline_mode<synchronous>, transform_indices = @transform_14, window_bounds = array<i64: 120, 84>}, {pipeline_mode = #tpu.pipeline_mode<synchronous>, transform_indices = @transform_15, window_bounds = array<i64: 1, 84>}, {pipeline_mode = #tpu.pipeline_mode<synchronous>, transform_indices = @transform_16, window_bounds = array<i64: 84, 10>}, {pipeline_mode = #tpu.pipeline_mode<synchronous>, transform_indices = @transform_17, window_bounds = array<i64: 1, 10>}, {transform_indices = @transform_18, window_bounds = array<i64: 8, 10>}]} {
    %c0 = arith.constant 0 : index
    %c0_0 = arith.constant 0 : index
    %0 = vector.load %arg1[%c0, %c0_0] : memref<224x28xf32, #tpu.memory_space<vmem>>, vector<224x28xf32>
    %c0_1 = arith.constant 0 : index
    %c0_2 = arith.constant 0 : index
    %c0_3 = arith.constant 0 : index
    %1 = vector.load %arg2[%c0_1, %c0_2, %c0_3] : memref<5x192x224xbf16, #tpu.memory_space<vmem>>, vector<1x192x224xbf16>
    %2 = vector.shape_cast %1 : vector<1x192x224xbf16> to vector<192x224xbf16>
    %3 = arith.truncf %0 : vector<224x28xf32> to vector<224x28xbf16>
    %cst = arith.constant dense<0.000000e+00> : vector<192x28xf32>
    %4 = tpu.matmul %2, %3, %cst {dimension_numbers = #tpu.dot_dimension_numbers<[1], [0], [0], [1], [0, 0, 1, 1], [], []>} : vector<192x224xbf16>, vector<224x28xbf16>, vector<192x28xf32> -> vector<192x28xf32>
    %c0_4 = arith.constant 0 : index
    %c0_5 = arith.constant 0 : index
    %c0_6 = arith.constant 0 : index
    %5 = vector.load %arg3[%c0_4, %c0_5, %c0_6] : memref<5x28x144xbf16, #tpu.memory_space<vmem>>, vector<1x28x144xbf16>
    %6 = vector.shape_cast %5 : vector<1x28x144xbf16> to vector<28x144xbf16>
    %7 = arith.truncf %4 : vector<192x28xf32> to vector<192x28xbf16>
    %cst_7 = arith.constant dense<0.000000e+00> : vector<192x144xf32>
    %8 = tpu.matmul %7, %6, %cst_7 {dimension_numbers = #tpu.dot_dimension_numbers<[1], [0], [0], [1], [0, 0, 1, 1], [], []>} : vector<192x28xbf16>, vector<28x144xbf16>, vector<192x144xf32> -> vector<192x144xf32>
    %c1 = arith.constant 1 : index
    %c0_8 = arith.constant 0 : index
    %c0_9 = arith.constant 0 : index
    %9 = vector.load %arg2[%c1, %c0_8, %c0_9] : memref<5x192x224xbf16, #tpu.memory_space<vmem>>, vector<1x192x224xbf16>
    %10 = vector.shape_cast %9 : vector<1x192x224xbf16> to vector<192x224xbf16>
    %11 = arith.truncf %0 : vector<224x28xf32> to vector<224x28xbf16>
    %cst_10 = arith.constant dense<0.000000e+00> : vector<192x28xf32>
    %12 = tpu.matmul %10, %11, %cst_10 {dimension_numbers = #tpu.dot_dimension_numbers<[1], [0], [0], [1], [0, 0, 1, 1], [], []>} : vector<192x224xbf16>, vector<224x28xbf16>, vector<192x28xf32> -> vector<192x28xf32>
    %c1_11 = arith.constant 1 : index
    %c0_12 = arith.constant 0 : index
    %c0_13 = arith.constant 0 : index
    %13 = vector.load %arg3[%c1_11, %c0_12, %c0_13] : memref<5x28x144xbf16, #tpu.memory_space<vmem>>, vector<1x28x144xbf16>
    %14 = vector.shape_cast %13 : vector<1x28x144xbf16> to vector<28x144xbf16>
    %15 = arith.truncf %12 : vector<192x28xf32> to vector<192x28xbf16>
    %cst_14 = arith.constant dense<0.000000e+00> : vector<192x144xf32>
    %16 = tpu.matmul %15, %14, %cst_14 {dimension_numbers = #tpu.dot_dimension_numbers<[1], [0], [0], [1], [0, 0, 1, 1], [], []>} : vector<192x28xbf16>, vector<28x144xbf16>, vector<192x144xf32> -> vector<192x144xf32>
    %17 = arith.addf %8, %16 : vector<192x144xf32>
    %c2 = arith.constant 2 : index
    %c0_15 = arith.constant 0 : index
    %c0_16 = arith.constant 0 : index
    %18 = vector.load %arg2[%c2, %c0_15, %c0_16] : memref<5x192x224xbf16, #tpu.memory_space<vmem>>, vector<1x192x224xbf16>
    %19 = vector.shape_cast %18 : vector<1x192x224xbf16> to vector<192x224xbf16>
    %20 = arith.truncf %0 : vector<224x28xf32> to vector<224x28xbf16>
    %cst_17 = arith.constant dense<0.000000e+00> : vector<192x28xf32>
    %21 = tpu.matmul %19, %20, %cst_17 {dimension_numbers = #tpu.dot_dimension_numbers<[1], [0], [0], [1], [0, 0, 1, 1], [], []>} : vector<192x224xbf16>, vector<224x28xbf16>, vector<192x28xf32> -> vector<192x28xf32>
    %c2_18 = arith.constant 2 : index
    %c0_19 = arith.constant 0 : index
    %c0_20 = arith.constant 0 : index
    %22 = vector.load %arg3[%c2_18, %c0_19, %c0_20] : memref<5x28x144xbf16, #tpu.memory_space<vmem>>, vector<1x28x144xbf16>
    %23 = vector.shape_cast %22 : vector<1x28x144xbf16> to vector<28x144xbf16>
    %24 = arith.truncf %21 : vector<192x28xf32> to vector<192x28xbf16>
    %cst_21 = arith.constant dense<0.000000e+00> : vector<192x144xf32>
    %25 = tpu.matmul %24, %23, %cst_21 {dimension_numbers = #tpu.dot_dimension_numbers<[1], [0], [0], [1], [0, 0, 1, 1], [], []>} : vector<192x28xbf16>, vector<28x144xbf16>, vector<192x144xf32> -> vector<192x144xf32>
    %26 = arith.addf %17, %25 : vector<192x144xf32>
    %c3 = arith.constant 3 : index
    %c0_22 = arith.constant 0 : index
    %c0_23 = arith.constant 0 : index
    %27 = vector.load %arg2[%c3, %c0_22, %c0_23] : memref<5x192x224xbf16, #tpu.memory_space<vmem>>, vector<1x192x224xbf16>
    %28 = vector.shape_cast %27 : vector<1x192x224xbf16> to vector<192x224xbf16>
    %29 = arith.truncf %0 : vector<224x28xf32> to vector<224x28xbf16>
    %cst_24 = arith.constant dense<0.000000e+00> : vector<192x28xf32>
    %30 = tpu.matmul %28, %29, %cst_24 {dimension_numbers = #tpu.dot_dimension_numbers<[1], [0], [0], [1], [0, 0, 1, 1], [], []>} : vector<192x224xbf16>, vector<224x28xbf16>, vector<192x28xf32> -> vector<192x28xf32>
    %c3_25 = arith.constant 3 : index
    %c0_26 = arith.constant 0 : index
    %c0_27 = arith.constant 0 : index
    %31 = vector.load %arg3[%c3_25, %c0_26, %c0_27] : memref<5x28x144xbf16, #tpu.memory_space<vmem>>, vector<1x28x144xbf16>
    %32 = vector.shape_cast %31 : vector<1x28x144xbf16> to vector<28x144xbf16>
    %33 = arith.truncf %30 : vector<192x28xf32> to vector<192x28xbf16>
    %cst_28 = arith.constant dense<0.000000e+00> : vector<192x144xf32>
    %34 = tpu.matmul %33, %32, %cst_28 {dimension_numbers = #tpu.dot_dimension_numbers<[1], [0], [0], [1], [0, 0, 1, 1], [], []>} : vector<192x28xbf16>, vector<28x144xbf16>, vector<192x144xf32> -> vector<192x144xf32>
    %35 = arith.addf %26, %34 : vector<192x144xf32>
    %c4 = arith.constant 4 : index
    %c0_29 = arith.constant 0 : index
    %c0_30 = arith.constant 0 : index
    %36 = vector.load %arg2[%c4, %c0_29, %c0_30] : memref<5x192x224xbf16, #tpu.memory_space<vmem>>, vector<1x192x224xbf16>
    %37 = vector.shape_cast %36 : vector<1x192x224xbf16> to vector<192x224xbf16>
    %38 = arith.truncf %0 : vector<224x28xf32> to vector<224x28xbf16>
    %cst_31 = arith.constant dense<0.000000e+00> : vector<192x28xf32>
    %39 = tpu.matmul %37, %38, %cst_31 {dimension_numbers = #tpu.dot_dimension_numbers<[1], [0], [0], [1], [0, 0, 1, 1], [], []>} : vector<192x224xbf16>, vector<224x28xbf16>, vector<192x28xf32> -> vector<192x28xf32>
    %c4_32 = arith.constant 4 : index
    %c0_33 = arith.constant 0 : index
    %c0_34 = arith.constant 0 : index
    %40 = vector.load %arg3[%c4_32, %c0_33, %c0_34] : memref<5x28x144xbf16, #tpu.memory_space<vmem>>, vector<1x28x144xbf16>
    %41 = vector.shape_cast %40 : vector<1x28x144xbf16> to vector<28x144xbf16>
    %42 = arith.truncf %39 : vector<192x28xf32> to vector<192x28xbf16>
    %cst_35 = arith.constant dense<0.000000e+00> : vector<192x144xf32>
    %43 = tpu.matmul %42, %41, %cst_35 {dimension_numbers = #tpu.dot_dimension_numbers<[1], [0], [0], [1], [0, 0, 1, 1], [], []>} : vector<192x28xbf16>, vector<28x144xbf16>, vector<192x144xf32> -> vector<192x144xf32>
    %44 = arith.addf %35, %43 : vector<192x144xf32>
    %c0_36 = arith.constant 0 : index
    %c0_37 = arith.constant 0 : index
    %45 = vector.load %arg4[%c0_36, %c0_37] : memref<1x144xf32, #tpu.memory_space<vmem>>, vector<1x144xf32>
    %46 = vector.broadcast %45 : vector<1x144xf32> to vector<192x144xf32>
    %47 = arith.addf %44, %46 : vector<192x144xf32>
    %cst_38 = arith.constant 0.000000e+00 : f32
    %48 = vector.broadcast %cst_38 : f32 to vector<192x144xf32>
    %49 = arith.maximumf %47, %48 : vector<192x144xf32>
    %c0_39 = arith.constant 0 : index
    %c0_40 = arith.constant 0 : index
    %50 = vector.load %arg5[%c0_39, %c0_40] : memref<96x192xbf16, #tpu.memory_space<vmem>>, vector<96x192xbf16>
    %51 = arith.truncf %49 : vector<192x144xf32> to vector<192x144xbf16>
    %cst_41 = arith.constant dense<0.000000e+00> : vector<96x144xf32>
    %52 = tpu.matmul %50, %51, %cst_41 {dimension_numbers = #tpu.dot_dimension_numbers<[1], [0], [0], [1], [0, 0, 1, 1], [], []>} : vector<96x192xbf16>, vector<192x144xbf16>, vector<96x144xf32> -> vector<96x144xf32>
    %c0_42 = arith.constant 0 : index
    %c0_43 = arith.constant 0 : index
    %53 = vector.load %arg6[%c0_42, %c0_43] : memref<144x72xbf16, #tpu.memory_space<vmem>>, vector<144x72xbf16>
    %54 = arith.truncf %52 : vector<96x144xf32> to vector<96x144xbf16>
    %cst_44 = arith.constant dense<0.000000e+00> : vector<96x72xf32>
    %55 = tpu.matmul %54, %53, %cst_44 {dimension_numbers = #tpu.dot_dimension_numbers<[1], [0], [0], [1], [0, 0, 1, 1], [], []>} : vector<96x144xbf16>, vector<144x72xbf16>, vector<96x72xf32> -> vector<96x72xf32>
    %c0_45 = arith.constant 0 : index
    %c0_46 = arith.constant 0 : index
    %c0_47 = arith.constant 0 : index
    %56 = vector.load %arg7[%c0_45, %c0_46, %c0_47] : memref<5x64x96xbf16, #tpu.memory_space<vmem>>, vector<1x64x96xbf16>
    %57 = vector.shape_cast %56 : vector<1x64x96xbf16> to vector<64x96xbf16>
    %58 = arith.truncf %55 : vector<96x72xf32> to vector<96x72xbf16>
    %cst_48 = arith.constant dense<0.000000e+00> : vector<64x72xf32>
    %59 = tpu.matmul %57, %58, %cst_48 {dimension_numbers = #tpu.dot_dimension_numbers<[1], [0], [0], [1], [0, 0, 1, 1], [], []>} : vector<64x96xbf16>, vector<96x72xbf16>, vector<64x72xf32> -> vector<64x72xf32>
    %c0_49 = arith.constant 0 : index
    %c0_50 = arith.constant 0 : index
    %c0_51 = arith.constant 0 : index
    %60 = vector.load %arg8[%c0_49, %c0_50, %c0_51] : memref<5x72x128xbf16, #tpu.memory_space<vmem>>, vector<1x72x128xbf16>
    %61 = vector.shape_cast %60 : vector<1x72x128xbf16> to vector<72x128xbf16>
    %62 = arith.truncf %59 : vector<64x72xf32> to vector<64x72xbf16>
    %cst_52 = arith.constant dense<0.000000e+00> : vector<64x128xf32>
    %63 = tpu.matmul %62, %61, %cst_52 {dimension_numbers = #tpu.dot_dimension_numbers<[1], [0], [0], [1], [0, 0, 1, 1], [], []>} : vector<64x72xbf16>, vector<72x128xbf16>, vector<64x128xf32> -> vector<64x128xf32>
    %c1_53 = arith.constant 1 : index
    %c0_54 = arith.constant 0 : index
    %c0_55 = arith.constant 0 : index
    %64 = vector.load %arg7[%c1_53, %c0_54, %c0_55] : memref<5x64x96xbf16, #tpu.memory_space<vmem>>, vector<1x64x96xbf16>
    %65 = vector.shape_cast %64 : vector<1x64x96xbf16> to vector<64x96xbf16>
    %66 = arith.truncf %55 : vector<96x72xf32> to vector<96x72xbf16>
    %cst_56 = arith.constant dense<0.000000e+00> : vector<64x72xf32>
    %67 = tpu.matmul %65, %66, %cst_56 {dimension_numbers = #tpu.dot_dimension_numbers<[1], [0], [0], [1], [0, 0, 1, 1], [], []>} : vector<64x96xbf16>, vector<96x72xbf16>, vector<64x72xf32> -> vector<64x72xf32>
    %c1_57 = arith.constant 1 : index
    %c0_58 = arith.constant 0 : index
    %c0_59 = arith.constant 0 : index
    %68 = vector.load %arg8[%c1_57, %c0_58, %c0_59] : memref<5x72x128xbf16, #tpu.memory_space<vmem>>, vector<1x72x128xbf16>
    %69 = vector.shape_cast %68 : vector<1x72x128xbf16> to vector<72x128xbf16>
    %70 = arith.truncf %67 : vector<64x72xf32> to vector<64x72xbf16>
    %cst_60 = arith.constant dense<0.000000e+00> : vector<64x128xf32>
    %71 = tpu.matmul %70, %69, %cst_60 {dimension_numbers = #tpu.dot_dimension_numbers<[1], [0], [0], [1], [0, 0, 1, 1], [], []>} : vector<64x72xbf16>, vector<72x128xbf16>, vector<64x128xf32> -> vector<64x128xf32>
    %72 = arith.addf %63, %71 : vector<64x128xf32>
    %c2_61 = arith.constant 2 : index
    %c0_62 = arith.constant 0 : index
    %c0_63 = arith.constant 0 : index
    %73 = vector.load %arg7[%c2_61, %c0_62, %c0_63] : memref<5x64x96xbf16, #tpu.memory_space<vmem>>, vector<1x64x96xbf16>
    %74 = vector.shape_cast %73 : vector<1x64x96xbf16> to vector<64x96xbf16>
    %75 = arith.truncf %55 : vector<96x72xf32> to vector<96x72xbf16>
    %cst_64 = arith.constant dense<0.000000e+00> : vector<64x72xf32>
    %76 = tpu.matmul %74, %75, %cst_64 {dimension_numbers = #tpu.dot_dimension_numbers<[1], [0], [0], [1], [0, 0, 1, 1], [], []>} : vector<64x96xbf16>, vector<96x72xbf16>, vector<64x72xf32> -> vector<64x72xf32>
    %c2_65 = arith.constant 2 : index
    %c0_66 = arith.constant 0 : index
    %c0_67 = arith.constant 0 : index
    %77 = vector.load %arg8[%c2_65, %c0_66, %c0_67] : memref<5x72x128xbf16, #tpu.memory_space<vmem>>, vector<1x72x128xbf16>
    %78 = vector.shape_cast %77 : vector<1x72x128xbf16> to vector<72x128xbf16>
    %79 = arith.truncf %76 : vector<64x72xf32> to vector<64x72xbf16>
    %cst_68 = arith.constant dense<0.000000e+00> : vector<64x128xf32>
    %80 = tpu.matmul %79, %78, %cst_68 {dimension_numbers = #tpu.dot_dimension_numbers<[1], [0], [0], [1], [0, 0, 1, 1], [], []>} : vector<64x72xbf16>, vector<72x128xbf16>, vector<64x128xf32> -> vector<64x128xf32>
    %81 = arith.addf %72, %80 : vector<64x128xf32>
    %c3_69 = arith.constant 3 : index
    %c0_70 = arith.constant 0 : index
    %c0_71 = arith.constant 0 : index
    %82 = vector.load %arg7[%c3_69, %c0_70, %c0_71] : memref<5x64x96xbf16, #tpu.memory_space<vmem>>, vector<1x64x96xbf16>
    %83 = vector.shape_cast %82 : vector<1x64x96xbf16> to vector<64x96xbf16>
    %84 = arith.truncf %55 : vector<96x72xf32> to vector<96x72xbf16>
    %cst_72 = arith.constant dense<0.000000e+00> : vector<64x72xf32>
    %85 = tpu.matmul %83, %84, %cst_72 {dimension_numbers = #tpu.dot_dimension_numbers<[1], [0], [0], [1], [0, 0, 1, 1], [], []>} : vector<64x96xbf16>, vector<96x72xbf16>, vector<64x72xf32> -> vector<64x72xf32>
    %c3_73 = arith.constant 3 : index
    %c0_74 = arith.constant 0 : index
    %c0_75 = arith.constant 0 : index
    %86 = vector.load %arg8[%c3_73, %c0_74, %c0_75] : memref<5x72x128xbf16, #tpu.memory_space<vmem>>, vector<1x72x128xbf16>
    %87 = vector.shape_cast %86 : vector<1x72x128xbf16> to vector<72x128xbf16>
    %88 = arith.truncf %85 : vector<64x72xf32> to vector<64x72xbf16>
    %cst_76 = arith.constant dense<0.000000e+00> : vector<64x128xf32>
    %89 = tpu.matmul %88, %87, %cst_76 {dimension_numbers = #tpu.dot_dimension_numbers<[1], [0], [0], [1], [0, 0, 1, 1], [], []>} : vector<64x72xbf16>, vector<72x128xbf16>, vector<64x128xf32> -> vector<64x128xf32>
    %90 = arith.addf %81, %89 : vector<64x128xf32>
    %c4_77 = arith.constant 4 : index
    %c0_78 = arith.constant 0 : index
    %c0_79 = arith.constant 0 : index
    %91 = vector.load %arg7[%c4_77, %c0_78, %c0_79] : memref<5x64x96xbf16, #tpu.memory_space<vmem>>, vector<1x64x96xbf16>
    %92 = vector.shape_cast %91 : vector<1x64x96xbf16> to vector<64x96xbf16>
    %93 = arith.truncf %55 : vector<96x72xf32> to vector<96x72xbf16>
    %cst_80 = arith.constant dense<0.000000e+00> : vector<64x72xf32>
    %94 = tpu.matmul %92, %93, %cst_80 {dimension_numbers = #tpu.dot_dimension_numbers<[1], [0], [0], [1], [0, 0, 1, 1], [], []>} : vector<64x96xbf16>, vector<96x72xbf16>, vector<64x72xf32> -> vector<64x72xf32>
    %c4_81 = arith.constant 4 : index
    %c0_82 = arith.constant 0 : index
    %c0_83 = arith.constant 0 : index
    %95 = vector.load %arg8[%c4_81, %c0_82, %c0_83] : memref<5x72x128xbf16, #tpu.memory_space<vmem>>, vector<1x72x128xbf16>
    %96 = vector.shape_cast %95 : vector<1x72x128xbf16> to vector<72x128xbf16>
    %97 = arith.truncf %94 : vector<64x72xf32> to vector<64x72xbf16>
    %cst_84 = arith.constant dense<0.000000e+00> : vector<64x128xf32>
    %98 = tpu.matmul %97, %96, %cst_84 {dimension_numbers = #tpu.dot_dimension_numbers<[1], [0], [0], [1], [0, 0, 1, 1], [], []>} : vector<64x72xbf16>, vector<72x128xbf16>, vector<64x128xf32> -> vector<64x128xf32>
    %99 = arith.addf %90, %98 : vector<64x128xf32>
    %c0_85 = arith.constant 0 : index
    %c0_86 = arith.constant 0 : index
    %100 = vector.load %arg9[%c0_85, %c0_86] : memref<1x128xf32, #tpu.memory_space<vmem>>, vector<1x128xf32>
    %101 = vector.broadcast %100 : vector<1x128xf32> to vector<64x128xf32>
    %102 = arith.addf %99, %101 : vector<64x128xf32>
    %cst_87 = arith.constant 0.000000e+00 : f32
    %103 = vector.broadcast %cst_87 : f32 to vector<64x128xf32>
    %104 = arith.maximumf %102, %103 : vector<64x128xf32>
    %c0_88 = arith.constant 0 : index
    %c0_89 = arith.constant 0 : index
    %105 = vector.load %arg10[%c0_88, %c0_89] : memref<32x64xbf16, #tpu.memory_space<vmem>>, vector<32x64xbf16>
    %106 = arith.truncf %104 : vector<64x128xf32> to vector<64x128xbf16>
    %cst_90 = arith.constant dense<0.000000e+00> : vector<32x128xf32>
    %107 = tpu.matmul %105, %106, %cst_90 {dimension_numbers = #tpu.dot_dimension_numbers<[1], [0], [0], [1], [0, 0, 1, 1], [], []>} : vector<32x64xbf16>, vector<64x128xbf16>, vector<32x128xf32> -> vector<32x128xf32>
    %c0_91 = arith.constant 0 : index
    %c0_92 = arith.constant 0 : index
    %108 = vector.load %arg11[%c0_91, %c0_92] : memref<128x64xbf16, #tpu.memory_space<vmem>>, vector<128x64xbf16>
    %109 = arith.truncf %107 : vector<32x128xf32> to vector<32x128xbf16>
    %cst_93 = arith.constant dense<0.000000e+00> : vector<32x64xf32>
    %110 = tpu.matmul %109, %108, %cst_93 {dimension_numbers = #tpu.dot_dimension_numbers<[1], [0], [0], [1], [0, 0, 1, 1], [], []>} : vector<32x128xbf16>, vector<128x64xbf16>, vector<32x64xf32> -> vector<32x64xf32>
    %c0_94 = arith.constant 0 : index
    %c0_95 = arith.constant 0 : index
    %c0_96 = arith.constant 0 : index
    %111 = vector.load %arg12[%c0_94, %c0_95, %c0_96] : memref<4x8x32xbf16, #tpu.memory_space<vmem>>, vector<1x8x32xbf16>
    %112 = vector.shape_cast %111 : vector<1x8x32xbf16> to vector<8x32xbf16>
    %113 = arith.truncf %110 : vector<32x64xf32> to vector<32x64xbf16>
    %cst_97 = arith.constant dense<0.000000e+00> : vector<8x64xf32>
    %114 = tpu.matmul %112, %113, %cst_97 {dimension_numbers = #tpu.dot_dimension_numbers<[1], [0], [0], [1], [0, 0, 1, 1], [], []>} : vector<8x32xbf16>, vector<32x64xbf16>, vector<8x64xf32> -> vector<8x64xf32>
    %c0_98 = arith.constant 0 : index
    %c0_99 = arith.constant 0 : index
    %c0_100 = arith.constant 0 : index
    %115 = vector.load %arg13[%c0_98, %c0_99, %c0_100] : memref<4x64x120xbf16, #tpu.memory_space<vmem>>, vector<1x64x120xbf16>
    %116 = vector.shape_cast %115 : vector<1x64x120xbf16> to vector<64x120xbf16>
    %117 = arith.truncf %114 : vector<8x64xf32> to vector<8x64xbf16>
    %cst_101 = arith.constant dense<0.000000e+00> : vector<8x120xf32>
    %118 = tpu.matmul %117, %116, %cst_101 {dimension_numbers = #tpu.dot_dimension_numbers<[1], [0], [0], [1], [0, 0, 1, 1], [], []>} : vector<8x64xbf16>, vector<64x120xbf16>, vector<8x120xf32> -> vector<8x120xf32>
    %c1_102 = arith.constant 1 : index
    %c0_103 = arith.constant 0 : index
    %c0_104 = arith.constant 0 : index
    %119 = vector.load %arg12[%c1_102, %c0_103, %c0_104] : memref<4x8x32xbf16, #tpu.memory_space<vmem>>, vector<1x8x32xbf16>
    %120 = vector.shape_cast %119 : vector<1x8x32xbf16> to vector<8x32xbf16>
    %121 = arith.truncf %110 : vector<32x64xf32> to vector<32x64xbf16>
    %cst_105 = arith.constant dense<0.000000e+00> : vector<8x64xf32>
    %122 = tpu.matmul %120, %121, %cst_105 {dimension_numbers = #tpu.dot_dimension_numbers<[1], [0], [0], [1], [0, 0, 1, 1], [], []>} : vector<8x32xbf16>, vector<32x64xbf16>, vector<8x64xf32> -> vector<8x64xf32>
    %c1_106 = arith.constant 1 : index
    %c0_107 = arith.constant 0 : index
    %c0_108 = arith.constant 0 : index
    %123 = vector.load %arg13[%c1_106, %c0_107, %c0_108] : memref<4x64x120xbf16, #tpu.memory_space<vmem>>, vector<1x64x120xbf16>
    %124 = vector.shape_cast %123 : vector<1x64x120xbf16> to vector<64x120xbf16>
    %125 = arith.truncf %122 : vector<8x64xf32> to vector<8x64xbf16>
    %cst_109 = arith.constant dense<0.000000e+00> : vector<8x120xf32>
    %126 = tpu.matmul %125, %124, %cst_109 {dimension_numbers = #tpu.dot_dimension_numbers<[1], [0], [0], [1], [0, 0, 1, 1], [], []>} : vector<8x64xbf16>, vector<64x120xbf16>, vector<8x120xf32> -> vector<8x120xf32>
    %127 = arith.addf %118, %126 : vector<8x120xf32>
    %c2_110 = arith.constant 2 : index
    %c0_111 = arith.constant 0 : index
    %c0_112 = arith.constant 0 : index
    %128 = vector.load %arg12[%c2_110, %c0_111, %c0_112] : memref<4x8x32xbf16, #tpu.memory_space<vmem>>, vector<1x8x32xbf16>
    %129 = vector.shape_cast %128 : vector<1x8x32xbf16> to vector<8x32xbf16>
    %130 = arith.truncf %110 : vector<32x64xf32> to vector<32x64xbf16>
    %cst_113 = arith.constant dense<0.000000e+00> : vector<8x64xf32>
    %131 = tpu.matmul %129, %130, %cst_113 {dimension_numbers = #tpu.dot_dimension_numbers<[1], [0], [0], [1], [0, 0, 1, 1], [], []>} : vector<8x32xbf16>, vector<32x64xbf16>, vector<8x64xf32> -> vector<8x64xf32>
    %c2_114 = arith.constant 2 : index
    %c0_115 = arith.constant 0 : index
    %c0_116 = arith.constant 0 : index
    %132 = vector.load %arg13[%c2_114, %c0_115, %c0_116] : memref<4x64x120xbf16, #tpu.memory_space<vmem>>, vector<1x64x120xbf16>
    %133 = vector.shape_cast %132 : vector<1x64x120xbf16> to vector<64x120xbf16>
    %134 = arith.truncf %131 : vector<8x64xf32> to vector<8x64xbf16>
    %cst_117 = arith.constant dense<0.000000e+00> : vector<8x120xf32>
    %135 = tpu.matmul %134, %133, %cst_117 {dimension_numbers = #tpu.dot_dimension_numbers<[1], [0], [0], [1], [0, 0, 1, 1], [], []>} : vector<8x64xbf16>, vector<64x120xbf16>, vector<8x120xf32> -> vector<8x120xf32>
    %136 = arith.addf %127, %135 : vector<8x120xf32>
    %c3_118 = arith.constant 3 : index
    %c0_119 = arith.constant 0 : index
    %c0_120 = arith.constant 0 : index
    %137 = vector.load %arg12[%c3_118, %c0_119, %c0_120] : memref<4x8x32xbf16, #tpu.memory_space<vmem>>, vector<1x8x32xbf16>
    %138 = vector.shape_cast %137 : vector<1x8x32xbf16> to vector<8x32xbf16>
    %139 = arith.truncf %110 : vector<32x64xf32> to vector<32x64xbf16>
    %cst_121 = arith.constant dense<0.000000e+00> : vector<8x64xf32>
    %140 = tpu.matmul %138, %139, %cst_121 {dimension_numbers = #tpu.dot_dimension_numbers<[1], [0], [0], [1], [0, 0, 1, 1], [], []>} : vector<8x32xbf16>, vector<32x64xbf16>, vector<8x64xf32> -> vector<8x64xf32>
    %c3_122 = arith.constant 3 : index
    %c0_123 = arith.constant 0 : index
    %c0_124 = arith.constant 0 : index
    %141 = vector.load %arg13[%c3_122, %c0_123, %c0_124] : memref<4x64x120xbf16, #tpu.memory_space<vmem>>, vector<1x64x120xbf16>
    %142 = vector.shape_cast %141 : vector<1x64x120xbf16> to vector<64x120xbf16>
    %143 = arith.truncf %140 : vector<8x64xf32> to vector<8x64xbf16>
    %cst_125 = arith.constant dense<0.000000e+00> : vector<8x120xf32>
    %144 = tpu.matmul %143, %142, %cst_125 {dimension_numbers = #tpu.dot_dimension_numbers<[1], [0], [0], [1], [0, 0, 1, 1], [], []>} : vector<8x64xbf16>, vector<64x120xbf16>, vector<8x120xf32> -> vector<8x120xf32>
    %145 = arith.addf %136, %144 : vector<8x120xf32>
    %c0_126 = arith.constant 0 : index
    %c0_127 = arith.constant 0 : index
    %146 = vector.load %arg14[%c0_126, %c0_127] : memref<1x120xf32, #tpu.memory_space<vmem>>, vector<1x120xf32>
    %147 = vector.broadcast %146 : vector<1x120xf32> to vector<8x120xf32>
    %148 = arith.addf %145, %147 : vector<8x120xf32>
    %cst_128 = arith.constant 0.000000e+00 : f32
    %149 = vector.broadcast %cst_128 : f32 to vector<8x120xf32>
    %150 = arith.maximumf %148, %149 : vector<8x120xf32>
    %c0_129 = arith.constant 0 : index
    %c0_130 = arith.constant 0 : index
    %151 = vector.load %arg15[%c0_129, %c0_130] : memref<120x84xbf16, #tpu.memory_space<vmem>>, vector<120x84xbf16>
    %152 = arith.truncf %150 : vector<8x120xf32> to vector<8x120xbf16>
    %cst_131 = arith.constant dense<0.000000e+00> : vector<8x84xf32>
    %153 = tpu.matmul %152, %151, %cst_131 {dimension_numbers = #tpu.dot_dimension_numbers<[1], [0], [0], [1], [0, 0, 1, 1], [], []>} : vector<8x120xbf16>, vector<120x84xbf16>, vector<8x84xf32> -> vector<8x84xf32>
    %c0_132 = arith.constant 0 : index
    %c0_133 = arith.constant 0 : index
    %154 = vector.load %arg16[%c0_132, %c0_133] : memref<1x84xf32, #tpu.memory_space<vmem>>, vector<1x84xf32>
    %155 = vector.broadcast %154 : vector<1x84xf32> to vector<8x84xf32>
    %156 = arith.addf %153, %155 : vector<8x84xf32>
    %cst_134 = arith.constant 0.000000e+00 : f32
    %157 = vector.broadcast %cst_134 : f32 to vector<8x84xf32>
    %158 = arith.maximumf %156, %157 : vector<8x84xf32>
    %c0_135 = arith.constant 0 : index
    %c0_136 = arith.constant 0 : index
    %159 = vector.load %arg17[%c0_135, %c0_136] : memref<84x10xbf16, #tpu.memory_space<vmem>>, vector<84x10xbf16>
    %160 = arith.truncf %158 : vector<8x84xf32> to vector<8x84xbf16>
    %cst_137 = arith.constant dense<0.000000e+00> : vector<8x10xf32>
    %161 = tpu.matmul %160, %159, %cst_137 {dimension_numbers = #tpu.dot_dimension_numbers<[1], [0], [0], [1], [0, 0, 1, 1], [], []>} : vector<8x84xbf16>, vector<84x10xbf16>, vector<8x10xf32> -> vector<8x10xf32>
    %c0_138 = arith.constant 0 : index
    %c0_139 = arith.constant 0 : index
    %162 = vector.load %arg18[%c0_138, %c0_139] : memref<1x10xf32, #tpu.memory_space<vmem>>, vector<1x10xf32>
    %163 = vector.broadcast %162 : vector<1x10xf32> to vector<8x10xf32>
    %164 = arith.addf %161, %163 : vector<8x10xf32>
    %c0_140 = arith.constant 0 : index
    %c0_141 = arith.constant 0 : index
    %165 = vector.load %arg19[%c0_140, %c0_141] : memref<8x10xf32, #tpu.memory_space<vmem>>, vector<8x10xf32>
    tpu.vector_store %arg19[%c0_140, %c0_141], %164 {strides = array<i32>} : memref<8x10xf32, #tpu.memory_space<vmem>>, vector<8x10xf32>,
    return
  }
  func.func @transform_0(%arg0: i32) -> (i32, i32) {
    %c0_i32 = arith.constant 0 : i32
    %c0_i32_0 = arith.constant 0 : i32
    return %arg0, %c0_i32 : i32, i32
  }
  func.func @transform_1(%arg0: i32) -> (i32, i32, i32) {
    %c0_i32 = arith.constant 0 : i32
    %c0_i32_0 = arith.constant 0 : i32
    %c0_i32_1 = arith.constant 0 : i32
    %c0_i32_2 = arith.constant 0 : i32
    return %c0_i32, %c0_i32_0, %c0_i32_1 : i32, i32, i32
  }
  func.func @transform_2(%arg0: i32) -> (i32, i32, i32) {
    %c0_i32 = arith.constant 0 : i32
    %c0_i32_0 = arith.constant 0 : i32
    %c0_i32_1 = arith.constant 0 : i32
    %c0_i32_2 = arith.constant 0 : i32
    return %c0_i32, %c0_i32_0, %c0_i32_1 : i32, i32, i32
  }
  func.func @transform_3(%arg0: i32) -> (i32, i32) {
    %c0_i32 = arith.constant 0 : i32
    %c0_i32_0 = arith.constant 0 : i32
    %c0_i32_1 = arith.constant 0 : i32
    return %c0_i32, %c0_i32_0 : i32, i32
  }
  func.func @transform_4(%arg0: i32) -> (i32, i32) {
    %c0_i32 = arith.constant 0 : i32
    %c0_i32_0 = arith.constant 0 : i32
    %c0_i32_1 = arith.constant 0 : i32
    return %c0_i32, %c0_i32_0 : i32, i32
  }
  func.func @transform_5(%arg0: i32) -> (i32, i32) {
    %c0_i32 = arith.constant 0 : i32
    %c0_i32_0 = arith.constant 0 : i32
    %c0_i32_1 = arith.constant 0 : i32
    return %c0_i32, %c0_i32_0 : i32, i32
  }
  func.func @transform_6(%arg0: i32) -> (i32, i32, i32) {
    %c0_i32 = arith.constant 0 : i32
    %c0_i32_0 = arith.constant 0 : i32
    %c0_i32_1 = arith.constant 0 : i32
    %c0_i32_2 = arith.constant 0 : i32
    return %c0_i32, %c0_i32_0, %c0_i32_1 : i32, i32, i32
  }
  func.func @transform_7(%arg0: i32) -> (i32, i32, i32) {
    %c0_i32 = arith.constant 0 : i32
    %c0_i32_0 = arith.constant 0 : i32
    %c0_i32_1 = arith.constant 0 : i32
    %c0_i32_2 = arith.constant 0 : i32
    return %c0_i32, %c0_i32_0, %c0_i32_1 : i32, i32, i32
  }
  func.func @transform_8(%arg0: i32) -> (i32, i32) {
    %c0_i32 = arith.constant 0 : i32
    %c0_i32_0 = arith.constant 0 : i32
    %c0_i32_1 = arith.constant 0 : i32
    return %c0_i32, %c0_i32_0 : i32, i32
  }
  func.func @transform_9(%arg0: i32) -> (i32, i32) {
    %c0_i32 = arith.constant 0 : i32
    %c0_i32_0 = arith.constant 0 : i32
    %c0_i32_1 = arith.constant 0 : i32
    return %c0_i32, %c0_i32_0 : i32, i32
  }
  func.func @transform_10(%arg0: i32) -> (i32, i32) {
    %c0_i32 = arith.constant 0 : i32
    %c0_i32_0 = arith.constant 0 : i32
    %c0_i32_1 = arith.constant 0 : i32
    return %c0_i32, %c0_i32_0 : i32, i32
  }
  func.func @transform_11(%arg0: i32) -> (i32, i32, i32) {
    %c0_i32 = arith.constant 0 : i32
    %c0_i32_0 = arith.constant 0 : i32
    %c0_i32_1 = arith.constant 0 : i32
    %c0_i32_2 = arith.constant 0 : i32
    return %c0_i32, %c0_i32_0, %c0_i32_1 : i32, i32, i32
  }
  func.func @transform_12(%arg0: i32) -> (i32, i32, i32) {
    %c0_i32 = arith.constant 0 : i32
    %c0_i32_0 = arith.constant 0 : i32
    %c0_i32_1 = arith.constant 0 : i32
    %c0_i32_2 = arith.constant 0 : i32
    return %c0_i32, %c0_i32_0, %c0_i32_1 : i32, i32, i32
  }
  func.func @transform_13(%arg0: i32) -> (i32, i32) {
    %c0_i32 = arith.constant 0 : i32
    %c0_i32_0 = arith.constant 0 : i32
    %c0_i32_1 = arith.constant 0 : i32
    return %c0_i32, %c0_i32_0 : i32, i32
  }
  func.func @transform_14(%arg0: i32) -> (i32, i32) {
    %c0_i32 = arith.constant 0 : i32
    %c0_i32_0 = arith.constant 0 : i32
    %c0_i32_1 = arith.constant 0 : i32
    return %c0_i32, %c0_i32_0 : i32, i32
  }
  func.func @transform_15(%arg0: i32) -> (i32, i32) {
    %c0_i32 = arith.constant 0 : i32
    %c0_i32_0 = arith.constant 0 : i32
    %c0_i32_1 = arith.constant 0 : i32
    return %c0_i32, %c0_i32_0 : i32, i32
  }
  func.func @transform_16(%arg0: i32) -> (i32, i32) {
    %c0_i32 = arith.constant 0 : i32
    %c0_i32_0 = arith.constant 0 : i32
    %c0_i32_1 = arith.constant 0 : i32
    return %c0_i32, %c0_i32_0 : i32, i32
  }
  func.func @transform_17(%arg0: i32) -> (i32, i32) {
    %c0_i32 = arith.constant 0 : i32
    %c0_i32_0 = arith.constant 0 : i32
    %c0_i32_1 = arith.constant 0 : i32
    return %c0_i32, %c0_i32_0 : i32, i32
  }
  func.func @transform_18(%arg0: i32) -> (i32, i32) {
    %c0_i32 = arith.constant 0 : i32
    %c0_i32_0 = arith.constant 0 : i32
    return %arg0, %c0_i32 : i32, i32
  }
}

</mosaic_0001>

<bundles_post_ra>
// kernel: network_forward.1
= control target key start
LH: loop header
LB: loop body
LE: loop exit
PB: predicated region body
PF: predicated region fallthrough
CT: control target
= control target key end

     0   :  { %s9104_s0 = inlined_call_operand.vmem [shape: f32[224,28], index: 0, kind: input, shape index: {}]   ;;  %s9105_s1 = inlined_call_operand.vmem [shape: bf16[5,192,224], index: 1, kind: input, shape index: {}]   ;;  %s9106_s2 = inlined_call_operand.hbm [shape: bf16[5,28,144], index: 2, kind: input, shape index: {}]   ;;  %s9107_s3 = inlined_call_operand.vmem [shape: f32[1,144], index: 3, kind: input, shape index: {}]   ;;  %s9108_s4 = inlined_call_operand.hbm [shape: bf16[96,192], index: 4, kind: input, shape index: {}]   ;;  %s9109_s5 = inlined_call_operand.hbm [shape: bf16[144,72], index: 5, kind: input, shape index: {}]   ;;  %s9110_s6 = inlined_call_operand.hbm [shape: bf16[5,64,96], index: 6, kind: input, shape index: {}]   ;;  %s9111_s7 = inlined_call_operand.vmem [shape: bf16[5,72,128], index: 7, kind: input, shape index: {}]   ;;  %s9112_s8 = inlined_call_operand.hbm [shape: f32[1,128], index: 8, kind: input, shape index: {}]   ;;  %s9113_s9 = inlined_call_operand.vmem [shape: bf16[32,64], index: 9, kind: input, shape index: {}]   ;;  %s9114_s10 = inlined_call_operand.vmem [shape: bf16[128,64], index: 10, kind: input, shape index: {}]   ;;  %s9115_s11 = inlined_call_operand.hbm [shape: bf16[4,8,32], index: 11, kind: input, shape index: {}]   ;;  %s9116_s12 = inlined_call_operand.vmem [shape: bf16[4,64,120], index: 12, kind: input, shape index: {}]   ;;  %s9117_s13 = inlined_call_operand.hbm [shape: f32[1,120], index: 13, kind: input, shape index: {}]   ;;  %s9118_s14 = inlined_call_operand.vmem [shape: bf16[120,84], index: 14, kind: input, shape index: {}]   ;;  %s9119_s15 = inlined_call_operand.hbm [shape: f32[1,84], index: 15, kind: input, shape index: {}]   ;;  %s9120_s16 = inlined_call_operand.vmem [shape: bf16[84,10], index: 16, kind: input, shape index: {}]   ;;  %s9121_s17 = inlined_call_operand.hbm [shape: f32[1,10], index: 17, kind: input, shape index: {}]   ;;  %s9122_s18 = inlined_call_operand.vmem [shape: f32[8,10], index: 18, kind: output, shape index: {}]  }
   0x1   :  { %9126 = sst [smem:[#allocation50_spill]] %s9104_s0 }
   0x2   :  { %9127 = sst [smem:[#allocation51_spill]] %s9105_s1 }
   0x3   :  { %9128 = sst [smem:[#allocation52_spill]] %s9106_s2 }
   0x4   :  { %23 = vsyncpa [#allocation3], 0 }
   0x5   :  { %24 = vsyncpa [#allocation5], 0 }
   0x6   :  { %25 = vsyncpa [#allocation8], 0 }
   0x7   :  { %26 = vsyncpa [#allocation11], 0 }
   0x8   :  { %27 = vsyncpa [#allocation14], 0  ;;  %s51_s29 = sshll.u32 %s9108_s4, 4  ;;  %s6782_s30 = smov [#allocation4]   ;;  %s52_s29 = int_to_ptr.hbm [resolvable:$true] %s51_s29 }
   0x9   :  { %s53_s0 = sshll.u32 %s6782_s30, 4  ;;  %s9125_s19 = smov 128   ;;  %s54_s0 = int_to_ptr.vmem [resolvable:$true] %s53_s0 }
   0xa   :  { %s6784_s1 = smov 8   ;;  %s77_s22 = sshll.u32 %s9110_s6, 4  ;;  %s78_s22 = int_to_ptr.hbm [resolvable:$true] %s77_s22 }
   0xb   :  { %59 = dma.hbm_to_vmem [thread:$0]  %s52_s29, 1536, %s54_s0, [#allocation5], %s9125_s19, %s9125_s19, %s6784_s1  }
   0xc   :  { %s6785_s2 = smov [#allocation7]   ;;  %s107_s4 = sshll.u32 %s9115_s11, 4  ;;  %s108_s4 = int_to_ptr.hbm [resolvable:$true] %s107_s4 }
   0xd   :  { %s79_s23 = sshll.u32 %s6785_s2, 4  ;;  %s6786_s26 = smov 64   ;;  %s80_s23 = int_to_ptr.vmem [resolvable:$true] %s79_s23 }
   0xe   :  { %s6787_s27 = smov 4   ;;  %s136_s29 = sshll.u32 %s9119_s15, 4  ;;  %s137_s29 = int_to_ptr.hbm [resolvable:$true] %s136_s29 }
   0xf   :  { %85 = dma.hbm_to_vmem [thread:$0]  %s78_s22, 2560, %s80_s23, [#allocation8], %s6786_s26, %s6786_s26, %s6787_s27  }
  0x10   :  { %s6788_s0 = smov [#allocation10]   ;;  %s6789_s6 = smov [#allocation13]  }
  0x11   :  { %s109_s19 = sshll.u32 %s6788_s0, 4  ;;  %s138_s20 = sshll.u32 %s6789_s6, 4  ;;  %s110_s19 = int_to_ptr.vmem [resolvable:$true] %s109_s19  ;;  %s139_s20 = int_to_ptr.vmem [resolvable:$true] %s138_s20 }
  0x12   :  { %115 = dma.hbm_to_vmem [thread:$0]  %s108_s4, 256, %s110_s19, [#allocation11], %s6786_s26, %s6786_s26, %s6787_s27  }
  0x13   :  { %s9129_s24 = sld [smem:[#allocation52_spill]]  ;;  %s64_s23 = sshll.u32 %s9109_s5, 4  ;;  %s65_s23 = int_to_ptr.hbm [resolvable:$true] %s64_s23 }
  0x14   :  { %141 = dma.hbm_to_vmem [thread:$0]  %s137_s29, 16, %s139_s20, [#allocation14]  }
  0x15   :  { %s6790_s28 = smov [#allocation2]   ;;  %s9130_s30 = smov 128  }
  0x16   :  { %s38_s15 = sshll.u32 %s6790_s28, 4  ;;  %s6791_s19 = smov [#allocation6]   ;;  %s39_s15 = int_to_ptr.vmem [resolvable:$true] %s38_s15 }
  0x17   :  { %s66_s4 = sshll.u32 %s6791_s19, 4  ;;  %s93_s21 = sshll.u32 %s9112_s8, 4  ;;  %s67_s4 = int_to_ptr.vmem [resolvable:$true] %s66_s4  ;;  %s94_s21 = int_to_ptr.hbm [resolvable:$true] %s93_s21 }
  0x18   :  { %72 = dma.hbm_to_vmem [thread:$0]  %s65_s23, 1152, %s67_s4, [#allocation5], %s6786_s26, %s6786_s26, %s6787_s27  }
  0x19   :  { %s36_s11 = sshll.u32 %s9129_s24, 4  ;;  %s123_s5 = sshll.u32 %s9117_s13, 4  ;;  %s37_s11 = int_to_ptr.hbm [resolvable:$true] %s36_s11  ;;  %s124_s5 = int_to_ptr.hbm [resolvable:$true] %s123_s5 }
  0x1a   :  { %44 = dma.hbm_to_vmem [thread:$0]  %s37_s11, 2560, %s39_s15, [#allocation3], %s9130_s30, %s9130_s30, %s6784_s1  }
  0x1b   :  { %s6792_s2 = smov [#allocation9]   ;;  %s6793_s25 = smov [#allocation12]  }
  0x1c   :  { %s95_s24 = sshll.u32 %s6792_s2, 4  ;;  %s125_s1 = sshll.u32 %s6793_s25, 4  ;;  %s96_s24 = int_to_ptr.vmem [resolvable:$true] %s95_s24  ;;  %s126_s1 = int_to_ptr.vmem [resolvable:$true] %s125_s1 }
  0x1d   :  { %98 = dma.hbm_to_vmem [thread:$0]  %s94_s21, 16, %s96_s24, [#allocation8]  }
  0x1e   :  { %s149_s28 = sshll.u32 %s9121_s17, 4  ;;  %s6794_s8 = smov [#allocation15]   ;;  %s150_s28 = int_to_ptr.hbm [resolvable:$true] %s149_s28 }
  0x1f   :  { %128 = dma.hbm_to_vmem [thread:$0]  %s124_s5, 16, %s126_s1, [#allocation11]  }
  0x20   :  { %s151_s26 = sshll.u32 %s6794_s8, 4  ;;  %s152_s26 = int_to_ptr.vmem [resolvable:$true] %s151_s26 }
  0x21   :  { %154 = dma.hbm_to_vmem [thread:$0]  %s150_s28, 16, %s152_s26, [#allocation14]  }
  0x22   :  { %6772 = dma.done.wait [#allocation3], 2560  }
  0x23   :  { %6773 = vsyncadd [#allocation3], 4294964736 }
  0x24   :  { %6774 = dma.done.wait [#allocation5], 2688  }
  0x25   :  { %6775 = vsyncadd [#allocation5], 4294964608 }
  0x26   :  { %6776 = dma.done.wait [#allocation8], 2576  }
  0x27   :  { %6777 = vsyncadd [#allocation8], 4294964720 }
  0x28   :  { %6778 = dma.done.wait [#allocation11], 272  }
  0x29   :  { %6779 = vsyncadd [#allocation11], 4294967024 }
  0x2a   :  { %6780 = dma.done.wait [#allocation14], 32  }
  0x2b   :  { %6781 = vsyncadd [#allocation14], 4294967264  ;;  %s9131_s17 = sld [smem:[#allocation50_spill]]  ;;  %vm366_vm0 = vcmask 785408   ;;  %vm936_vm1 = vcmask 1045504   ;;  %vm899_vm2 = vcmask 228352  }
  0x2c   :  { %s9132_s4 = sld [smem:[#allocation51_spill]]  ;;  %vm3181_vm3 = vcmask 523264   ;;  %vm3440_vm4 = vcmask 130048   ;;  %vm3749_vm5 = vcmask 1043456   ;;  %vm3736_vm6 = vcmask 588800  }
  0x2d   :  { %vm4493_vm7 = vcmask 261120   ;;  %vm4910_vm8 = vcmask 1041408   ;;  %vm4836_vm9 = vcmask 982016   ;;  %vm4906_vm10 = vcmask 687104  }
  0x2e   :  { %vm4927_vm11 = vcmask 80896  }
  0x31   :  { %v206_v0 = vld [vmem:[%s9131_s17 + $0x70] sm:$0xff]  ;;  %v207_v1 = vld [vmem:[%s9131_s17 + $0x78] sm:$0xff]  ;;  %v204_v5 = vld [vmem:[%s9131_s17 + $0x60] sm:$0xff] }
  0x32   :  { %v218_v2 = vld [vmem:[%s9131_s17 + $0xd0] sm:$0xff]  ;;  %v6932_v3 = vpack.c.bf16 %v207_v1, %v206_v0  ;;  %v219_v4 = vld [vmem:[%s9131_s17 + $0xd8] sm:$0xff]  ;;  %v205_v6 = vld [vmem:[%s9131_s17 + $0x68] sm:$0xff] }
  0x33   :  { %v6943_v7 = vpack.c.bf16 %v219_v4, %v218_v2  ;;  %v216_v8 = vld [vmem:[%s9131_s17 + $0xc0] sm:$0xff]  ;;  %v217_v9 = vld [vmem:[%s9131_s17 + $0xc8] sm:$0xff]  ;;  %v6953_v10 = vpack.c.bf16 %v205_v6, %v204_v5  ;;  %v202_v12 = vld [vmem:[%s9131_s17 + $0x50] sm:$0xff] }
  0x34   :  { %403 = vmatpush.bf16.msra.mxu0 %v6932_v3  ;;  %726 = vmatpush.bf16.msra.mxu2 %v6932_v3  ;;  %v6957_v11 = vpack.c.bf16 %v217_v9, %v216_v8  ;;  %v203_v13 = vld [vmem:[%s9131_s17 + $0x58] sm:$0xff]  ;;  %v214_v14 = vld [vmem:[%s9131_s17 + $0xb0] sm:$0xff]  ;;  %v200_v18 = vld [vmem:[%s9131_s17 + $0x40] sm:$0xff] }
  0x35   :  { %474 = vmatpush.bf16.msra.mxu1 %v6943_v7  ;;  %797 = vmatpush.bf16.msra.mxu3 %v6943_v7  ;;  %v215_v15 = vld [vmem:[%s9131_s17 + $0xb8] sm:$0xff]  ;;  %v6973_v16 = vpack.c.bf16 %v203_v13, %v202_v12  ;;  %v201_v19 = vld [vmem:[%s9131_s17 + $0x48] sm:$0xff]  ;;  %v212_v20 = vld [vmem:[%s9131_s17 + $0xa0] sm:$0xff] }
  0x36   :  { %v6977_v17 = vpack.c.bf16 %v215_v15, %v214_v14  ;;  %v213_v21 = vld [vmem:[%s9131_s17 + $0xa8] sm:$0xff]  ;;  %v6993_v22 = vpack.c.bf16 %v201_v19, %v200_v18  ;;  %v198_v24 = vld [vmem:[%s9131_s17 + $0x30] sm:$0xff]  ;;  %v199_v25 = vld [vmem:[%s9131_s17 + $0x38] sm:$0xff] }
  0x37   :  { %v6997_v23 = vpack.c.bf16 %v213_v21, %v212_v20  ;;  %v210_v26 = vld [vmem:[%s9131_s17 + $0x90] sm:$0xff]  ;;  %v211_v27 = vld [vmem:[%s9131_s17 + $0x98] sm:$0xff]  ;;  %v7013_v28 = vpack.c.bf16 %v199_v25, %v198_v24  ;;  %v196_v30 = vld [vmem:[%s9131_s17 + $0x20] sm:$0xff] }
  0x38   :  { %404 = vmatpush.bf16.msra.mxu0 %v6953_v10  ;;  %727 = vmatpush.bf16.msra.mxu2 %v6953_v10  ;;  %v7017_v29 = vpack.c.bf16 %v211_v27, %v210_v26  ;;  %v197_v31 = vld [vmem:[%s9131_s17 + $0x28] sm:$0xff]  ;;  %v208_v32 = vld [vmem:[%s9131_s17 + $0x80] sm:$0xff]  ;;  %v194_v40 = vld [vmem:[%s9131_s17 + $0x10] sm:$0xff] }
  0x39   :  { %475 = vmatpush.bf16.msra.mxu1 %v6957_v11  ;;  %798 = vmatpush.bf16.msra.mxu3 %v6957_v11  ;;  %v209_v33 = vld [vmem:[%s9131_s17 + $0x88] sm:$0xff]  ;;  %v7033_v34 = vpack.c.bf16 %v197_v31, %v196_v30  ;;  %v6300_v35 = vld [vmem:[%s9132_s4 + $0x4] sm:$0xf]  ;;  %v195_v41 = vld [vmem:[%s9131_s17 + $0x18] sm:$0xff] }
  0x3a   :  { %v7040_v36 = vpack.c.bf16 %v209_v33, %v208_v32  ;;  %v4942_v37 = vld [vmem:[%s9132_s4 + $0x8] sm:$0xf0]  ;;  %v6328_v38 = vld [vmem:[%s9132_s4 + $0xc4] sm:$0xf]  ;;  %v7061_v44 = vpack.c.bf16 %v195_v41, %v194_v40  ;;  %v4940_v47 = vld [vmem:[%s9132_s4] sm:$0xf] }
  0x3b   :  { %v5074_v39 = vld [vmem:[%s9132_s4 + $0xc8] sm:$0xf0]  ;;  %v4945_v42 = vor.u32 %v6300_v35, %v4942_v37  ;;  %v192_v45 = vld [vmem:[%s9131_s17] sm:$0xff]  ;;  %v6301_v49 = vld [vmem:[%s9132_s4 + $0x4] sm:$0xf0] }
  0x3c   :  { %405 = vmatpush.bf16.msra.mxu0 %v6973_v16  ;;  %728 = vmatpush.bf16.msra.mxu2 %v6973_v16  ;;  %v5077_v43 = vor.u32 %v6328_v38, %v5074_v39  ;;  %v193_v46 = vld [vmem:[%s9131_s17 + $0x8] sm:$0xff]  ;;  %v5072_v50 = vld [vmem:[%s9132_s4 + $0xc0] sm:$0xf]  ;;  %v4941_v52 = vor.u32 %v6301_v49, %v4940_v47  ;;  %v6302_v54 = vld [vmem:[%s9132_s4 + $0x14] sm:$0xf] }
  0x3d   :  { %476 = vmatpush.bf16.msra.mxu1 %v6977_v17  ;;  %799 = vmatpush.bf16.msra.mxu3 %v6977_v17  ;;  %v7076_v48 = vpack.c.bf16 %v193_v46, %v192_v45  ;;  %v6329_v51 = vld [vmem:[%s9132_s4 + $0xc4] sm:$0xf0]  ;;  %v4950_v55 = vld [vmem:[%s9132_s4 + $0x18] sm:$0xf0]  ;;  %v6330_v56 = vld [vmem:[%s9132_s4 + $0xd4] sm:$0xf] }
  0x3e   :  { %v5073_v53 = vor.u32 %v6329_v51, %v5072_v50  ;;  %v5082_v57 = vld [vmem:[%s9132_s4 + $0xd8] sm:$0xf0]  ;;  %v4953_v58 = vor.u32 %v6302_v54, %v4950_v55  ;;  %v4948_v60 = vld [vmem:[%s9132_s4 + $0x10] sm:$0xf]  ;;  %v6303_v61 = vld [vmem:[%s9132_s4 + $0x14] sm:$0xf0] }
  0x3f   :  { %v5085_v59 = vor.u32 %v6330_v56, %v5082_v57  ;;  %v5080_v62 = vld [vmem:[%s9132_s4 + $0xd0] sm:$0xf]  ;;  %v6331_v63 = vld [vmem:[%s9132_s4 + $0xd4] sm:$0xf0]  ;;  %v4949_v0 = vor.u32 %v6303_v61, %v4948_v60  ;;  %v6304_v2 = vld [vmem:[%s9132_s4 + $0x24] sm:$0xf] }
  0x40   :  { %406 = vmatpush.bf16.msra.mxu0 %v6993_v22  ;;  %729 = vmatpush.bf16.msra.mxu2 %v6993_v22  ;;  %v5081_v1 = vor.u32 %v6331_v63, %v5080_v62  ;;  %v4958_v4 = vld [vmem:[%s9132_s4 + $0x28] sm:$0xf0]  ;;  %v6332_v5 = vld [vmem:[%s9132_s4 + $0xe4] sm:$0xf]  ;;  %v4956_v12 = vld [vmem:[%s9132_s4 + $0x20] sm:$0xf] }
  0x41   :  { %477 = vmatpush.bf16.msra.mxu1 %v6997_v23  ;;  %800 = vmatpush.bf16.msra.mxu3 %v6997_v23  ;;  %v5090_v6 = vld [vmem:[%s9132_s4 + $0xe8] sm:$0xf0]  ;;  %v4961_v8 = vor.u32 %v6304_v2, %v4958_v4  ;;  %v6305_v13 = vld [vmem:[%s9132_s4 + $0x24] sm:$0xf0]  ;;  %v5088_v14 = vld [vmem:[%s9132_s4 + $0xe0] sm:$0xf] }
  0x42   :  { %v5093_v9 = vor.u32 %v6332_v5, %v5090_v6  ;;  %v6333_v15 = vld [vmem:[%s9132_s4 + $0xe4] sm:$0xf0]  ;;  %v4957_v18 = vor.u32 %v6305_v13, %v4956_v12  ;;  %v6306_v20 = vld [vmem:[%s9132_s4 + $0x34] sm:$0xf]  ;;  %v4966_v21 = vld [vmem:[%s9132_s4 + $0x38] sm:$0xf0] }
  0x43   :  { %v5089_v19 = vor.u32 %v6333_v15, %v5088_v14  ;;  %v6334_v24 = vld [vmem:[%s9132_s4 + $0xf4] sm:$0xf]  ;;  %v5098_v25 = vld [vmem:[%s9132_s4 + $0xf8] sm:$0xf0]  ;;  %v4969_v26 = vor.u32 %v6306_v20, %v4966_v21  ;;  %v4964_v30 = vld [vmem:[%s9132_s4 + $0x30] sm:$0xf] }
  0x44   :  { %407 = vmatpush.bf16.msra.mxu0 %v7013_v28  ;;  %730 = vmatpush.bf16.msra.mxu2 %v7013_v28  ;;  %v5101_v27 = vor.u32 %v6334_v24, %v5098_v25  ;;  %v6307_v31 = vld [vmem:[%s9132_s4 + $0x34] sm:$0xf0]  ;;  %v5096_v32 = vld [vmem:[%s9132_s4 + $0xf0] sm:$0xf]  ;;  %v6308_v38 = vld [vmem:[%s9132_s4 + $0x44] sm:$0xf] }
  0x45   :  { %478 = vmatpush.bf16.msra.mxu1 %v7017_v29  ;;  %801 = vmatpush.bf16.msra.mxu3 %v7017_v29  ;;  %v6335_v33 = vld [vmem:[%s9132_s4 + $0xf4] sm:$0xf0]  ;;  %v4965_v35 = vor.u32 %v6307_v31, %v4964_v30  ;;  %v4974_v39 = vld [vmem:[%s9132_s4 + $0x48] sm:$0xf0]  ;;  %v6336_v40 = vld [vmem:[%s9132_s4 + $0x104] sm:$0xf] }
  0x46   :  { %v5097_v37 = vor.u32 %v6335_v33, %v5096_v32  ;;  %v5106_v41 = vld [vmem:[%s9132_s4 + $0x108] sm:$0xf0]  ;;  %v4972_v45 = vld [vmem:[%s9132_s4 + $0x40] sm:$0xf]  ;;  %v6309_v46 = vld [vmem:[%s9132_s4 + $0x44] sm:$0xf0] }
  0x47   :  { %v5104_v47 = vld [vmem:[%s9132_s4 + $0x100] sm:$0xf]  ;;  %v6337_v49 = vld [vmem:[%s9132_s4 + $0x104] sm:$0xf0]  ;;  %v4973_v50 = vor.u32 %v6309_v46, %v4972_v45  ;;  %v6338_v54 = vld [vmem:[%s9132_s4 + $0x114] sm:$0xf] }
  0x48   :  { %408 = vmatpush.bf16.msra.mxu0 %v7033_v34  ;;  %731 = vmatpush.bf16.msra.mxu2 %v7033_v34  ;;  %v5105_v51 = vor.u32 %v6337_v49, %v5104_v47  ;;  %v5114_v55 = vld [vmem:[%s9132_s4 + $0x118] sm:$0xf0]  ;;  %v5112_v60 = vld [vmem:[%s9132_s4 + $0x110] sm:$0xf]  ;;  %v6339_v61 = vld [vmem:[%s9132_s4 + $0x114] sm:$0xf0] }
  0x49   :  { %479 = vmatpush.bf16.msra.mxu1 %v7040_v36  ;;  %802 = vmatpush.bf16.msra.mxu3 %v7040_v36  ;;  %v5117_v57 = vor.u32 %v6338_v54, %v5114_v55  ;;  %v5113_v63 = vor.u32 %v6339_v61, %v5112_v60  ;;  %v6340_v2 = vld [vmem:[%s9132_s4 + $0x124] sm:$0xf]  ;;  %v5122_v4 = vld [vmem:[%s9132_s4 + $0x128] sm:$0xf0]  ;;  %v5120_v12 = vld [vmem:[%s9132_s4 + $0x120] sm:$0xf] }
  0x4a   :  { %v5125_v6 = vor.u32 %v6340_v2, %v5122_v4  ;;  %v6341_v13 = vld [vmem:[%s9132_s4 + $0x124] sm:$0xf0]  ;;  %v6342_v20 = vld [vmem:[%s9132_s4 + $0x134] sm:$0xf]  ;;  %v5130_v21 = vld [vmem:[%s9132_s4 + $0x138] sm:$0xf0] }
  0x4b   :  { %v5121_v15 = vor.u32 %v6341_v13, %v5120_v12  ;;  %v5133_v25 = vor.u32 %v6342_v20, %v5130_v21  ;;  %v5128_v30 = vld [vmem:[%s9132_s4 + $0x130] sm:$0xf]  ;;  %v6343_v31 = vld [vmem:[%s9132_s4 + $0x134] sm:$0xf0]  ;;  %v6317_v45 = vld [vmem:[%s9132_s4 + $0x84] sm:$0xf0] }
  0x4c   :  { %5034 = vmatmul.msk.bf16.vlgmr.msra.gmra.mxu1 %vm366_vm0, %v4945_v42  ;;  %5166 = vmatmul.msk.bf16.vlgmr.msra.gmra.mxu3 %vm366_vm0, %v5077_v43  ;;  %v4977_v42 = vor.u32 %v6308_v38, %v4974_v39  ;;  %v5109_v43 = vor.u32 %v6336_v40, %v5106_v41  ;;  %v5129_v33 = vor.u32 %v6343_v31, %v5128_v30  ;;  %v6344_v38 = vld [vmem:[%s9132_s4 + $0x144] sm:$0xf]  ;;  %v5138_v39 = vld [vmem:[%s9132_s4 + $0x148] sm:$0xf0]  ;;  %v5136_v46 = vld [vmem:[%s9132_s4 + $0x140] sm:$0xf] }
  0x4d   :  { %409 = vmatpush.bf16.msra.mxu0 %v7061_v44  ;;  %732 = vmatpush.bf16.msra.mxu2 %v7061_v44  ;;  %v5141_v41 = vor.u32 %v6344_v38, %v5138_v39  ;;  %v6345_v47 = vld [vmem:[%s9132_s4 + $0x144] sm:$0xf0]  ;;  %v6318_v54 = vld [vmem:[%s9132_s4 + $0x94] sm:$0xf]  ;;  %v5014_v55 = vld [vmem:[%s9132_s4 + $0x98] sm:$0xf0] }
  0x4e   :  { %v5017_v60 = vor.u32 %v6318_v54, %v5014_v55  ;;  %v5190_v2 = vld [vmem:[#allocation2 + $0x38] sm:$0x30]  ;;  %v6319_v4 = vld [vmem:[%s9132_s4 + $0x94] sm:$0xf0]  ;;  %v5188_v20 = vld [vmem:[#allocation2 + $0x30] sm:$0xf] }
  0x4f   :  { %v6355_v21 = vld [vmem:[#allocation2 + $0x34] sm:$0x30]  ;;  %v6348_v30 = vld [vmem:[%s9132_s4 + $0x164] sm:$0xf]  ;;  %v5154_v31 = vld [vmem:[%s9132_s4 + $0x168] sm:$0xf0] }
  0x50   :  { %v6326_v54 = vld [vmem:[#allocation2 + $0x14] sm:$0xf] }
  0x51   :  { %410 = vmatpush.bf16.msra.mxu0 %v7076_v48  ;;  %733 = vmatpush.bf16.msra.mxu2 %v7076_v48 }
  0x54   :  { %411 = vmatmul.bf16.vlgmr.msra.gmra.mxu0 %v4941_v52  ;;  %734 = vmatmul.bf16.vlgmr.msra.gmra.mxu2 %v5073_v53  ;;  %v6310_v52 = vld [vmem:[%s9132_s4 + $0x54] sm:$0xf]  ;;  %v4982_v53 = vld [vmem:[%s9132_s4 + $0x58] sm:$0xf0] }
  0x55   :  { %v4985_v56 = vor.u32 %v6310_v52, %v4982_v53 }
  0x5c   :  { %5035 = vmatmul.msk.bf16.gmra.mxu1 %vm366_vm0, %v4953_v58  ;;  %5167 = vmatmul.msk.bf16.gmra.mxu3 %vm366_vm0, %v5085_v59  ;;  %v4980_v58 = vld [vmem:[%s9132_s4 + $0x50] sm:$0xf]  ;;  %v6311_v59 = vld [vmem:[%s9132_s4 + $0x54] sm:$0xf0] }
  0x5d   :  { %v4981_v62 = vor.u32 %v6311_v59, %v4980_v58 }
  0x64   :  { %416 = vmatmul.bf16.gmra.mxu0 %v4949_v0  ;;  %739 = vmatmul.bf16.gmra.mxu2 %v5081_v1  ;;  %v6312_v0 = vld [vmem:[%s9132_s4 + $0x64] sm:$0xf]  ;;  %v4990_v1 = vld [vmem:[%s9132_s4 + $0x68] sm:$0xf0] }
  0x65   :  { %v4993_v5 = vor.u32 %v6312_v0, %v4990_v1  ;;  %v5012_v0 = vld [vmem:[%s9132_s4 + $0x90] sm:$0xf]  ;;  %v6354_v1 = vld [vmem:[#allocation2 + $0x34] sm:$0xf] }
  0x6c   :  { %5036 = vmatmul.msk.bf16.gmra.mxu1 %vm366_vm0, %v4961_v8  ;;  %5168 = vmatmul.msk.bf16.gmra.mxu3 %vm366_vm0, %v5093_v9  ;;  %v4988_v8 = vld [vmem:[%s9132_s4 + $0x60] sm:$0xf]  ;;  %v6313_v9 = vld [vmem:[%s9132_s4 + $0x64] sm:$0xf0] }
  0x6d   :  { %v4989_v14 = vor.u32 %v6313_v9, %v4988_v8  ;;  %v5193_v8 = vor.u32 %v6354_v1, %v5190_v2  ;;  %v5152_v1 = vld [vmem:[%s9132_s4 + $0x160] sm:$0xf]  ;;  %v6349_v2 = vld [vmem:[%s9132_s4 + $0x164] sm:$0xf0] }
  0x6f   :  { %v941_v13 = vsel %vm936_vm1, %v5193_v8, 0  ;;  %v6324_v8 = vld [vmem:[#allocation2 + $0x4] sm:$0xf] }
  0x70   :  { %1018 = vmatpush.bf16.msrb.mxu3 %v941_v13 }
  0x74   :  { %421 = vmatmul.bf16.gmra.mxu0 %v4957_v18  ;;  %744 = vmatmul.bf16.gmra.mxu2 %v5089_v19  ;;  %v6314_v18 = vld [vmem:[%s9132_s4 + $0x74] sm:$0xf]  ;;  %v4998_v19 = vld [vmem:[%s9132_s4 + $0x78] sm:$0xf0] }
  0x75   :  { %v5001_v24 = vor.u32 %v6314_v18, %v4998_v19 }
  0x7c   :  { %5037 = vmatmul.msk.bf16.gmra.mxu1 %vm366_vm0, %v4969_v26  ;;  %5169 = vmatmul.msk.bf16.gmra.mxu3 %vm366_vm0, %v5101_v27  ;;  %v4996_v26 = vld [vmem:[%s9132_s4 + $0x70] sm:$0xf]  ;;  %v6315_v27 = vld [vmem:[%s9132_s4 + $0x74] sm:$0xf0] }
  0x7d   :  { %v4997_v32 = vor.u32 %v6315_v27, %v4996_v26  ;;  %v5022_v27 = vld [vmem:[%s9132_s4 + $0xa8] sm:$0xf0] }
  0x84   :  { %426 = vmatmul.bf16.gmra.mxu0 %v4965_v35  ;;  %749 = vmatmul.bf16.gmra.mxu2 %v5097_v37  ;;  %v6316_v35 = vld [vmem:[%s9132_s4 + $0x84] sm:$0xf]  ;;  %v5006_v37 = vld [vmem:[%s9132_s4 + $0x88] sm:$0xf0] }
  0x85   :  { %v5009_v40 = vor.u32 %v6316_v35, %v5006_v37  ;;  %v6352_v35 = vld [vmem:[#allocation2 + $0x24] sm:$0xf] }
  0x8c   :  { %5038 = vmatmul.msk.bf16.gmra.mxu1 %vm366_vm0, %v4977_v42  ;;  %5170 = vmatmul.msk.bf16.gmra.mxu3 %vm366_vm0, %v5109_v43  ;;  %v5004_v43 = vld [vmem:[%s9132_s4 + $0x80] sm:$0xf] }
  0x94   :  { %431 = vmatmul.bf16.gmra.mxu0 %v4973_v50  ;;  %754 = vmatmul.bf16.gmra.mxu2 %v5105_v51  ;;  %v5005_v50 = vor.u32 %v6317_v45, %v5004_v43  ;;  %v5137_v51 = vor.u32 %v6345_v47, %v5136_v46  ;;  %v5157_v43 = vor.u32 %v6348_v30, %v5154_v31  ;;  %v6322_v30 = vld [vmem:[%s9132_s4 + $0xb4] sm:$0xf]  ;;  %v5030_v31 = vld [vmem:[%s9132_s4 + $0xb8] sm:$0xf0] }
  0x9c   :  { %5039 = vmatmul.msk.bf16.gmra.mxu1 %vm366_vm0, %v4985_v56  ;;  %5171 = vmatmul.msk.bf16.gmra.mxu3 %vm366_vm0, %v5117_v57  ;;  %v6346_v56 = vld [vmem:[%s9132_s4 + $0x154] sm:$0xf]  ;;  %v5146_v57 = vld [vmem:[%s9132_s4 + $0x158] sm:$0xf0] }
  0x9d   :  { %v5149_v61 = vor.u32 %v6346_v56, %v5146_v57  ;;  %v5230_v56 = vld [vmem:[#allocation2 + $0x18] sm:$0x30] }
  0x9e   :  { %v5233_v57 = vor.u32 %v6326_v54, %v5230_v56  ;;  %v5160_v54 = vld [vmem:[%s9132_s4 + $0x170] sm:$0xf] }
  0xa4   :  { %436 = vmatmul.bf16.gmra.mxu0 %v4981_v62  ;;  %759 = vmatmul.bf16.gmra.mxu2 %v5113_v63 }
  0xac   :  { %5040 = vmatmul.msk.bf16.gmra.mxu1 %vm366_vm0, %v4993_v5  ;;  %5172 = vmatmul.msk.bf16.gmra.mxu3 %vm366_vm0, %v5125_v6  ;;  %v5144_v5 = vld [vmem:[%s9132_s4 + $0x150] sm:$0xf]  ;;  %v6347_v6 = vld [vmem:[%s9132_s4 + $0x154] sm:$0xf0] }
  0xb4   :  { %441 = vmatmul.bf16.gmra.mxu0 %v4989_v14  ;;  %764 = vmatmul.bf16.gmra.mxu2 %v5121_v15  ;;  %v5013_v14 = vor.u32 %v6319_v4, %v5012_v0  ;;  %v5145_v15 = vor.u32 %v6347_v6, %v5144_v5  ;;  %v1139_v4 = vsel %vm936_vm1, %v5233_v57, 0  ;;  %v5220_v5 = vld [vmem:[#allocation2] sm:$0xf]  ;;  %v6325_v6 = vld [vmem:[#allocation2 + $0x4] sm:$0xf0] }
  0xb5   :  { %1216 = vmatpush.bf16.msrb.mxu2 %v1139_v4 }
  0xbc   :  { %5041 = vmatmul.msk.bf16.gmra.mxu1 %vm366_vm0, %v5001_v24  ;;  %5173 = vmatmul.msk.bf16.gmra.mxu3 %vm366_vm0, %v5133_v25  ;;  %v5189_v24 = vor.u32 %v6355_v21, %v5188_v20  ;;  %v6320_v25 = vld [vmem:[%s9132_s4 + $0xa4] sm:$0xf]  ;;  %v5222_v20 = vld [vmem:[#allocation2 + $0x8] sm:$0xf0] }
  0xbe   :  { %v938_v26 = vsel %vm936_vm1, %v5189_v24, 0  ;;  %v5153_v24 = vor.u32 %v6349_v2, %v5152_v1 }
  0xbf   :  { %949 = vmatpush.bf16.msrb.mxu1 %v938_v26 }
  0xc4   :  { %446 = vmatmul.bf16.gmra.mxu0 %v4997_v32  ;;  %769 = vmatmul.bf16.gmra.mxu2 %v5129_v33  ;;  %v5180_v32 = vld [vmem:[#allocation2 + $0x20] sm:$0xf]  ;;  %v6353_v33 = vld [vmem:[#allocation2 + $0x24] sm:$0xf0] }
  0xc5   :  { %v5181_v39 = vor.u32 %v6353_v33, %v5180_v32  ;;  %v6350_v32 = vld [vmem:[%s9132_s4 + $0x174] sm:$0xf]  ;;  %v5162_v33 = vld [vmem:[%s9132_s4 + $0x178] sm:$0xf0] }
  0xc7   :  { %950 = vmatpush.bf16.msrb.mxu1 %v5181_v39 }
  0xc9   :  { %v7283_v42 = vpop.f32.mrf.mxu1 }
  0xcb   :  { %1448 = vmatpush.bf16.msra.mxu1 %v6932_v3 }
  0xcc   :  { %5042 = vmatmul.msk.bf16.gmra.mxu1 %vm366_vm0, %v5009_v40  ;;  %5174 = vmatmul.msk.bf16.gmra.mxu3 %vm366_vm0, %v5141_v41  ;;  %v5182_v40 = vld [vmem:[#allocation2 + $0x28] sm:$0xf0]  ;;  %v5025_v41 = vor.u32 %v6320_v25, %v5022_v27  ;;  %v5225_v25 = vor.u32 %v6324_v8, %v5222_v20 }
  0xcd   :  { %v5185_v45 = vor.u32 %v6352_v35, %v5182_v40  ;;  %v5033_v40 = vor.u32 %v6322_v30, %v5030_v31 }
  0xce   :  { %1217 = vmatpush.bf16.msrb.mxu2 %v5225_v25 }
  0xcf   :  { %v7299_v49 = vpop.f32.mrf.mxu3  ;;  %1019 = vmatpush.bf16.msrb.mxu3 %v5185_v45  ;;  %1449 = vmatpush.bf16.msra.mxu1 %v6953_v10 }
  0xd1   :  { %v7301_v52 = vpop.f32.mrf.mxu0  ;;  %v7303_v53 = vpop.f32.mrf.mxu1 }
  0xd3   :  { %1519 = vmatpush.bf16.msra.mxu3 %v6943_v7  ;;  %1450 = vmatpush.bf16.msra.mxu1 %v6973_v16 }
  0xd4   :  { %451 = vmatmul.bf16.gmra.mxu0 %v5005_v50  ;;  %774 = vmatmul.bf16.gmra.mxu2 %v5137_v51  ;;  %v5228_v50 = vld [vmem:[#allocation2 + $0x10] sm:$0xf]  ;;  %v6327_v51 = vld [vmem:[#allocation2 + $0x14] sm:$0x30] }
  0xd5   :  { %v5229_v55 = vor.u32 %v6327_v51, %v5228_v50  ;;  %v5028_v50 = vld [vmem:[%s9132_s4 + $0xb0] sm:$0xf]  ;;  %v6323_v51 = vld [vmem:[%s9132_s4 + $0xb4] sm:$0xf0] }
  0xd7   :  { %v7317_v58 = vpop.f32.mrf.mxu2  ;;  %v7319_v59 = vpop.f32.mrf.mxu3  ;;  %v1136_v0 = vsel %vm936_vm1, %v5229_v55, 0  ;;  %1520 = vmatpush.bf16.msra.mxu3 %v6957_v11  ;;  %1451 = vmatpush.bf16.msra.mxu1 %v6993_v22  ;;  %v6351_v55 = vld [vmem:[%s9132_s4 + $0x174] sm:$0xf0] }
  0xd8   :  { %1147 = vmatpush.bf16.msrb.mxu0 %v1136_v0 }
  0xd9   :  { %v7321_v62 = vpop.f32.mrf.mxu0  ;;  %v7323_v63 = vpop.f32.mrf.mxu1 }
  0xdb   :  { %1521 = vmatpush.bf16.msra.mxu3 %v6977_v17  ;;  %1452 = vmatpush.bf16.msra.mxu1 %v7013_v28 }
  0xdc   :  { %5043 = vmatmul.msk.bf16.gmra.mxu1 %vm366_vm0, %v5017_v60  ;;  %5175 = vmatmul.msk.bf16.gmra.mxu3 %vm366_vm0, %v5149_v61  ;;  %v5020_v60 = vld [vmem:[%s9132_s4 + $0xa0] sm:$0xf]  ;;  %v6321_v61 = vld [vmem:[%s9132_s4 + $0xa4] sm:$0xf0] }
  0xdd   :  { %v5021_v21 = vor.u32 %v6321_v61, %v5020_v60  ;;  %v5029_v60 = vor.u32 %v6323_v51, %v5028_v50  ;;  %v5161_v61 = vor.u32 %v6351_v55, %v5160_v54 }
  0xdf   :  { %v7339_v9 = vpop.f32.mrf.mxu2  ;;  %v7341_v12 = vpop.f32.mrf.mxu3  ;;  %1522 = vmatpush.bf16.msra.mxu3 %v6997_v23  ;;  %1453 = vmatpush.bf16.msra.mxu1 %v7033_v34 }
  0xe0   :  { %v807_v2 = vadd.f32 %v7319_v59, %v7339_v9  ;;  %v484_v59 = vadd.f32 %v7303_v53, %v7321_v62 }
  0xe1   :  { %v7344_v18 = vpop.f32.mrf.mxu0  ;;  %v7346_v19 = vpop.f32.mrf.mxu1 }
  0xe3   :  { %1523 = vmatpush.bf16.msra.mxu3 %v7017_v29  ;;  %1454 = vmatpush.bf16.msra.mxu1 %v7061_v44 }
  0xe4   :  { %456 = vmatmul.bf16.gmra.mxu0 %v5013_v14  ;;  %779 = vmatmul.bf16.gmra.mxu2 %v5145_v15  ;;  %v5221_v15 = vor.u32 %v6325_v6, %v5220_v5  ;;  %v805_v6 = vadd.f32 %v7299_v49, %v7317_v58  ;;  %v482_v49 = vadd.f32 %v7283_v42, %v7301_v52 }
  0xe6   :  { %1148 = vmatpush.bf16.msrb.mxu0 %v5221_v15  ;;  %v869_v20 = vpack.c.bf16 %v807_v2, %v805_v6  ;;  %v545_v25 = vpack.c.bf16 %v484_v59, %v482_v49 }
  0xe7   :  { %v7361_v37 = vpop.f32.mrf.mxu2  ;;  %v7363_v38 = vpop.f32.mrf.mxu3  ;;  %1524 = vmatpush.bf16.msra.mxu3 %v7040_v36  ;;  %1455 = vmatpush.bf16.msra.mxu1 %v7076_v48 }
  0xe8   :  { %v810_v62 = vadd.f32 %v7341_v12, %v7361_v37 }
  0xe9   :  { %v7365_v46 = vpop.f32.mrf.mxu0  ;;  %v7367_v47 = vpop.f32.mrf.mxu1 }
  0xea   :  { %v489_v12 = vadd.f32 %v7346_v19, %v7365_v46 }
  0xec   :  { %5044 = vmatmul.msk.bf16.gmra.mxu1 %vm366_vm0, %v5025_v41  ;;  %5176 = vmatmul.msk.bf16.gmra.mxu3 %vm366_vm0, %v5157_v43  ;;  %v5165_v41 = vor.u32 %v6350_v32, %v5162_v33 }
  0xef   :  { %v7388_v13 = vpop.f32.mrf.mxu2  ;;  %v7390_v14 = vpop.f32.mrf.mxu3 }
  0xf0   :  { %v812_v42 = vadd.f32 %v7363_v38, %v7388_v13  ;;  %v487_v13 = vadd.f32 %v7323_v63, %v7344_v18 }
  0xf1   :  { %v7393_v26 = vpop.f32.mrf.mxu0  ;;  %v7395_v27 = vpop.f32.mrf.mxu1 }
  0xf2   :  { %v870_v32 = vpack.c.bf16 %v812_v42, %v810_v62 }
  0xf4   :  { %461 = vmatmul.bf16.gmra.mxu0 %v5021_v21  ;;  %784 = vmatmul.bf16.gmra.mxu2 %v5153_v24 }
  0xf7   :  { %v7412_v35 = vpop.f32.mrf.mxu2  ;;  %v7414_v39 = vpop.f32.mrf.mxu3 }
  0xf8   :  { %v815_v63 = vadd.f32 %v7390_v14, %v7412_v35 }
  0xf9   :  { %v7417_v43 = vpop.f32.mrf.mxu0  ;;  %v7419_v45 = vpop.f32.mrf.mxu1 }
  0xfa   :  { %v494_v55 = vadd.f32 %v7395_v27, %v7417_v43 }
  0xfc   :  { %5045 = vmatmul.msk.bf16.gmra.mxu1 %vm366_vm0, %v5033_v40  ;;  %5177 = vmatmul.msk.bf16.gmra.mxu3 %vm366_vm0, %v5165_v41  ;;  %v546_v41 = vpack.c.bf16 %v489_v12, %v487_v13 }
  0xff   :  { %v747_v56 = vpop.f32.mrf.mxu2  ;;  %v7438_v57 = vpop.f32.mrf.mxu3 }
 0x100   :  { %v817_v19 = vadd.f32 %v7414_v39, %v747_v56  ;;  %v492_v56 = vadd.f32 %v7367_v47, %v7393_v26 }
 0x101   :  { %v7441_v0 = vpop.f32.mrf.mxu0  ;;  %v7443_v1 = vpop.f32.mrf.mxu1 }
 0x102   :  { %v871_v54 = vpack.c.bf16 %v817_v19, %v815_v63 }
 0x104   :  { %466 = vmatmul.bf16.gmra.mxu0 %v5029_v60  ;;  %789 = vmatmul.bf16.gmra.mxu2 %v5161_v61  ;;  %v547_v61 = vpack.c.bf16 %v494_v55, %v492_v56 }
 0x107   :  { %v7449_v4 = vpop.f32.mrf.mxu2  ;;  %v7451_v5 = vpop.f32.mrf.mxu3 }
 0x108   :  { %v820_v27 = vadd.f32 %v7438_v57, %v7449_v4 }
 0x109   :  { %v7455_v8 = vpop.f32.mrf.mxu0  ;;  %v7457_v15 = vpop.f32.mrf.mxu1 }
 0x10a   :  { %v499_v26 = vadd.f32 %v7443_v1, %v7455_v8 }
 0x10c   :  { %5194 = vmatmul.msk.bf16.vlgmr.msrb.gmra.mxu1 %vm899_vm2, %v869_v20  ;;  %5206 = vmatmul.msk.bf16.vlgmr.msrb.gmra.mxu3 %vm899_vm2, %v869_v20 }
 0x10d   :  { %2018 = vmatpush.bf16.msrb.mxu1 %v6932_v3  ;;  %2089 = vmatpush.bf16.msrb.mxu3 %v6943_v7 }
 0x10f   :  { %v752_v9 = vpop.f32.mrf.mxu2  ;;  %v7465_v21 = vpop.f32.mrf.mxu3 }
 0x110   :  { %v822_v2 = vadd.f32 %v7451_v5, %v752_v9  ;;  %v497_v5 = vadd.f32 %v7419_v45, %v7441_v0 }
 0x111   :  { %v7469_v58 = vpop.f32.mrf.mxu0  ;;  %v7471_v24 = vpop.f32.mrf.mxu1  ;;  %2019 = vmatpush.bf16.msrb.mxu1 %v6953_v10  ;;  %2090 = vmatpush.bf16.msrb.mxu3 %v6957_v11 }
 0x112   :  { %v872_v47 = vpack.c.bf16 %v822_v2, %v820_v27  ;;  %v548_v4 = vpack.c.bf16 %v499_v26, %v497_v5 }
 0x114   :  { %5234 = vmatmul.msk.bf16.vlgmr.msrb.gmra.mxu0 %vm899_vm2, %v545_v25  ;;  %5246 = vmatmul.msk.bf16.vlgmr.msrb.gmra.mxu2 %vm899_vm2, %v545_v25 }
 0x115   :  { %2020 = vmatpush.bf16.msrb.mxu1 %v6973_v16  ;;  %2091 = vmatpush.bf16.msrb.mxu3 %v6977_v17 }
 0x117   :  { %v7481_v52 = vpop.f32.mrf.mxu2  ;;  %v826_v53 = vpop.f32.mrf.mxu3 }
 0x118   :  { %v825_v1 = vadd.f32 %v7465_v21, %v7481_v52 }
 0x119   :  { %v7485_v30 = vpop.f32.mrf.mxu0  ;;  %v7487_v31 = vpop.f32.mrf.mxu1  ;;  %2021 = vmatpush.bf16.msrb.mxu1 %v6993_v22  ;;  %2092 = vmatpush.bf16.msrb.mxu3 %v6997_v23 }
 0x11a   :  { %v504_v45 = vadd.f32 %v7471_v24, %v7485_v30 }
 0x11c   :  { %5195 = vmatmul.msk.bf16.gmra.mxu1 %vm899_vm2, %v870_v32  ;;  %5207 = vmatmul.msk.bf16.gmra.mxu3 %vm899_vm2, %v870_v32 }
 0x11d   :  { %2022 = vmatpush.bf16.msrb.mxu1 %v7013_v28  ;;  %2093 = vmatpush.bf16.msrb.mxu3 %v7017_v29 }
 0x11f   :  { %v757_v37 = vpop.f32.mrf.mxu2  ;;  %v7497_v38 = vpop.f32.mrf.mxu3 }
 0x120   :  { %v827_v42 = vadd.f32 %v826_v53, %v757_v37  ;;  %v502_v53 = vadd.f32 %v7457_v15, %v7469_v58 }
 0x121   :  { %v7501_v33 = vpop.f32.mrf.mxu0  ;;  %v7503_v40 = vpop.f32.mrf.mxu1  ;;  %2023 = vmatpush.bf16.msrb.mxu1 %v7033_v34  ;;  %2094 = vmatpush.bf16.msrb.mxu3 %v7040_v36 }
 0x122   :  { %v873_v13 = vpack.c.bf16 %v827_v42, %v825_v1  ;;  %v549_v52 = vpack.c.bf16 %v504_v45, %v502_v53 }
 0x124   :  { %5235 = vmatmul.msk.bf16.gmra.mxu0 %vm899_vm2, %v546_v41  ;;  %5247 = vmatmul.msk.bf16.gmra.mxu2 %vm899_vm2, %v546_v41 }
 0x125   :  { %2024 = vmatpush.bf16.msrb.mxu1 %v7061_v44 }
 0x127   :  { %v760_v46 = vpop.f32.mrf.mxu2  ;;  %v831_v50 = vpop.f32.mrf.mxu3 }
 0x128   :  { %v830_v24 = vadd.f32 %v7497_v38, %v760_v46 }
 0x129   :  { %v439_v18 = vpop.f32.mrf.mxu0  ;;  %v7513_v51 = vpop.f32.mrf.mxu1  ;;  %2025 = vmatpush.bf16.msrb.mxu1 %v7076_v48 }
 0x12a   :  { %v509_v15 = vadd.f32 %v7503_v40, %v439_v18 }
 0x12c   :  { %5196 = vmatmul.msk.bf16.gmra.mxu1 %vm899_vm2, %v871_v54  ;;  %5208 = vmatmul.msk.bf16.gmra.mxu3 %vm899_vm2, %v871_v54 }
 0x12f   :  { %v762_v60 = vpop.f32.mrf.mxu2  ;;  %v7520_v39 = vpop.f32.mrf.mxu3 }
 0x130   :  { %v832_v19 = vadd.f32 %v831_v50, %v762_v60  ;;  %v507_v50 = vadd.f32 %v7487_v31, %v7501_v33 }
 0x131   :  { %v7524_v14 = vpop.f32.mrf.mxu0  ;;  %v7526_v35 = vpop.f32.mrf.mxu1 }
 0x132   :  { %v874_v56 = vpack.c.bf16 %v832_v19, %v830_v24  ;;  %v550_v38 = vpack.c.bf16 %v509_v15, %v507_v50 }
 0x134   :  { %5236 = vmatmul.msk.bf16.gmra.mxu0 %vm899_vm2, %v547_v61  ;;  %5248 = vmatmul.msk.bf16.gmra.mxu2 %vm899_vm2, %v547_v61 }
 0x137   :  { %v765_v6 = vpop.f32.mrf.mxu2  ;;  %v836_v20 = vpop.f32.mrf.mxu3 }
 0x138   :  { %v835_v40 = vadd.f32 %v7520_v39, %v765_v6 }
 0x139   :  { %v444_v43 = vpop.f32.mrf.mxu0  ;;  %v7533_v59 = vpop.f32.mrf.mxu1 }
 0x13a   :  { %v514_v31 = vadd.f32 %v7526_v35, %v444_v43 }
 0x13c   :  { %5197 = vmatmul.msk.bf16.gmra.mxu1 %vm899_vm2, %v872_v47  ;;  %5209 = vmatmul.msk.bf16.gmra.mxu3 %vm899_vm2, %v872_v47 }
 0x13f   :  { %v767_v49 = vpop.f32.mrf.mxu2  ;;  %v7539_v25 = vpop.f32.mrf.mxu3 }
 0x140   :  { %v837_v46 = vadd.f32 %v836_v20, %v767_v49  ;;  %v512_v20 = vadd.f32 %v7513_v51, %v7524_v14 }
 0x141   :  { %v7543_v9 = vpop.f32.mrf.mxu0  ;;  %v7545_v57 = vpop.f32.mrf.mxu1 }
 0x142   :  { %v875_v5 = vpack.c.bf16 %v837_v46, %v835_v40  ;;  %v551_v39 = vpack.c.bf16 %v514_v31, %v512_v20 }
 0x144   :  { %5237 = vmatmul.msk.bf16.gmra.mxu0 %vm899_vm2, %v548_v4  ;;  %5249 = vmatmul.msk.bf16.gmra.mxu2 %vm899_vm2, %v548_v4 }
 0x147   :  { %v770_v62 = vpop.f32.mrf.mxu2  ;;  %v841_v32 = vpop.f32.mrf.mxu3 }
 0x148   :  { %v840_v35 = vadd.f32 %v7539_v25, %v770_v62 }
 0x149   :  { %v449_v8 = vpop.f32.mrf.mxu0  ;;  %v7551_v12 = vpop.f32.mrf.mxu1 }
 0x14a   :  { %v519_v51 = vadd.f32 %v7545_v57, %v449_v8 }
 0x14c   :  { %5198 = vmatmul.msk.bf16.gmra.mxu1 %vm899_vm2, %v873_v13  ;;  %5210 = vmatmul.msk.bf16.gmra.mxu3 %vm899_vm2, %v873_v13 }
 0x14f   :  { %v772_v0 = vpop.f32.mrf.mxu2  ;;  %v7557_v41 = vpop.f32.mrf.mxu3 }
 0x150   :  { %v842_v6 = vadd.f32 %v841_v32, %v772_v0  ;;  %v517_v32 = vadd.f32 %v7533_v59, %v7543_v9 }
 0x151   :  { %v7561_v37 = vpop.f32.mrf.mxu0  ;;  %v7563_v21 = vpop.f32.mrf.mxu1 }
 0x152   :  { %v876_v53 = vpack.c.bf16 %v842_v6, %v840_v35  ;;  %v552_v62 = vpack.c.bf16 %v519_v51, %v517_v32  ;;  %v522_v46 = vadd.f32 %v7551_v12, %v7561_v37 }
 0x154   :  { %5238 = vmatmul.msk.bf16.gmra.mxu0 %vm899_vm2, %v549_v52  ;;  %5250 = vmatmul.msk.bf16.gmra.mxu2 %vm899_vm2, %v549_v52 }
 0x157   :  { %v775_v63 = vpop.f32.mrf.mxu2  ;;  %v846_v54 = vpop.f32.mrf.mxu3 }
 0x158   :  { %v845_v57 = vadd.f32 %v7557_v41, %v775_v63 }
 0x159   :  { %v454_v30 = vpop.f32.mrf.mxu0  ;;  %v7568_v55 = vpop.f32.mrf.mxu1 }
 0x15a   :  { %v524_v59 = vadd.f32 %v7563_v21, %v454_v30 }
 0x15c   :  { %5199 = vmatmul.msk.bf16.gmra.mxu1 %vm899_vm2, %v874_v56  ;;  %5211 = vmatmul.msk.bf16.gmra.mxu3 %vm899_vm2, %v874_v56  ;;  %v553_v40 = vpack.c.bf16 %v524_v59, %v522_v46 }
 0x15f   :  { %v777_v58 = vpop.f32.mrf.mxu2  ;;  %v7573_v61 = vpop.f32.mrf.mxu3 }
 0x160   :  { %v847_v19 = vadd.f32 %v846_v54, %v777_v58 }
 0x161   :  { %v7577_v60 = vpop.f32.mrf.mxu0  ;;  %v7579_v2 = vpop.f32.mrf.mxu1 }
 0x162   :  { %v877_v50 = vpack.c.bf16 %v847_v19, %v845_v57 }
 0x164   :  { %5239 = vmatmul.msk.bf16.gmra.mxu0 %vm899_vm2, %v550_v38  ;;  %5251 = vmatmul.msk.bf16.gmra.mxu2 %vm899_vm2, %v550_v38 }
 0x167   :  { %v780_v27 = vpop.f32.mrf.mxu2  ;;  %v851_v47 = vpop.f32.mrf.mxu3 }
 0x168   :  { %v850_v21 = vadd.f32 %v7573_v61, %v780_v27 }
 0x169   :  { %v459_v18 = vpop.f32.mrf.mxu0  ;;  %v7584_v26 = vpop.f32.mrf.mxu1 }
 0x16c   :  { %5200 = vmatmul.msk.bf16.gmra.mxu1 %vm899_vm2, %v875_v5  ;;  %5212 = vmatmul.msk.bf16.gmra.mxu3 %vm899_vm2, %v875_v5 }
 0x16f   :  { %v782_v33 = vpop.f32.mrf.mxu2  ;;  %v7589_v4 = vpop.f32.mrf.mxu3 }
 0x170   :  { %v852_v63 = vadd.f32 %v851_v47, %v782_v33  ;;  %v527_v47 = vadd.f32 %v7568_v55, %v7577_v60 }
 0x171   :  { %v7593_v49 = vpop.f32.mrf.mxu0  ;;  %v7595_v42 = vpop.f32.mrf.mxu1 }
 0x172   :  { %v878_v37 = vpack.c.bf16 %v852_v63, %v850_v21 }
 0x174   :  { %5240 = vmatmul.msk.bf16.gmra.mxu0 %vm899_vm2, %v551_v39  ;;  %5252 = vmatmul.msk.bf16.gmra.mxu2 %vm899_vm2, %v551_v39  ;;  %v529_v39 = vadd.f32 %v7579_v2, %v459_v18 }
 0x176   :  { %v554_v27 = vpack.c.bf16 %v529_v39, %v527_v47 }
 0x177   :  { %v785_v1 = vpop.f32.mrf.mxu2  ;;  %v856_v13 = vpop.f32.mrf.mxu3 }
 0x178   :  { %v855_v18 = vadd.f32 %v7589_v4, %v785_v1 }
 0x179   :  { %v7600_v43 = vpop.f32.mrf.mxu0  ;;  %v7602_v45 = vpop.f32.mrf.mxu1 }
 0x17a   :  { %v534_v57 = vadd.f32 %v7595_v42, %v7600_v43 }
 0x17c   :  { %5201 = vmatmul.msk.bf16.gmra.mxu1 %vm899_vm2, %v876_v53  ;;  %5213 = vmatmul.msk.bf16.gmra.mxu3 %vm899_vm2, %v876_v53 }
 0x17f   :  { %v787_v14 = vpop.f32.mrf.mxu2  ;;  %v7607_v52 = vpop.f32.mrf.mxu3 }
 0x180   :  { %v857_v51 = vadd.f32 %v856_v13, %v787_v14  ;;  %v532_v14 = vadd.f32 %v7584_v26, %v7593_v49 }
 0x181   :  { %v7611_v0 = vpop.f32.mrf.mxu0  ;;  %v7613_v25 = vpop.f32.mrf.mxu1 }
 0x182   :  { %v879_v60 = vpack.c.bf16 %v857_v51, %v855_v18 }
 0x184   :  { %5241 = vmatmul.msk.bf16.gmra.mxu0 %vm899_vm2, %v552_v62  ;;  %5253 = vmatmul.msk.bf16.gmra.mxu2 %vm899_vm2, %v552_v62 }
 0x187   :  { %v790_v24 = vpop.f32.mrf.mxu2  ;;  %v861_v56 = vpop.f32.mrf.mxu3 }
 0x188   :  { %v860_v43 = vadd.f32 %v7607_v52, %v790_v24 }
 0x189   :  { %v7618_v8 = vpop.f32.mrf.mxu0  ;;  %v952_v15 = vpop.f32.mrf.mxu1 }
 0x18a   :  { %v539_v63 = vadd.f32 %v7613_v25, %v7618_v8  ;;  %v5284_v25 = vld [vmem:[%s9132_s4 + $0x180] sm:$0xf]  ;;  %v6357_v8 = vld [vmem:[%s9132_s4 + $0x184] sm:$0xf0] }
 0x18b   :  { %v5285_v47 = vor.u32 %v6357_v8, %v5284_v25 }
 0x18c   :  { %5202 = vmatmul.msk.bf16.gmra.mxu1 %vm899_vm2, %v877_v50  ;;  %5214 = vmatmul.msk.bf16.gmra.mxu3 %vm899_vm2, %v877_v50  ;;  %v555_v50 = vpack.c.bf16 %v534_v57, %v532_v14 }
 0x18f   :  { %v792_v9 = vpop.f32.mrf.mxu2  ;;  %v1021_v38 = vpop.f32.mrf.mxu3 }
 0x191   :  { %v7625_v54 = vpop.f32.mrf.mxu1  ;;  %v1150_v58 = vpop.f32.mrf.mxu0 }
 0x192   :  { %v7627_v41 = vadd.f32 %v1150_v58, %v952_v15 }
 0x194   :  { %5242 = vmatmul.msk.bf16.gmra.mxu0 %vm899_vm2, %v553_v40  ;;  %5254 = vmatmul.msk.bf16.gmra.mxu2 %vm899_vm2, %v553_v40 }
 0x197   :  { %v7631_v5 = vpop.f32.mrf.mxu3  ;;  %v1219_v31 = vpop.f32.mrf.mxu2 }
 0x198   :  { %v7634_v30 = vadd.f32 %v1219_v31, %v1021_v38  ;;  %v862_v38 = vadd.f32 %v861_v56, %v792_v9  ;;  %v537_v9 = vadd.f32 %v7602_v45, %v7611_v0  ;;  %v6356_v45 = vld [vmem:[%s9132_s4 + $0x184] sm:$0xf]  ;;  %v5286_v0 = vld [vmem:[%s9132_s4 + $0x188] sm:$0xf0] }
 0x199   :  { %v957_v20 = vpop.f32.mrf.mxu1  ;;  %v7636_v12 = vpop.f32.mrf.mxu0 }
 0x19a   :  { %v880_v49 = vpack.c.bf16 %v862_v38, %v860_v43  ;;  %v556_v21 = vpack.c.bf16 %v539_v63, %v537_v9 }
 0x19c   :  { %5203 = vmatmul.msk.bf16.gmra.mxu1 %vm899_vm2, %v878_v37  ;;  %5215 = vmatmul.msk.bf16.gmra.mxu3 %vm899_vm2, %v878_v37 }
 0x19f   :  { %v1026_v6 = vpop.f32.mrf.mxu3  ;;  %v7641_v35 = vpop.f32.mrf.mxu2 }
 0x1a1   :  { %v7645_v33 = vpop.f32.mrf.mxu1  ;;  %v1155_v61 = vpop.f32.mrf.mxu0 }
 0x1a2   :  { %v7647_v53 = vadd.f32 %v1155_v61, %v957_v20  ;;  %v5289_v61 = vor.u32 %v6356_v45, %v5286_v0 }
 0x1a4   :  { %5243 = vmatmul.msk.bf16.gmra.mxu0 %vm899_vm2, %v554_v27  ;;  %5255 = vmatmul.msk.bf16.gmra.mxu2 %vm899_vm2, %v554_v27 }
 0x1a7   :  { %v7651_v32 = vpop.f32.mrf.mxu3  ;;  %v1224_v2 = vpop.f32.mrf.mxu2 }
 0x1a8   :  { %v7654_v62 = vadd.f32 %v1224_v2, %v1026_v6 }
 0x1a9   :  { %v962_v19 = vpop.f32.mrf.mxu1  ;;  %v7656_v55 = vpop.f32.mrf.mxu0 }
 0x1ac   :  { %5204 = vmatmul.msk.bf16.gmra.mxu1 %vm899_vm2, %v879_v60  ;;  %5216 = vmatmul.msk.bf16.gmra.mxu3 %vm899_vm2, %v879_v60 }
 0x1af   :  { %v1031_v15 = vpop.f32.mrf.mxu3  ;;  %v7662_v13 = vpop.f32.mrf.mxu2 }
 0x1b1   :  { %v7666_v4 = vpop.f32.mrf.mxu1  ;;  %v1160_v1 = vpop.f32.mrf.mxu0 }
 0x1b2   :  { %v7668_v59 = vadd.f32 %v1160_v1, %v962_v19 }
 0x1b4   :  { %5244 = vmatmul.msk.bf16.gmra.mxu0 %vm899_vm2, %v555_v50  ;;  %5256 = vmatmul.msk.bf16.gmra.mxu2 %vm899_vm2, %v555_v50 }
 0x1b7   :  { %v7672_v46 = vpop.f32.mrf.mxu3  ;;  %v1229_v42 = vpop.f32.mrf.mxu2 }
 0x1b8   :  { %v7675_v58 = vadd.f32 %v1229_v42, %v1031_v15  ;;  %v5292_v15 = vld [vmem:[%s9132_s4 + $0x190] sm:$0xf] }
 0x1b9   :  { %v967_v40 = vpop.f32.mrf.mxu1  ;;  %v7677_v26 = vpop.f32.mrf.mxu0 }
 0x1bc   :  { %5205 = vmatmul.msk.bf16.gmra.mxu1 %vm899_vm2, %v880_v49  ;;  %5217 = vmatmul.msk.bf16.gmra.mxu3 %vm899_vm2, %v880_v49 }
 0x1bf   :  { %v1036_v31 = vpop.f32.mrf.mxu3  ;;  %v7683_v56 = vpop.f32.mrf.mxu2 }
 0x1c1   :  { %v7687_v52 = vpop.f32.mrf.mxu1  ;;  %v1165_v24 = vpop.f32.mrf.mxu0 }
 0x1c2   :  { %v7689_v20 = vadd.f32 %v1165_v24, %v967_v40 }
 0x1c4   :  { %5245 = vmatmul.msk.bf16.gmra.mxu0 %vm899_vm2, %v556_v21  ;;  %5257 = vmatmul.msk.bf16.gmra.mxu2 %vm899_vm2, %v556_v21 }
 0x1c7   :  { %v7705_v37 = vpop.f32.mrf.mxu3  ;;  %v1234_v39 = vpop.f32.mrf.mxu2 }
 0x1c8   :  { %v7707_v6 = vadd.f32 %v1234_v39, %v1036_v31 }
 0x1c9   :  { %v972_v27 = vpop.f32.mrf.mxu1  ;;  %v7709_v51 = vpop.f32.mrf.mxu0 }
 0x1cc   :  { %1456 = vmatmul.bf16.vlgmr.msra.gmra.mxu1 %v5285_v47  ;;  %5378 = vmatmul.msk.bf16.vlgmr.msra.gmra.mxu3 %vm366_vm0, %v5289_v61  ;;  %v5308_v47 = vld [vmem:[%s9132_s4 + $0x1b0] sm:$0xf]  ;;  %v6363_v61 = vld [vmem:[%s9132_s4 + $0x1b4] sm:$0xf0] }
 0x1cd   :  { %2588 = vmatpush.bf16.msra.mxu1 %v6932_v3  ;;  %2659 = vmatpush.bf16.msra.mxu3 %v6943_v7  ;;  %v6359_v3 = vld [vmem:[%s9132_s4 + $0x194] sm:$0xf0]  ;;  %v6358_v7 = vld [vmem:[%s9132_s4 + $0x194] sm:$0xf] }
 0x1ce   :  { %v5293_v50 = vor.u32 %v6359_v3, %v5292_v15  ;;  %v5309_v3 = vor.u32 %v6363_v61, %v5308_v47 }
 0x1cf   :  { %v1041_v2 = vpop.f32.mrf.mxu3  ;;  %v7714_v18 = vpop.f32.mrf.mxu2 }
 0x1d1   :  { %v7716_v19 = vpop.f32.mrf.mxu1  ;;  %v1170_v60 = vpop.f32.mrf.mxu0  ;;  %2589 = vmatpush.bf16.msra.mxu1 %v6953_v10  ;;  %2660 = vmatpush.bf16.msra.mxu3 %v6957_v11  ;;  %v5294_v10 = vld [vmem:[%s9132_s4 + $0x198] sm:$0xf0] }
 0x1d2   :  { %v7720_v57 = vadd.f32 %v1170_v60, %v972_v27  ;;  %v5297_v38 = vor.u32 %v6358_v7, %v5294_v10  ;;  %v5310_v27 = vld [vmem:[%s9132_s4 + $0x1b8] sm:$0xf0] }
 0x1d5   :  { %2590 = vmatpush.bf16.msra.mxu1 %v6973_v16  ;;  %2661 = vmatpush.bf16.msra.mxu3 %v6977_v17 }
 0x1d7   :  { %v7736_v11 = vpop.f32.mrf.mxu3  ;;  %v1239_v14 = vpop.f32.mrf.mxu2 }
 0x1d8   :  { %v7738_v1 = vadd.f32 %v1239_v14, %v1041_v2 }
 0x1d9   :  { %v977_v42 = vpop.f32.mrf.mxu1  ;;  %v7740_v43 = vpop.f32.mrf.mxu0  ;;  %2591 = vmatpush.bf16.msra.mxu1 %v6993_v22  ;;  %2662 = vmatpush.bf16.msra.mxu3 %v6997_v23  ;;  %v5300_v23 = vld [vmem:[%s9132_s4 + $0x1a0] sm:$0xf] }
 0x1dc   :  { %1461 = vmatmul.bf16.gmra.mxu1 %v5293_v50  ;;  %5379 = vmatmul.msk.bf16.gmra.mxu3 %vm366_vm0, %v5297_v38 }
 0x1dd   :  { %2592 = vmatpush.bf16.msra.mxu1 %v7013_v28  ;;  %2663 = vmatpush.bf16.msra.mxu3 %v7017_v29  ;;  %v6361_v28 = vld [vmem:[%s9132_s4 + $0x1a4] sm:$0xf0]  ;;  %v6360_v29 = vld [vmem:[%s9132_s4 + $0x1a4] sm:$0xf] }
 0x1de   :  { %v5301_v9 = vor.u32 %v6361_v28, %v5300_v23  ;;  %v5316_v23 = vld [vmem:[%s9132_s4 + $0x1c0] sm:$0xf]  ;;  %v6365_v28 = vld [vmem:[%s9132_s4 + $0x1c4] sm:$0xf0] }
 0x1df   :  { %v1046_v16 = vpop.f32.mrf.mxu3  ;;  %v7747_v17 = vpop.f32.mrf.mxu2 }
 0x1e1   :  { %v7749_v40 = vpop.f32.mrf.mxu1  ;;  %v1175_v49 = vpop.f32.mrf.mxu0  ;;  %2593 = vmatpush.bf16.msra.mxu1 %v7033_v34  ;;  %2664 = vmatpush.bf16.msra.mxu3 %v7040_v36  ;;  %v5302_v34 = vld [vmem:[%s9132_s4 + $0x1a8] sm:$0xf0] }
 0x1e2   :  { %v7753_v22 = vadd.f32 %v1175_v49, %v977_v42  ;;  %v5305_v24 = vor.u32 %v6360_v29, %v5302_v34  ;;  %v6364_v29 = vld [vmem:[%s9132_s4 + $0x1c4] sm:$0xf]  ;;  %v5318_v34 = vld [vmem:[%s9132_s4 + $0x1c8] sm:$0xf0] }
 0x1e5   :  { %2594 = vmatpush.bf16.msra.mxu1 %v7061_v44 }
 0x1e7   :  { %v7768_v36 = vpop.f32.mrf.mxu3  ;;  %v1244_v63 = vpop.f32.mrf.mxu2 }
 0x1e8   :  { %v7770_v31 = vadd.f32 %v1244_v63, %v1046_v16 }
 0x1e9   :  { %v982_v21 = vpop.f32.mrf.mxu1  ;;  %v7772_v25 = vpop.f32.mrf.mxu0  ;;  %2595 = vmatpush.bf16.msra.mxu1 %v7076_v48  ;;  %v6362_v48 = vld [vmem:[%s9132_s4 + $0x1b4] sm:$0xf] }
 0x1ea   :  { %v5313_v7 = vor.u32 %v6362_v48, %v5310_v27 }
 0x1ec   :  { %1466 = vmatmul.bf16.gmra.mxu1 %v5301_v9  ;;  %5380 = vmatmul.msk.bf16.gmra.mxu3 %vm366_vm0, %v5305_v24 }
 0x1ef   :  { %v1051_v8 = vpop.f32.mrf.mxu3  ;;  %v7776_v45 = vpop.f32.mrf.mxu2 }
 0x1f1   :  { %v7778_v0 = vpop.f32.mrf.mxu1  ;;  %v1180_v44 = vpop.f32.mrf.mxu0 }
 0x1f2   :  { %v7780_v39 = vadd.f32 %v1180_v44, %v982_v21  ;;  %v5317_v21 = vor.u32 %v6365_v28, %v5316_v23 }
 0x1f7   :  { %v7794_v2 = vpop.f32.mrf.mxu3  ;;  %v1249_v60 = vpop.f32.mrf.mxu2 }
 0x1f8   :  { %v7796_v15 = vadd.f32 %v1249_v60, %v1051_v8  ;;  %v5321_v8 = vor.u32 %v6364_v29, %v5318_v34 }
 0x1f9   :  { %v987_v10 = vpop.f32.mrf.mxu1  ;;  %v7798_v14 = vpop.f32.mrf.mxu0 }
 0x1fc   :  { %1471 = vmatmul.bf16.gmra.mxu1 %v5309_v3  ;;  %5381 = vmatmul.msk.bf16.gmra.mxu3 %vm366_vm0, %v5313_v7  ;;  %v5324_v7 = vld [vmem:[%s9132_s4 + $0x1d0] sm:$0xf] }
 0x1ff   :  { %v1056_v50 = vpop.f32.mrf.mxu3  ;;  %v7801_v38 = vpop.f32.mrf.mxu2 }
 0x201   :  { %v7803_v42 = vpop.f32.mrf.mxu1  ;;  %v1185_v16 = vpop.f32.mrf.mxu0 }
 0x202   :  { %v7805_v49 = vadd.f32 %v1185_v16, %v987_v10  ;;  %v6367_v10 = vld [vmem:[%s9132_s4 + $0x1d4] sm:$0xf0]  ;;  %v5326_v16 = vld [vmem:[%s9132_s4 + $0x1d8] sm:$0xf0] }
 0x203   :  { %v5325_v34 = vor.u32 %v6367_v10, %v5324_v7  ;;  %v6369_v7 = vld [vmem:[%s9132_s4 + $0x1e4] sm:$0xf0]  ;;  %v6368_v10 = vld [vmem:[%s9132_s4 + $0x1e4] sm:$0xf] }
 0x207   :  { %v7819_v63 = vpop.f32.mrf.mxu3  ;;  %v1254_v9 = vpop.f32.mrf.mxu2 }
 0x208   :  { %9133 = vst [vmem:[#allocation21_spill] sm:$0xff] %v7819_v63  ;;  %v7821_v24 = vadd.f32 %v1254_v9, %v1056_v50  ;;  %v6366_v50 = vld [vmem:[%s9132_s4 + $0x1d4] sm:$0xf] }
 0x209   :  { %v992_v44 = vpop.f32.mrf.mxu1  ;;  %v7823_v47 = vpop.f32.mrf.mxu0  ;;  %v5329_v9 = vor.u32 %v6366_v50, %v5326_v16  ;;  %v5334_v50 = vld [vmem:[%s9132_s4 + $0x1e8] sm:$0xf0] }
 0x20a   :  { %9134 = vst [vmem:[#allocation22_spill] sm:$0xff] %v7821_v24 }
 0x20b   :  { %9135 = vst [vmem:[#allocation23_spill] sm:$0xff] %v7823_v47 }
 0x20c   :  { %1476 = vmatmul.bf16.gmra.mxu1 %v5317_v21  ;;  %5382 = vmatmul.msk.bf16.gmra.mxu3 %vm366_vm0, %v5321_v8 }
 0x20f   :  { %v1061_v61 = vpop.f32.mrf.mxu3  ;;  %v7826_v48 = vpop.f32.mrf.mxu2 }
 0x210   :  { %9136 = vst [vmem:[#allocation24_spill] sm:$0xff] %v7826_v48 }
 0x211   :  { %v7828_v27 = vpop.f32.mrf.mxu1  ;;  %v1190_v60 = vpop.f32.mrf.mxu0 }
 0x212   :  { %9137 = vst [vmem:[#allocation25_spill] sm:$0xff] %v7828_v27  ;;  %v7830_v3 = vadd.f32 %v1190_v60, %v992_v44 }
 0x214   :  { %9138 = vst [vmem:[#allocation26_spill] sm:$0xff] %v7830_v3 }
 0x217   :  { %v7844_v23 = vpop.f32.mrf.mxu3  ;;  %v1259_v28 = vpop.f32.mrf.mxu2 }
 0x218   :  { %9139 = vst [vmem:[#allocation27_spill] sm:$0xff] %v7844_v23  ;;  %v7846_v29 = vadd.f32 %v1259_v28, %v1061_v61  ;;  %v5332_v61 = vld [vmem:[%s9132_s4 + $0x1e0] sm:$0xf] }
 0x219   :  { %v997_v21 = vpop.f32.mrf.mxu1  ;;  %v7848_v8 = vpop.f32.mrf.mxu0 }
 0x21a   :  { %9140 = vst [vmem:[#allocation28_spill] sm:$0xff] %v7846_v29 }
 0x21b   :  { %9141 = vst [vmem:[#allocation29_spill] sm:$0xff] %v7848_v8 }
 0x21c   :  { %1481 = vmatmul.bf16.gmra.mxu1 %v5325_v34  ;;  %5383 = vmatmul.msk.bf16.gmra.mxu3 %vm366_vm0, %v5329_v9  ;;  %v5333_v34 = vor.u32 %v6369_v7, %v5332_v61  ;;  %v5337_v9 = vor.u32 %v6368_v10, %v5334_v50  ;;  %v5400_v61 = vld [vmem:[#allocation2 + $0x50] sm:$0xf]  ;;  %v6383_v7 = vld [vmem:[#allocation2 + $0x54] sm:$0x30] }
 0x21d   :  { %v5401_v50 = vor.u32 %v6383_v7, %v5400_v61 }
 0x21f   :  { %v1066_v44 = vpop.f32.mrf.mxu3  ;;  %v7851_v60 = vpop.f32.mrf.mxu2 }
 0x220   :  { %9142 = vst [vmem:[#allocation30_spill] sm:$0xff] %v7851_v60  ;;  %v5402_v60 = vld [vmem:[#allocation2 + $0x58] sm:$0x30] }
 0x221   :  { %v7853_v27 = vpop.f32.mrf.mxu1  ;;  %v1195_v3 = vpop.f32.mrf.mxu0 }
 0x222   :  { %9143 = vst [vmem:[#allocation31_spill] sm:$0xff] %v7853_v27  ;;  %v7855_v48 = vadd.f32 %v1195_v3, %v997_v21 }
 0x224   :  { %9144 = vst [vmem:[#allocation32_spill] sm:$0xff] %v7855_v48  ;;  %v6382_v48 = vld [vmem:[#allocation2 + $0x54] sm:$0xf] }
 0x225   :  { %v5405_v23 = vor.u32 %v6382_v48, %v5402_v60  ;;  %v1658_v48 = vsel %vm936_vm1, %v5401_v50, 0  ;;  %v6371_v60 = vld [vmem:[%s9132_s4 + $0x1f4] sm:$0xf0]  ;;  %v5394_v50 = vld [vmem:[#allocation2 + $0x48] sm:$0xf0] }
 0x226   :  { %1669 = vmatpush.bf16.msra.mxu0 %v1658_v48 }
 0x227   :  { %v7869_v16 = vpop.f32.mrf.mxu3  ;;  %v1264_v3 = vpop.f32.mrf.mxu2  ;;  %v1661_v63 = vsel %vm936_vm1, %v5405_v23, 0  ;;  %v5342_v23 = vld [vmem:[%s9132_s4 + $0x1f8] sm:$0xf0] }
 0x228   :  { %9145 = vst [vmem:[#allocation33_spill] sm:$0xff] %v7869_v16  ;;  %v7871_v28 = vadd.f32 %v1264_v3, %v1066_v44  ;;  %1738 = vmatpush.bf16.msra.mxu2 %v1661_v63  ;;  %v5340_v3 = vld [vmem:[%s9132_s4 + $0x1f0] sm:$0xf]  ;;  %v6370_v63 = vld [vmem:[%s9132_s4 + $0x1f4] sm:$0xf] }
 0x229   :  { %v1002_v21 = vpop.f32.mrf.mxu1  ;;  %v7873_v27 = vpop.f32.mrf.mxu0 }
 0x22a   :  { %9146 = vst [vmem:[#allocation34_spill] sm:$0xff] %v7871_v28 }
 0x22b   :  { %9147 = vst [vmem:[#allocation35_spill] sm:$0xff] %v7873_v27 }
 0x22c   :  { %1486 = vmatmul.bf16.gmra.mxu1 %v5333_v34  ;;  %5384 = vmatmul.msk.bf16.gmra.mxu3 %vm366_vm0, %v5337_v9  ;;  %v5392_v34 = vld [vmem:[#allocation2 + $0x40] sm:$0xf]  ;;  %v6381_v9 = vld [vmem:[#allocation2 + $0x44] sm:$0xf0] }
 0x22d   :  { %v5393_v7 = vor.u32 %v6381_v9, %v5392_v34 }
 0x22f   :  { %v1071_v29 = vpop.f32.mrf.mxu3  ;;  %v7876_v8 = vpop.f32.mrf.mxu2  ;;  %1670 = vmatpush.bf16.msra.mxu0 %v5393_v7 }
 0x230   :  { %9148 = vst [vmem:[#allocation36_spill] sm:$0xff] %v7876_v8  ;;  %v5345_v8 = vor.u32 %v6370_v63, %v5342_v23 }
 0x231   :  { %v7879_v16 = vpop.f32.mrf.mxu1  ;;  %v1200_v44 = vpop.f32.mrf.mxu0 }
 0x232   :  { %9149 = vst [vmem:[#allocation37_spill] sm:$0xff] %v7879_v16  ;;  %v7881_v10 = vadd.f32 %v1200_v44, %v1002_v21  ;;  %v6380_v21 = vld [vmem:[#allocation2 + $0x44] sm:$0xf] }
 0x233   :  { %v5397_v28 = vor.u32 %v6380_v21, %v5394_v50  ;;  %v5356_v50 = vld [vmem:[%s9132_s4 + $0x210] sm:$0xf] }
 0x234   :  { %9150 = vst [vmem:[#allocation38_spill] sm:$0xff] %v7881_v10  ;;  %v5341_v10 = vor.u32 %v6371_v60, %v5340_v3  ;;  %v6373_v3 = vld [vmem:[%s9132_s4 + $0x204] sm:$0xf0] }
 0x235   :  { %1739 = vmatpush.bf16.msra.mxu2 %v5397_v28  ;;  %v5350_v28 = vld [vmem:[%s9132_s4 + $0x208] sm:$0xf0] }
 0x237   :  { %v7896_v44 = vpop.f32.mrf.mxu3  ;;  %v1269_v61 = vpop.f32.mrf.mxu2 }
 0x238   :  { %9151 = vst [vmem:[#allocation39_spill] sm:$0xff] %v7896_v44  ;;  %v7898_v16 = vadd.f32 %v1269_v61, %v1071_v29  ;;  %v5348_v29 = vld [vmem:[%s9132_s4 + $0x200] sm:$0xf] }
 0x239   :  { %v1007_v27 = vpop.f32.mrf.mxu1  ;;  %v7900_v24 = vpop.f32.mrf.mxu0  ;;  %v5349_v63 = vor.u32 %v6373_v3, %v5348_v29  ;;  %v5358_v29 = vld [vmem:[%s9132_s4 + $0x218] sm:$0xf0] }
 0x23a   :  { %9152 = vst [vmem:[#allocation40_spill] sm:$0xff] %v7898_v16 }
 0x23c   :  { %1491 = vmatmul.bf16.gmra.mxu1 %v5341_v10  ;;  %5385 = vmatmul.msk.bf16.gmra.mxu3 %vm366_vm0, %v5345_v8  ;;  %v6372_v8 = vld [vmem:[%s9132_s4 + $0x204] sm:$0xf] }
 0x23d   :  { %v5353_v23 = vor.u32 %v6372_v8, %v5350_v28 }
 0x23f   :  { %v1076_v48 = vpop.f32.mrf.mxu3  ;;  %v7903_v47 = vpop.f32.mrf.mxu2 }
 0x240   :  { %9153 = vst [vmem:[#allocation41_spill] sm:$0xff] %v7903_v47 }
 0x241   :  { %v7905_v44 = vpop.f32.mrf.mxu1  ;;  %v1205_v34 = vpop.f32.mrf.mxu0 }
 0x242   :  { %9154 = vst [vmem:[#allocation42_spill] sm:$0xff] %v7905_v44  ;;  %v7907_v9 = vadd.f32 %v1205_v34, %v1007_v27  ;;  %v6375_v34 = vld [vmem:[%s9132_s4 + $0x214] sm:$0xf0] }
 0x244   :  { %9155 = vst [vmem:[#allocation43_spill] sm:$0xff] %v7907_v9  ;;  %v5364_v9 = vld [vmem:[%s9132_s4 + $0x220] sm:$0xf] }
 0x247   :  { %v7921_v10 = vpop.f32.mrf.mxu3  ;;  %v1274_v27 = vpop.f32.mrf.mxu2 }
 0x248   :  { %9156 = vst [vmem:[#allocation44_spill] sm:$0xff] %v7921_v10  ;;  %v7923_v60 = vadd.f32 %v1274_v27, %v1076_v48  ;;  %v6374_v48 = vld [vmem:[%s9132_s4 + $0x214] sm:$0xf]  ;;  %v5357_v27 = vor.u32 %v6375_v34, %v5356_v50 }
 0x249   :  { %v1457_v21 = vpop.f32.mrf.mxu1 }
 0x24a   :  { %9157 = vst [vmem:[#allocation45_spill] sm:$0xff] %v7923_v60 }
 0x24c   :  { %1496 = vmatmul.bf16.gmra.mxu1 %v5349_v63  ;;  %5386 = vmatmul.msk.bf16.gmra.mxu3 %vm366_vm0, %v5353_v23  ;;  %v5361_v63 = vor.u32 %v6374_v48, %v5358_v29 }
 0x24f   :  { %v1526_v61 = vpop.f32.mrf.mxu3 }
 0x250   :  { %v1527_v8 = vadd.f32 %v1526_v61, %v1457_v21  ;;  %v6377_v21 = vld [vmem:[%s9132_s4 + $0x224] sm:$0xf0]  ;;  %v6376_v61 = vld [vmem:[%s9132_s4 + $0x224] sm:$0xf] }
 0x251   :  { %v1459_v7 = vpop.f32.mrf.mxu1  ;;  %v5365_v48 = vor.u32 %v6377_v21, %v5364_v9  ;;  %v6378_v9 = vld [vmem:[%s9132_s4 + $0x234] sm:$0xf] }
 0x257   :  { %v1528_v3 = vpop.f32.mrf.mxu3 }
 0x258   :  { %v1529_v28 = vadd.f32 %v1528_v3, %v1459_v7  ;;  %v5366_v7 = vld [vmem:[%s9132_s4 + $0x228] sm:$0xf0] }
 0x259   :  { %v1462_v23 = vpop.f32.mrf.mxu1  ;;  %v5369_v29 = vor.u32 %v6376_v61, %v5366_v7 }
 0x25a   :  { %v1591_v10 = vpack.c.bf16 %v1529_v28, %v1527_v8 }
 0x25c   :  { %1501 = vmatmul.bf16.gmra.mxu1 %v5357_v27  ;;  %5387 = vmatmul.msk.bf16.gmra.mxu3 %vm366_vm0, %v5361_v63  ;;  %v5372_v63 = vld [vmem:[%s9132_s4 + $0x230] sm:$0xf] }
 0x25d   :  { %5406 = vmatmul.msk.bf16.vlgmr.msra.gmra.mxu0 %vm899_vm2, %v1591_v10  ;;  %5418 = vmatmul.msk.bf16.vlgmr.msra.gmra.mxu2 %vm899_vm2, %v1591_v10 }
 0x25f   :  { %v1531_v60 = vpop.f32.mrf.mxu3 }
 0x260   :  { %v1532_v10 = vadd.f32 %v1531_v60, %v1462_v23  ;;  %v5374_v60 = vld [vmem:[%s9132_s4 + $0x238] sm:$0xf0] }
 0x261   :  { %v1464_v44 = vpop.f32.mrf.mxu1 }
 0x267   :  { %v1533_v50 = vpop.f32.mrf.mxu3 }
 0x268   :  { %v1534_v34 = vadd.f32 %v1533_v50, %v1464_v44  ;;  %v6379_v44 = vld [vmem:[%s9132_s4 + $0x234] sm:$0xf0]  ;;  %v5377_v50 = vor.u32 %v6378_v9, %v5374_v60 }
 0x269   :  { %v1467_v3 = vpop.f32.mrf.mxu1  ;;  %v5373_v7 = vor.u32 %v6379_v44, %v5372_v63 }
 0x26a   :  { %v1592_v8 = vpack.c.bf16 %v1534_v34, %v1532_v10 }
 0x26c   :  { %1506 = vmatmul.bf16.gmra.mxu1 %v5365_v48  ;;  %5388 = vmatmul.msk.bf16.gmra.mxu3 %vm366_vm0, %v5369_v29 }
 0x26d   :  { %5407 = vmatmul.msk.bf16.gmra.mxu0 %vm899_vm2, %v1592_v8  ;;  %5419 = vmatmul.msk.bf16.gmra.mxu2 %vm899_vm2, %v1592_v8  ;;  %v5456_v8 = vld [vmem:[%s9132_s4 + $0x240] sm:$0xf] }
 0x26f   :  { %v1536_v28 = vpop.f32.mrf.mxu3 }
 0x270   :  { %v1537_v21 = vadd.f32 %v1536_v28, %v1467_v3  ;;  %v6385_v3 = vld [vmem:[%s9132_s4 + $0x244] sm:$0xf0]  ;;  %v6384_v28 = vld [vmem:[%s9132_s4 + $0x244] sm:$0xf] }
 0x271   :  { %v1469_v27 = vpop.f32.mrf.mxu1  ;;  %v5457_v60 = vor.u32 %v6385_v3, %v5456_v8 }
 0x277   :  { %v1538_v23 = vpop.f32.mrf.mxu3 }
 0x278   :  { %v1539_v61 = vadd.f32 %v1538_v23, %v1469_v27  ;;  %v5458_v27 = vld [vmem:[%s9132_s4 + $0x248] sm:$0xf0] }
 0x279   :  { %v1472_v10 = vpop.f32.mrf.mxu1  ;;  %v5461_v23 = vor.u32 %v6384_v28, %v5458_v27 }
 0x27a   :  { %v1593_v34 = vpack.c.bf16 %v1539_v61, %v1537_v21 }
 0x27c   :  { %1511 = vmatmul.bf16.gmra.mxu1 %v5373_v7  ;;  %5389 = vmatmul.msk.bf16.gmra.mxu3 %vm366_vm0, %v5377_v50 }
 0x27d   :  { %5408 = vmatmul.msk.bf16.gmra.mxu0 %vm899_vm2, %v1593_v34  ;;  %5420 = vmatmul.msk.bf16.gmra.mxu2 %vm899_vm2, %v1593_v34  ;;  %v5464_v34 = vld [vmem:[%s9132_s4 + $0x250] sm:$0xf] }
 0x27f   :  { %v1541_v48 = vpop.f32.mrf.mxu3 }
 0x280   :  { %v1542_v44 = vadd.f32 %v1541_v48, %v1472_v10  ;;  %v6387_v10 = vld [vmem:[%s9132_s4 + $0x254] sm:$0xf0]  ;;  %v6386_v48 = vld [vmem:[%s9132_s4 + $0x254] sm:$0xf] }
 0x281   :  { %v1474_v29 = vpop.f32.mrf.mxu1  ;;  %v5465_v27 = vor.u32 %v6387_v10, %v5464_v34 }
 0x287   :  { %v1543_v63 = vpop.f32.mrf.mxu3 }
 0x288   :  { %v1544_v9 = vadd.f32 %v1543_v63, %v1474_v29  ;;  %v5466_v29 = vld [vmem:[%s9132_s4 + $0x258] sm:$0xf0] }
 0x289   :  { %v1477_v21 = vpop.f32.mrf.mxu1  ;;  %v5469_v63 = vor.u32 %v6386_v48, %v5466_v29 }
 0x28a   :  { %v1594_v61 = vpack.c.bf16 %v1544_v9, %v1542_v44 }
 0x28c   :  { %2026 = vmatmul.bf16.vlgmr.msrb.gmra.mxu1 %v5457_v60  ;;  %5550 = vmatmul.msk.bf16.vlgmr.msrb.gmra.mxu3 %vm366_vm0, %v5461_v23 }
 0x28d   :  { %5409 = vmatmul.msk.bf16.gmra.mxu0 %vm899_vm2, %v1594_v61  ;;  %5421 = vmatmul.msk.bf16.gmra.mxu2 %vm899_vm2, %v1594_v61  ;;  %v5472_v61 = vld [vmem:[%s9132_s4 + $0x260] sm:$0xf] }
 0x28f   :  { %v1546_v7 = vpop.f32.mrf.mxu3 }
 0x290   :  { %v1547_v3 = vadd.f32 %v1546_v7, %v1477_v21  ;;  %v6389_v21 = vld [vmem:[%s9132_s4 + $0x264] sm:$0xf0]  ;;  %v6388_v7 = vld [vmem:[%s9132_s4 + $0x264] sm:$0xf] }
 0x291   :  { %v1479_v50 = vpop.f32.mrf.mxu1  ;;  %v5473_v29 = vor.u32 %v6389_v21, %v5472_v61 }
 0x297   :  { %v1548_v8 = vpop.f32.mrf.mxu3 }
 0x298   :  { %v1549_v28 = vadd.f32 %v1548_v8, %v1479_v50  ;;  %v5474_v50 = vld [vmem:[%s9132_s4 + $0x268] sm:$0xf0] }
 0x299   :  { %v1482_v44 = vpop.f32.mrf.mxu1  ;;  %v5477_v8 = vor.u32 %v6388_v7, %v5474_v50 }
 0x29a   :  { %v1595_v9 = vpack.c.bf16 %v1549_v28, %v1547_v3 }
 0x29c   :  { %2031 = vmatmul.bf16.gmra.mxu1 %v5465_v27  ;;  %5551 = vmatmul.msk.bf16.gmra.mxu3 %vm366_vm0, %v5469_v63 }
 0x29d   :  { %5410 = vmatmul.msk.bf16.gmra.mxu0 %vm899_vm2, %v1595_v9  ;;  %5422 = vmatmul.msk.bf16.gmra.mxu2 %vm899_vm2, %v1595_v9  ;;  %v5480_v9 = vld [vmem:[%s9132_s4 + $0x270] sm:$0xf] }
 0x29f   :  { %v1551_v60 = vpop.f32.mrf.mxu3 }
 0x2a0   :  { %v1552_v10 = vadd.f32 %v1551_v60, %v1482_v44  ;;  %v6391_v44 = vld [vmem:[%s9132_s4 + $0x274] sm:$0xf0]  ;;  %v6390_v60 = vld [vmem:[%s9132_s4 + $0x274] sm:$0xf] }
 0x2a1   :  { %v1484_v23 = vpop.f32.mrf.mxu1  ;;  %v5481_v50 = vor.u32 %v6391_v44, %v5480_v9 }
 0x2a7   :  { %v1553_v34 = vpop.f32.mrf.mxu3 }
 0x2a8   :  { %v1554_v48 = vadd.f32 %v1553_v34, %v1484_v23  ;;  %v5482_v23 = vld [vmem:[%s9132_s4 + $0x278] sm:$0xf0] }
 0x2a9   :  { %v1487_v3 = vpop.f32.mrf.mxu1  ;;  %v5485_v34 = vor.u32 %v6390_v60, %v5482_v23 }
 0x2aa   :  { %v1596_v28 = vpack.c.bf16 %v1554_v48, %v1552_v10 }
 0x2ac   :  { %2036 = vmatmul.bf16.gmra.mxu1 %v5473_v29  ;;  %5552 = vmatmul.msk.bf16.gmra.mxu3 %vm366_vm0, %v5477_v8 }
 0x2ad   :  { %5411 = vmatmul.msk.bf16.gmra.mxu0 %vm899_vm2, %v1596_v28  ;;  %5423 = vmatmul.msk.bf16.gmra.mxu2 %vm899_vm2, %v1596_v28  ;;  %v5488_v28 = vld [vmem:[%s9132_s4 + $0x280] sm:$0xf] }
 0x2af   :  { %v1556_v27 = vpop.f32.mrf.mxu3 }
 0x2b0   :  { %v1557_v21 = vadd.f32 %v1556_v27, %v1487_v3  ;;  %v6393_v3 = vld [vmem:[%s9132_s4 + $0x284] sm:$0xf0]  ;;  %v6392_v27 = vld [vmem:[%s9132_s4 + $0x284] sm:$0xf] }
 0x2b1   :  { %v1489_v63 = vpop.f32.mrf.mxu1  ;;  %v5489_v23 = vor.u32 %v6393_v3, %v5488_v28  ;;  %v5498_v28 = vld [vmem:[%s9132_s4 + $0x298] sm:$0xf0] }
 0x2b7   :  { %v1558_v61 = vpop.f32.mrf.mxu3 }
 0x2b8   :  { %v1559_v7 = vadd.f32 %v1558_v61, %v1489_v63  ;;  %v5490_v63 = vld [vmem:[%s9132_s4 + $0x288] sm:$0xf0] }
 0x2b9   :  { %v1492_v10 = vpop.f32.mrf.mxu1  ;;  %v5493_v61 = vor.u32 %v6392_v27, %v5490_v63  ;;  %v8060_v27 = vpop.f32.mrf.mxu2 }
 0x2ba   :  { %v1597_v48 = vpack.c.bf16 %v1559_v7, %v1557_v21 }
 0x2bc   :  { %2041 = vmatmul.bf16.gmra.mxu1 %v5481_v50  ;;  %5553 = vmatmul.msk.bf16.gmra.mxu3 %vm366_vm0, %v5485_v34 }
 0x2bd   :  { %5412 = vmatmul.msk.bf16.gmra.mxu0 %vm899_vm2, %v1597_v48  ;;  %5424 = vmatmul.msk.bf16.gmra.mxu2 %vm899_vm2, %v1597_v48  ;;  %v8046_v48 = vpop.f32.mrf.mxu0 }
 0x2be   :  { %9158 = vst [vmem:[#allocation46_spill] sm:$0xff] %v8046_v48 }
 0x2bf   :  { %v1561_v29 = vpop.f32.mrf.mxu3 }
 0x2c0   :  { %v1562_v44 = vadd.f32 %v1561_v29, %v1492_v10  ;;  %v5496_v10 = vld [vmem:[%s9132_s4 + $0x290] sm:$0xf]  ;;  %v6395_v29 = vld [vmem:[%s9132_s4 + $0x294] sm:$0xf0] }
 0x2c1   :  { %v1494_v8 = vpop.f32.mrf.mxu1 }
 0x2c7   :  { %v1563_v9 = vpop.f32.mrf.mxu3 }
 0x2c8   :  { %v1564_v60 = vadd.f32 %v1563_v9, %v1494_v8  ;;  %v6394_v8 = vld [vmem:[%s9132_s4 + $0x294] sm:$0xf] }
 0x2c9   :  { %v1497_v21 = vpop.f32.mrf.mxu1 }
 0x2ca   :  { %v1598_v7 = vpack.c.bf16 %v1564_v60, %v1562_v44  ;;  %v5497_v44 = vor.u32 %v6395_v29, %v5496_v10  ;;  %v5501_v60 = vor.u32 %v6394_v8, %v5498_v28  ;;  %v6397_v8 = vld [vmem:[%s9132_s4 + $0x2a4] sm:$0xf0]  ;;  %v6396_v28 = vld [vmem:[%s9132_s4 + $0x2a4] sm:$0xf] }
 0x2cc   :  { %2046 = vmatmul.bf16.gmra.mxu1 %v5489_v23  ;;  %5554 = vmatmul.msk.bf16.gmra.mxu3 %vm366_vm0, %v5493_v61 }
 0x2cd   :  { %5413 = vmatmul.msk.bf16.gmra.mxu0 %vm899_vm2, %v1598_v7  ;;  %5425 = vmatmul.msk.bf16.gmra.mxu2 %vm899_vm2, %v1598_v7 }
 0x2cf   :  { %v1566_v50 = vpop.f32.mrf.mxu3 }
 0x2d0   :  { %v1567_v63 = vadd.f32 %v1566_v50, %v1497_v21  ;;  %v1153_v21 = vadd.f32 %v7636_v12, %v7625_v54  ;;  %v5506_v54 = vld [vmem:[%s9132_s4 + $0x2a8] sm:$0xf0] }
 0x2d1   :  { %v1499_v34 = vpop.f32.mrf.mxu1 }
 0x2d7   :  { %v1568_v3 = vpop.f32.mrf.mxu3 }
 0x2d8   :  { %v1569_v9 = vadd.f32 %v1568_v3, %v1499_v34 }
 0x2d9   :  { %v1502_v23 = vpop.f32.mrf.mxu1 }
 0x2da   :  { %v1599_v61 = vpack.c.bf16 %v1569_v9, %v1567_v63  ;;  %v1672_v7 = vpop.f32.mrf.mxu0 }
 0x2db   :  { %v8063_v48 = vadd.f32 %v1672_v7, %v7627_v41  ;;  %v5504_v41 = vld [vmem:[%s9132_s4 + $0x2a0] sm:$0xf] }
 0x2dc   :  { %2051 = vmatmul.bf16.gmra.mxu1 %v5497_v44  ;;  %5555 = vmatmul.msk.bf16.gmra.mxu3 %vm366_vm0, %v5501_v60  ;;  %v5505_v9 = vor.u32 %v6397_v8, %v5504_v41  ;;  %v5509_v44 = vor.u32 %v6396_v28, %v5506_v54  ;;  %v1158_v8 = vadd.f32 %v7656_v55, %v7645_v33  ;;  %v6398_v33 = vld [vmem:[%s9132_s4 + $0x2b4] sm:$0xf] }
 0x2dd   :  { %5414 = vmatmul.msk.bf16.gmra.mxu0 %vm899_vm2, %v1599_v61  ;;  %5426 = vmatmul.msk.bf16.gmra.mxu2 %vm899_vm2, %v1599_v61 }
 0x2df   :  { %v1571_v47 = vpop.f32.mrf.mxu3 }
 0x2e0   :  { %v1741_v16 = vpop.f32.mrf.mxu2 }
 0x2e1   :  { %v8071_v50 = vadd.f32 %v1741_v16, %v7634_v30  ;;  %v1504_v34 = vpop.f32.mrf.mxu1  ;;  %v1222_v30 = vadd.f32 %v7641_v35, %v7631_v5  ;;  %v1572_v16 = vadd.f32 %v1571_v47, %v1502_v23  ;;  %v6410_v5 = vld [vmem:[#allocation2 + $0x74] sm:$0xf]  ;;  %v5574_v35 = vld [vmem:[#allocation2 + $0x78] sm:$0x30] }
 0x2e2   :  { %v1674_v10 = vpop.f32.mrf.mxu0  ;;  %v5577_v47 = vor.u32 %v6410_v5, %v5574_v35  ;;  %v5564_v5 = vld [vmem:[#allocation2 + $0x60] sm:$0xf]  ;;  %v6409_v35 = vld [vmem:[#allocation2 + $0x64] sm:$0xf0] }
 0x2e3   :  { %v8073_v29 = vadd.f32 %v1674_v10, %v1153_v21 }
 0x2e4   :  { %v2231_v41 = vsel %vm936_vm1, %v5577_v47, 0  ;;  %v6408_v47 = vld [vmem:[#allocation2 + $0x64] sm:$0xf] }
 0x2e5   :  { %2308 = vmatpush.bf16.msrb.mxu2 %v2231_v41 }
 0x2e7   :  { %v1573_v12 = vpop.f32.mrf.mxu3 }
 0x2e8   :  { %v1574_v3 = vadd.f32 %v1573_v12, %v1504_v34  ;;  %v1743_v63 = vpop.f32.mrf.mxu2  ;;  %v6411_v12 = vld [vmem:[#allocation2 + $0x74] sm:$0x30] }
 0x2e9   :  { %v8089_v60 = vadd.f32 %v1743_v63, %v1222_v30  ;;  %v1507_v61 = vpop.f32.mrf.mxu1  ;;  %v5572_v30 = vld [vmem:[#allocation2 + $0x70] sm:$0xf] }
 0x2ea   :  { %v1600_v7 = vpack.c.bf16 %v1574_v3, %v1572_v16  ;;  %v1677_v21 = vpop.f32.mrf.mxu0  ;;  %v5573_v3 = vor.u32 %v6411_v12, %v5572_v30  ;;  %v5512_v63 = vld [vmem:[%s9132_s4 + $0x2b0] sm:$0xf]  ;;  %v5565_v30 = vor.u32 %v6409_v35, %v5564_v5  ;;  %v5566_v12 = vld [vmem:[#allocation2 + $0x68] sm:$0xf0] }
 0x2eb   :  { %v8092_v10 = vadd.f32 %v1677_v21, %v7647_v53 }
 0x2ec   :  { %2056 = vmatmul.bf16.gmra.mxu1 %v5505_v9  ;;  %5556 = vmatmul.msk.bf16.gmra.mxu3 %vm366_vm0, %v5509_v44  ;;  %v6399_v9 = vld [vmem:[%s9132_s4 + $0x2b4] sm:$0xf0]  ;;  %v2228_v55 = vsel %vm936_vm1, %v5573_v3, 0  ;;  %v1227_v44 = vadd.f32 %v7662_v13, %v7651_v32 }
 0x2ed   :  { %9159 = vst [vmem:[#allocation47_spill] sm:$0xff] %v8092_v10  ;;  %5415 = vmatmul.msk.bf16.gmra.mxu0 %vm899_vm2, %v1600_v7  ;;  %5427 = vmatmul.msk.bf16.gmra.mxu2 %vm899_vm2, %v1600_v7  ;;  %v5513_v21 = vor.u32 %v6399_v9, %v5512_v63  ;;  %v5569_v10 = vor.u32 %v6408_v47, %v5566_v12 }
 0x2ee   :  { %2239 = vmatpush.bf16.msrb.mxu0 %v2228_v55 }
 0x2ef   :  { %v1576_v23 = vpop.f32.mrf.mxu3  ;;  %2309 = vmatpush.bf16.msrb.mxu2 %v5569_v10  ;;  %v5520_v10 = vld [vmem:[%s9132_s4 + $0x2c0] sm:$0xf] }
 0x2f0   :  { %v1746_v34 = vpop.f32.mrf.mxu2 }
 0x2f1   :  { %v8101_v53 = vadd.f32 %v1746_v34, %v7654_v62  ;;  %v1509_v28 = vpop.f32.mrf.mxu1  ;;  %v5514_v62 = vld [vmem:[%s9132_s4 + $0x2b8] sm:$0xf0]  ;;  %v1577_v34 = vadd.f32 %v1576_v23, %v1507_v61  ;;  %v1163_v23 = vadd.f32 %v7677_v26, %v7666_v4  ;;  %v5522_v4 = vld [vmem:[%s9132_s4 + $0x2c8] sm:$0xf0] }
 0x2f2   :  { %v1679_v54 = vpop.f32.mrf.mxu0  ;;  %2240 = vmatpush.bf16.msrb.mxu0 %v5565_v30 }
 0x2f3   :  { %9160 = vst [vmem:[#allocation48_spill] sm:$0xff] %v8101_v53  ;;  %v8103_v16 = vadd.f32 %v1679_v54, %v1158_v8  ;;  %v5517_v54 = vor.u32 %v6398_v33, %v5514_v62  ;;  %v6401_v33 = vld [vmem:[%s9132_s4 + $0x2c4] sm:$0xf0]  ;;  %v6400_v62 = vld [vmem:[%s9132_s4 + $0x2c4] sm:$0xf] }
 0x2f4   :  { %v5521_v5 = vor.u32 %v6401_v33, %v5520_v10  ;;  %v5525_v35 = vor.u32 %v6400_v62, %v5522_v4 }
 0x2f5   :  { %9161 = vst [vmem:[#allocation49_spill] sm:$0xff] %v8103_v16 }
 0x2f7   :  { %v1578_v7 = vpop.f32.mrf.mxu3 }
 0x2f8   :  { %v1579_v41 = vadd.f32 %v1578_v7, %v1509_v28  ;;  %v1748_v8 = vpop.f32.mrf.mxu2 }
 0x2f9   :  { %v8120_v16 = vadd.f32 %v1748_v8, %v1227_v44  ;;  %v1512_v53 = vpop.f32.mrf.mxu1 }
 0x2fa   :  { %v1601_v3 = vpack.c.bf16 %v1579_v41, %v1577_v34  ;;  %v1682_v55 = vpop.f32.mrf.mxu0 }
 0x2fb   :  { %v8123_v32 = vadd.f32 %v1682_v55, %v7668_v59 }
 0x2fc   :  { %2061 = vmatmul.bf16.gmra.mxu1 %v5513_v21  ;;  %5557 = vmatmul.msk.bf16.gmra.mxu3 %vm366_vm0, %v5517_v54 }
 0x2fd   :  { %5416 = vmatmul.msk.bf16.gmra.mxu0 %vm899_vm2, %v1601_v3  ;;  %5428 = vmatmul.msk.bf16.gmra.mxu2 %vm899_vm2, %v1601_v3 }
 0x2ff   :  { %v1581_v13 = vpop.f32.mrf.mxu3 }
 0x300   :  { %v1751_v61 = vpop.f32.mrf.mxu2  ;;  %v1582_v44 = vadd.f32 %v1581_v13, %v1512_v53  ;;  %v1168_v53 = vadd.f32 %v7709_v51, %v7687_v52  ;;  %v6403_v13 = vld [vmem:[%s9132_s4 + $0x2d4] sm:$0xf0]  ;;  %v5530_v52 = vld [vmem:[%s9132_s4 + $0x2d8] sm:$0xf0] }
 0x301   :  { %v8131_v28 = vadd.f32 %v1751_v61, %v7675_v58  ;;  %v1514_v63 = vpop.f32.mrf.mxu1  ;;  %v1232_v58 = vadd.f32 %v7683_v56, %v7672_v46  ;;  %v6402_v61 = vld [vmem:[%s9132_s4 + $0x2d4] sm:$0xf] }
 0x302   :  { %v1684_v9 = vpop.f32.mrf.mxu0  ;;  %v5533_v33 = vor.u32 %v6402_v61, %v5530_v52 }
 0x303   :  { %v8133_v59 = vadd.f32 %v1684_v9, %v1163_v23 }
 0x307   :  { %v1583_v26 = vpop.f32.mrf.mxu3 }
 0x308   :  { %v1584_v7 = vadd.f32 %v1583_v26, %v1514_v63  ;;  %v1753_v21 = vpop.f32.mrf.mxu2 }
 0x309   :  { %v8149_v47 = vadd.f32 %v1753_v21, %v1232_v58  ;;  %v2027_v34 = vpop.f32.mrf.mxu1 }
 0x30a   :  { %v1602_v41 = vpack.c.bf16 %v1584_v7, %v1582_v44  ;;  %v1687_v8 = vpop.f32.mrf.mxu0  ;;  %v1173_v7 = vadd.f32 %v7740_v43, %v7716_v19  ;;  %v5538_v19 = vld [vmem:[%s9132_s4 + $0x2e8] sm:$0xf0] }
 0x30b   :  { %v8152_v54 = vadd.f32 %v1687_v8, %v7689_v20  ;;  %v5528_v20 = vld [vmem:[%s9132_s4 + $0x2d0] sm:$0xf]  ;;  %v6404_v8 = vld [vmem:[%s9132_s4 + $0x2e4] sm:$0xf] }
 0x30c   :  { %2066 = vmatmul.bf16.gmra.mxu1 %v5521_v5  ;;  %5558 = vmatmul.msk.bf16.gmra.mxu3 %vm366_vm0, %v5525_v35  ;;  %v5529_v10 = vor.u32 %v6403_v13, %v5528_v20 }
 0x30d   :  { %5417 = vmatmul.msk.bf16.gmra.mxu0 %vm899_vm2, %v1602_v41  ;;  %5429 = vmatmul.msk.bf16.gmra.mxu2 %vm899_vm2, %v1602_v41  ;;  %v6405_v41 = vld [vmem:[%s9132_s4 + $0x2e4] sm:$0xf0] }
 0x30f   :  { %v2096_v46 = vpop.f32.mrf.mxu3 }
 0x310   :  { %v1756_v56 = vpop.f32.mrf.mxu2  ;;  %v2097_v23 = vadd.f32 %v2096_v46, %v2027_v34 }
 0x311   :  { %v8160_v30 = vadd.f32 %v1756_v56, %v7707_v6  ;;  %v2029_v12 = vpop.f32.mrf.mxu1  ;;  %v1237_v6 = vadd.f32 %v7714_v18, %v7705_v37 }
 0x312   :  { %v1689_v3 = vpop.f32.mrf.mxu0 }
 0x313   :  { %v8162_v55 = vadd.f32 %v1689_v3, %v1168_v53  ;;  %v5541_v3 = vor.u32 %v6404_v8, %v5538_v19  ;;  %v1183_v19 = vadd.f32 %v7798_v14, %v7778_v0  ;;  %v5630_v0 = vld [vmem:[%s9132_s4 + $0x308] sm:$0xf0] }
 0x317   :  { %v2098_v51 = vpop.f32.mrf.mxu3 }
 0x318   :  { %v1758_v63 = vpop.f32.mrf.mxu2  ;;  %v2099_v9 = vadd.f32 %v2098_v51, %v2029_v12  ;;  %v1178_v51 = vadd.f32 %v7772_v25, %v7749_v40  ;;  %v5546_v40 = vld [vmem:[%s9132_s4 + $0x2f8] sm:$0xf0] }
 0x319   :  { %v8178_v62 = vadd.f32 %v1758_v63, %v1237_v6  ;;  %v2032_v4 = vpop.f32.mrf.mxu1 }
 0x31a   :  { %v2161_v58 = vpack.c.bf16 %v2099_v9, %v2097_v23  ;;  %v1692_v26 = vpop.f32.mrf.mxu0 }
 0x31b   :  { %v8181_v44 = vadd.f32 %v1692_v26, %v7720_v57  ;;  %v5536_v57 = vld [vmem:[%s9132_s4 + $0x2e0] sm:$0xf] }
 0x31c   :  { %2071 = vmatmul.bf16.gmra.mxu1 %v5529_v10  ;;  %5559 = vmatmul.msk.bf16.gmra.mxu3 %vm366_vm0, %v5533_v33  ;;  %v5537_v12 = vor.u32 %v6405_v41, %v5536_v57  ;;  %v6407_v33 = vld [vmem:[%s9132_s4 + $0x2f4] sm:$0xf0] }
 0x31d   :  { %5578 = vmatmul.msk.bf16.vlgmr.msrb.gmra.mxu0 %vm899_vm2, %v2161_v58  ;;  %5590 = vmatmul.msk.bf16.vlgmr.msrb.gmra.mxu2 %vm899_vm2, %v2161_v58 }
 0x31f   :  { %v2101_v37 = vpop.f32.mrf.mxu3 }
 0x320   :  { %v1761_v18 = vpop.f32.mrf.mxu2  ;;  %v2102_v46 = vadd.f32 %v2101_v37, %v2032_v4  ;;  %v6406_v4 = vld [vmem:[%s9132_s4 + $0x2f4] sm:$0xf] }
 0x321   :  { %v8189_v21 = vadd.f32 %v1761_v18, %v7738_v1  ;;  %v2034_v5 = vpop.f32.mrf.mxu1  ;;  %v1242_v1 = vadd.f32 %v7747_v17, %v7736_v11 }
 0x322   :  { %v1694_v35 = vpop.f32.mrf.mxu0 }
 0x323   :  { %v8191_v34 = vadd.f32 %v1694_v35, %v1173_v7  ;;  %v5549_v7 = vor.u32 %v6406_v4, %v5546_v40  ;;  %v9163_v40 = vld [vmem:[#allocation22_spill] sm:$0xff] }
 0x327   :  { %v2103_v43 = vpop.f32.mrf.mxu3 }
 0x328   :  { %v1763_v56 = vpop.f32.mrf.mxu2  ;;  %v2104_v53 = vadd.f32 %v2103_v43, %v2034_v5 }
 0x329   :  { %v8207_v20 = vadd.f32 %v1763_v56, %v1242_v1  ;;  %v2037_v13 = vpop.f32.mrf.mxu1 }
 0x32a   :  { %v2162_v61 = vpack.c.bf16 %v2104_v53, %v2102_v46  ;;  %v1697_v52 = vpop.f32.mrf.mxu0  ;;  %v6413_v53 = vld [vmem:[%s9132_s4 + $0x304] sm:$0xf0] }
 0x32b   :  { %v8210_v6 = vadd.f32 %v1697_v52, %v7753_v22  ;;  %v5544_v22 = vld [vmem:[%s9132_s4 + $0x2f0] sm:$0xf] }
 0x32c   :  { %2076 = vmatmul.bf16.gmra.mxu1 %v5537_v12  ;;  %5560 = vmatmul.msk.bf16.gmra.mxu3 %vm366_vm0, %v5541_v3  ;;  %v5545_v18 = vor.u32 %v6407_v33, %v5544_v22  ;;  %v6412_v12 = vld [vmem:[%s9132_s4 + $0x304] sm:$0xf]  ;;  %v9162_v33 = vld [vmem:[#allocation23_spill] sm:$0xff] }
 0x32d   :  { %5579 = vmatmul.msk.bf16.gmra.mxu0 %vm899_vm2, %v2162_v61  ;;  %5591 = vmatmul.msk.bf16.gmra.mxu2 %vm899_vm2, %v2162_v61  ;;  %v1188_v4 = vadd.f32 %v9162_v33, %v7803_v42  ;;  %v5638_v42 = vld [vmem:[%s9132_s4 + $0x318] sm:$0xf0]  ;;  %v5644_v33 = vld [vmem:[%s9132_s4 + $0x320] sm:$0xf] }
 0x32f   :  { %v2106_v11 = vpop.f32.mrf.mxu3 }
 0x330   :  { %v1766_v17 = vpop.f32.mrf.mxu2  ;;  %v2107_v58 = vadd.f32 %v2106_v11, %v2037_v13  ;;  %v5633_v11 = vor.u32 %v6412_v12, %v5630_v0 }
 0x331   :  { %v8218_v23 = vadd.f32 %v1766_v17, %v7770_v31  ;;  %v2039_v63 = vpop.f32.mrf.mxu1  ;;  %v1247_v31 = vadd.f32 %v7776_v45, %v7768_v36 }
 0x332   :  { %v1699_v9 = vpop.f32.mrf.mxu0 }
 0x333   :  { %v8220_v10 = vadd.f32 %v1699_v9, %v1178_v51 }
 0x337   :  { %v2108_v25 = vpop.f32.mrf.mxu3 }
 0x338   :  { %v1768_v26 = vpop.f32.mrf.mxu2  ;;  %v2109_v37 = vadd.f32 %v2108_v25, %v2039_v63 }
 0x339   :  { %v8236_v5 = vadd.f32 %v1768_v26, %v1247_v31  ;;  %v2042_v35 = vpop.f32.mrf.mxu1 }
 0x33a   :  { %v2163_v57 = vpack.c.bf16 %v2109_v37, %v2107_v58  ;;  %v1702_v41 = vpop.f32.mrf.mxu0  ;;  %v6415_v37 = vld [vmem:[%s9132_s4 + $0x314] sm:$0xf0] }
 0x33b   :  { %v8239_v8 = vadd.f32 %v1702_v41, %v7780_v39  ;;  %v5628_v39 = vld [vmem:[%s9132_s4 + $0x300] sm:$0xf] }
 0x33c   :  { %2081 = vmatmul.bf16.gmra.mxu1 %v5545_v18  ;;  %5561 = vmatmul.msk.bf16.gmra.mxu3 %vm366_vm0, %v5549_v7  ;;  %v5629_v52 = vor.u32 %v6413_v53, %v5628_v39  ;;  %v6414_v18 = vld [vmem:[%s9132_s4 + $0x314] sm:$0xf]  ;;  %v9164_v7 = vld [vmem:[#allocation21_spill] sm:$0xff] }
 0x33d   :  { %5580 = vmatmul.msk.bf16.gmra.mxu0 %vm899_vm2, %v2163_v57  ;;  %5592 = vmatmul.msk.bf16.gmra.mxu2 %vm899_vm2, %v2163_v57 }
 0x33f   :  { %v2111_v36 = vpop.f32.mrf.mxu3 }
 0x340   :  { %v1771_v45 = vpop.f32.mrf.mxu2  ;;  %v2112_v3 = vadd.f32 %v2111_v36, %v2042_v35  ;;  %v9165_v35 = vld [vmem:[#allocation24_spill] sm:$0xff] }
 0x341   :  { %v8247_v1 = vadd.f32 %v1771_v45, %v7796_v15  ;;  %v2044_v43 = vpop.f32.mrf.mxu1  ;;  %v1252_v15 = vadd.f32 %v7801_v38, %v7794_v2  ;;  %v1257_v57 = vadd.f32 %v9165_v35, %v9164_v7 }
 0x342   :  { %v1704_v46 = vpop.f32.mrf.mxu0 }
 0x343   :  { %v8249_v56 = vadd.f32 %v1704_v46, %v1183_v19  ;;  %v5641_v46 = vor.u32 %v6414_v18, %v5638_v42 }
 0x347   :  { %v2113_v14 = vpop.f32.mrf.mxu3 }
 0x348   :  { %v1773_v13 = vpop.f32.mrf.mxu2  ;;  %v2114_v61 = vadd.f32 %v2113_v14, %v2044_v43 }
 0x349   :  { %v8265_v17 = vadd.f32 %v1773_v13, %v1252_v15  ;;  %v2047_v51 = vpop.f32.mrf.mxu1  ;;  %v9166_v15 = vld [vmem:[#allocation26_spill] sm:$0xff] }
 0x34a   :  { %v2164_v63 = vpack.c.bf16 %v2114_v61, %v2112_v3  ;;  %v1707_v9 = vpop.f32.mrf.mxu0  ;;  %v9167_v61 = vld [vmem:[#allocation25_spill] sm:$0xff] }
 0x34b   :  { %v8268_v22 = vadd.f32 %v1707_v9, %v7805_v49  ;;  %v5636_v49 = vld [vmem:[%s9132_s4 + $0x310] sm:$0xf] }
 0x34c   :  { %2596 = vmatmul.bf16.vlgmr.msra.gmra.mxu1 %v5629_v52  ;;  %5722 = vmatmul.msk.bf16.vlgmr.msra.gmra.mxu3 %vm366_vm0, %v5633_v11  ;;  %v5637_v43 = vor.u32 %v6415_v37, %v5636_v49  ;;  %v9168_v52 = vld [vmem:[#allocation29_spill] sm:$0xff]  ;;  %v9171_v49 = vld [vmem:[#allocation30_spill] sm:$0xff] }
 0x34d   :  { %5581 = vmatmul.msk.bf16.gmra.mxu0 %vm899_vm2, %v2164_v63  ;;  %5593 = vmatmul.msk.bf16.gmra.mxu2 %vm899_vm2, %v2164_v63  ;;  %v1193_v11 = vadd.f32 %v9168_v52, %v9167_v61  ;;  %v9175_v61 = vld [vmem:[#allocation34_spill] sm:$0xff] }
 0x34f   :  { %v2116_v2 = vpop.f32.mrf.mxu3 }
 0x350   :  { %v1776_v38 = vpop.f32.mrf.mxu2  ;;  %v2117_v36 = vadd.f32 %v2116_v2, %v2047_v51  ;;  %v9169_v51 = vld [vmem:[#allocation28_spill] sm:$0xff] }
 0x351   :  { %v8276_v31 = vadd.f32 %v1776_v38, %v9163_v40  ;;  %v2049_v25 = vpop.f32.mrf.mxu1  ;;  %v6416_v40 = vld [vmem:[%s9132_s4 + $0x324] sm:$0xf] }
 0x352   :  { %v1709_v58 = vpop.f32.mrf.mxu0 }
 0x353   :  { %v8278_v26 = vadd.f32 %v1709_v58, %v1188_v4  ;;  %v6417_v4 = vld [vmem:[%s9132_s4 + $0x324] sm:$0xf0]  ;;  %v9170_v58 = vld [vmem:[#allocation27_spill] sm:$0xff] }
 0x354   :  { %v1262_v37 = vadd.f32 %v9171_v49, %v9170_v58  ;;  %v9177_v58 = vld [vmem:[#allocation36_spill] sm:$0xff] }
 0x357   :  { %v2118_v41 = vpop.f32.mrf.mxu3 }
 0x358   :  { %v1778_v45 = vpop.f32.mrf.mxu2  ;;  %v2119_v19 = vadd.f32 %v2118_v41, %v2049_v25  ;;  %v5646_v25 = vld [vmem:[%s9132_s4 + $0x328] sm:$0xf0] }
 0x359   :  { %v8294_v39 = vadd.f32 %v1778_v45, %v1257_v57  ;;  %v2052_v53 = vpop.f32.mrf.mxu1  ;;  %v5645_v57 = vor.u32 %v6417_v4, %v5644_v33  ;;  %v5649_v41 = vor.u32 %v6416_v40, %v5646_v25  ;;  %v6419_v33 = vld [vmem:[%s9132_s4 + $0x334] sm:$0xf0]  ;;  %v6418_v4 = vld [vmem:[%s9132_s4 + $0x334] sm:$0xf]  ;;  %v5654_v40 = vld [vmem:[%s9132_s4 + $0x338] sm:$0xf0] }
 0x35a   :  { %v2165_v12 = vpack.c.bf16 %v2119_v19, %v2117_v36  ;;  %v1712_v0 = vpop.f32.mrf.mxu0  ;;  %v9176_v25 = vld [vmem:[#allocation33_spill] sm:$0xff] }
 0x35b   :  { %v8297_v14 = vadd.f32 %v1712_v0, %v9166_v15  ;;  %v9173_v15 = vld [vmem:[#allocation31_spill] sm:$0xff]  ;;  %v1267_v49 = vadd.f32 %v9177_v58, %v9176_v25  ;;  %v6420_v25 = vld [vmem:[%s9132_s4 + $0x344] sm:$0xf] }
 0x35c   :  { %2601 = vmatmul.bf16.gmra.mxu1 %v5637_v43  ;;  %5723 = vmatmul.msk.bf16.gmra.mxu3 %vm366_vm0, %v5641_v46  ;;  %v9172_v46 = vld [vmem:[#allocation32_spill] sm:$0xff]  ;;  %v9181_v58 = vld [vmem:[#allocation39_spill] sm:$0xff] }
 0x35d   :  { %5582 = vmatmul.msk.bf16.gmra.mxu0 %vm899_vm2, %v2165_v12  ;;  %5594 = vmatmul.msk.bf16.gmra.mxu2 %vm899_vm2, %v2165_v12 }
 0x35f   :  { %v2121_v3 = vpop.f32.mrf.mxu3 }
 0x360   :  { %v1781_v13 = vpop.f32.mrf.mxu2  ;;  %v2122_v42 = vadd.f32 %v2121_v3, %v2052_v53  ;;  %v9174_v3 = vld [vmem:[#allocation35_spill] sm:$0xff] }
 0x361   :  { %v8305_v63 = vadd.f32 %v1781_v13, %v9169_v51  ;;  %v2054_v9 = vpop.f32.mrf.mxu1  ;;  %v1198_v13 = vadd.f32 %v9174_v3, %v9173_v15  ;;  %v9179_v3 = vld [vmem:[#allocation37_spill] sm:$0xff] }
 0x362   :  { %v1714_v2 = vpop.f32.mrf.mxu0 }
 0x363   :  { %v8307_v38 = vadd.f32 %v1714_v2, %v1193_v11  ;;  %v5652_v2 = vld [vmem:[%s9132_s4 + $0x330] sm:$0xf] }
 0x367   :  { %v2123_v18 = vpop.f32.mrf.mxu3 }
 0x368   :  { %v1783_v7 = vpop.f32.mrf.mxu2  ;;  %v2124_v35 = vadd.f32 %v2123_v18, %v2054_v9 }
 0x369   :  { %v8323_v36 = vadd.f32 %v1783_v7, %v1262_v37  ;;  %v2057_v45 = vpop.f32.mrf.mxu1 }
 0x36a   :  { %v2166_v19 = vpack.c.bf16 %v2124_v35, %v2122_v42  ;;  %v1717_v43 = vpop.f32.mrf.mxu0  ;;  %v5653_v35 = vor.u32 %v6419_v33, %v5652_v2 }
 0x36b   :  { %v8326_v12 = vadd.f32 %v1717_v43, %v9172_v46 }
 0x36c   :  { %2606 = vmatmul.bf16.gmra.mxu1 %v5645_v57  ;;  %5724 = vmatmul.msk.bf16.gmra.mxu3 %vm366_vm0, %v5649_v41  ;;  %v5657_v57 = vor.u32 %v6418_v4, %v5654_v40  ;;  %v5660_v4 = vld [vmem:[%s9132_s4 + $0x340] sm:$0xf]  ;;  %v6421_v40 = vld [vmem:[%s9132_s4 + $0x344] sm:$0xf0] }
 0x36d   :  { %5583 = vmatmul.msk.bf16.gmra.mxu0 %vm899_vm2, %v2166_v19  ;;  %5595 = vmatmul.msk.bf16.gmra.mxu2 %vm899_vm2, %v2166_v19 }
 0x36f   :  { %v2126_v53 = vpop.f32.mrf.mxu3 }
 0x370   :  { %v1786_v0 = vpop.f32.mrf.mxu2  ;;  %v2127_v18 = vadd.f32 %v2126_v53, %v2057_v45 }
 0x371   :  { %v8334_v52 = vadd.f32 %v1786_v0, %v9175_v61  ;;  %v2059_v11 = vpop.f32.mrf.mxu1  ;;  %v9178_v0 = vld [vmem:[#allocation38_spill] sm:$0xff]  ;;  %v9180_v61 = vld [vmem:[#allocation40_spill] sm:$0xff] }
 0x372   :  { %v1719_v51 = vpop.f32.mrf.mxu0 }
 0x373   :  { %v8336_v9 = vadd.f32 %v1719_v51, %v1198_v13  ;;  %v1203_v13 = vadd.f32 %v7900_v24, %v9179_v3  ;;  %v5662_v24 = vld [vmem:[%s9132_s4 + $0x348] sm:$0xf0] }
 0x377   :  { %v2128_v37 = vpop.f32.mrf.mxu3 }
 0x378   :  { %v1788_v42 = vpop.f32.mrf.mxu2  ;;  %v2129_v7 = vadd.f32 %v2128_v37, %v2059_v11 }
 0x379   :  { %v8352_v41 = vadd.f32 %v1788_v42, %v1267_v49  ;;  %v2062_v19 = vpop.f32.mrf.mxu1  ;;  %v9182_v49 = vld [vmem:[#allocation41_spill] sm:$0xff] }
 0x37a   :  { %v2167_v43 = vpack.c.bf16 %v2129_v7, %v2127_v18  ;;  %v1722_v46 = vpop.f32.mrf.mxu0  ;;  %v1272_v37 = vadd.f32 %v9182_v49, %v9181_v58 }
 0x37b   :  { %v8355_v15 = vadd.f32 %v1722_v46, %v9178_v0 }
 0x37c   :  { %2611 = vmatmul.bf16.gmra.mxu1 %v5653_v35  ;;  %5725 = vmatmul.msk.bf16.gmra.mxu3 %vm366_vm0, %v5657_v57  ;;  %v5661_v57 = vor.u32 %v6421_v40, %v5660_v4  ;;  %v9186_v40 = vld [vmem:[#allocation45_spill] sm:$0xff] }
 0x37d   :  { %5584 = vmatmul.msk.bf16.gmra.mxu0 %vm899_vm2, %v2167_v43  ;;  %5596 = vmatmul.msk.bf16.gmra.mxu2 %vm899_vm2, %v2167_v43  ;;  %v5665_v43 = vor.u32 %v6420_v25, %v5662_v24 }
 0x37f   :  { %v2131_v45 = vpop.f32.mrf.mxu3 }
 0x380   :  { %v1791_v53 = vpop.f32.mrf.mxu2  ;;  %v2132_v42 = vadd.f32 %v2131_v45, %v2062_v19 }
 0x381   :  { %v8363_v11 = vadd.f32 %v1791_v53, %v9180_v61  ;;  %v2064_v51 = vpop.f32.mrf.mxu1 }
 0x382   :  { %v1724_v2 = vpop.f32.mrf.mxu0 }
 0x383   :  { %v8365_v33 = vadd.f32 %v1724_v2, %v1203_v13  ;;  %v9183_v13 = vld [vmem:[#allocation43_spill] sm:$0xff]  ;;  %v9185_v2 = vld [vmem:[#allocation46_spill] sm:$0xff] }
 0x387   :  { %v2133_v18 = vpop.f32.mrf.mxu3 }
 0x388   :  { %v1793_v7 = vpop.f32.mrf.mxu2  ;;  %v2134_v35 = vadd.f32 %v2133_v18, %v2064_v51  ;;  %v9184_v51 = vld [vmem:[#allocation42_spill] sm:$0xff]  ;;  %v6423_v18 = vld [vmem:[%s9132_s4 + $0x354] sm:$0xf0] }
 0x389   :  { %v8381_v46 = vadd.f32 %v1793_v7, %v1272_v37  ;;  %v2067_v0 = vpop.f32.mrf.mxu1  ;;  %v1208_v4 = vadd.f32 %v9185_v2, %v9184_v51  ;;  %v5668_v37 = vld [vmem:[%s9132_s4 + $0x350] sm:$0xf]  ;;  %v5670_v7 = vld [vmem:[%s9132_s4 + $0x358] sm:$0xf0] }
 0x38a   :  { %v2168_v53 = vpack.c.bf16 %v2134_v35, %v2132_v42  ;;  %v1727_v3 = vpop.f32.mrf.mxu0  ;;  %v6422_v42 = vld [vmem:[%s9132_s4 + $0x354] sm:$0xf]  ;;  %v9188_v35 = vld [vmem:[#allocation44_spill] sm:$0xff] }
 0x38b   :  { %v8384_v61 = vadd.f32 %v1727_v3, %v9183_v13  ;;  %v5673_v51 = vor.u32 %v6422_v42, %v5670_v7  ;;  %v6425_v42 = vld [vmem:[%s9132_s4 + $0x364] sm:$0xf0]  ;;  %v6424_v7 = vld [vmem:[%s9132_s4 + $0x364] sm:$0xf] }
 0x38c   :  { %2616 = vmatmul.bf16.gmra.mxu1 %v5661_v57  ;;  %5726 = vmatmul.msk.bf16.gmra.mxu3 %vm366_vm0, %v5665_v43  ;;  %v1277_v57 = vadd.f32 %v8060_v27, %v9188_v35 }
 0x38d   :  { %5585 = vmatmul.msk.bf16.gmra.mxu0 %vm899_vm2, %v2168_v53  ;;  %5597 = vmatmul.msk.bf16.gmra.mxu2 %vm899_vm2, %v2168_v53 }
 0x38f   :  { %v2136_v19 = vpop.f32.mrf.mxu3 }
 0x390   :  { %v1796_v45 = vpop.f32.mrf.mxu2  ;;  %v2137_v53 = vadd.f32 %v2136_v19, %v2067_v0 }
 0x391   :  { %v8392_v25 = vadd.f32 %v1796_v45, %v9186_v40  ;;  %v2069_v24 = vpop.f32.mrf.mxu1  ;;  %v5669_v45 = vor.u32 %v6423_v18, %v5668_v37 }
 0x392   :  { %v1729_v58 = vpop.f32.mrf.mxu0 }
 0x393   :  { %v8394_v49 = vadd.f32 %v1729_v58, %v1208_v4 }
 0x395   :  { %9187 = vst [vmem:[#allocation23_spill] sm:$0xff] %v8394_v49 }
 0x397   :  { %v2138_v43 = vpop.f32.mrf.mxu3 }
 0x398   :  { %v1798_v3 = vpop.f32.mrf.mxu2  ;;  %v2139_v13 = vadd.f32 %v2138_v43, %v2069_v24 }
 0x399   :  { %v8410_v2 = vadd.f32 %v1798_v3, %v1277_v57  ;;  %v2072_v4 = vpop.f32.mrf.mxu1 }
 0x39a   :  { %v2169_v40 = vpack.c.bf16 %v2139_v13, %v2137_v53  ;;  %v2242_v58 = vpop.f32.mrf.mxu0 }
 0x39b   :  { %9189 = vst [vmem:[#allocation22_spill] sm:$0xff] %v8410_v2  ;;  %v8413_v49 = vadd.f32 %v2242_v58, %v8063_v48  ;;  %v5676_v48 = vld [vmem:[%s9132_s4 + $0x360] sm:$0xf]  ;;  %v9194_v58 = vld [vmem:[#allocation47_spill] sm:$0xff] }
 0x39c   :  { %2621 = vmatmul.bf16.gmra.mxu1 %v5669_v45  ;;  %5727 = vmatmul.msk.bf16.gmra.mxu3 %vm366_vm0, %v5673_v51  ;;  %v5677_v53 = vor.u32 %v6425_v42, %v5676_v48  ;;  %v9196_v42 = vld [vmem:[#allocation48_spill] sm:$0xff] }
 0x39d   :  { %9190 = vst [vmem:[#allocation21_spill] sm:$0xff] %v8413_v49  ;;  %5586 = vmatmul.msk.bf16.gmra.mxu0 %vm899_vm2, %v2169_v40  ;;  %5598 = vmatmul.msk.bf16.gmra.mxu2 %vm899_vm2, %v2169_v40 }
 0x39f   :  { %v2141_v27 = vpop.f32.mrf.mxu3 }
 0x3a0   :  { %v2311_v0 = vpop.f32.mrf.mxu2  ;;  %v2142_v57 = vadd.f32 %v2141_v27, %v2072_v4  ;;  %v6438_v4 = vld [vmem:[#allocation2 + $0x94] sm:$0xf]  ;;  %v5746_v27 = vld [vmem:[#allocation2 + $0x98] sm:$0x30] }
 0x3a1   :  { %v8419_v19 = vadd.f32 %v2311_v0, %v8071_v50  ;;  %v2074_v24 = vpop.f32.mrf.mxu1  ;;  %v5678_v50 = vld [vmem:[%s9132_s4 + $0x368] sm:$0xf0] }
 0x3a2   :  { %v2244_v37 = vpop.f32.mrf.mxu0  ;;  %v5681_v3 = vor.u32 %v6424_v7, %v5678_v50 }
 0x3a3   :  { %9191 = vst [vmem:[#allocation24_spill] sm:$0xff] %v8419_v19  ;;  %v8422_v18 = vadd.f32 %v2244_v37, %v8073_v29 }
 0x3a5   :  { %9192 = vst [vmem:[#allocation26_spill] sm:$0xff] %v8422_v18 }
 0x3a7   :  { %v2143_v35 = vpop.f32.mrf.mxu3 }
 0x3a8   :  { %v2144_v29 = vadd.f32 %v2143_v35, %v2074_v24  ;;  %v2313_v43 = vpop.f32.mrf.mxu2  ;;  %v5749_v24 = vor.u32 %v6438_v4, %v5746_v27  ;;  %v5686_v4 = vld [vmem:[%s9132_s4 + $0x378] sm:$0xf0] }
 0x3a9   :  { %v8437_v13 = vadd.f32 %v2313_v43, %v8089_v60  ;;  %v2077_v45 = vpop.f32.mrf.mxu1  ;;  %v9198_v43 = vld [vmem:[#allocation49_spill] sm:$0xff] }
 0x3aa   :  { %v2170_v51 = vpack.c.bf16 %v2144_v29, %v2142_v57  ;;  %v2247_v40 = vpop.f32.mrf.mxu0  ;;  %v2801_v60 = vsel %vm936_vm1, %v5749_v24, 0  ;;  %v5744_v57 = vld [vmem:[#allocation2 + $0x90] sm:$0xf]  ;;  %v6439_v29 = vld [vmem:[#allocation2 + $0x94] sm:$0x30] }
 0x3ab   :  { %9193 = vst [vmem:[#allocation25_spill] sm:$0xff] %v8437_v13  ;;  %v8440_v0 = vadd.f32 %v2247_v40, %v9194_v58  ;;  %2878 = vmatpush.bf16.msra.mxu2 %v2801_v60  ;;  %v6427_v40 = vld [vmem:[%s9132_s4 + $0x374] sm:$0xf0]  ;;  %v6426_v58 = vld [vmem:[%s9132_s4 + $0x374] sm:$0xf] }
 0x3ac   :  { %2626 = vmatmul.bf16.gmra.mxu1 %v5677_v53  ;;  %5728 = vmatmul.msk.bf16.gmra.mxu3 %vm366_vm0, %v5681_v3  ;;  %v5745_v3 = vor.u32 %v6439_v29, %v5744_v57  ;;  %v5736_v60 = vld [vmem:[#allocation2 + $0x80] sm:$0xf] }
 0x3ad   :  { %9195 = vst [vmem:[#allocation29_spill] sm:$0xff] %v8440_v0  ;;  %5587 = vmatmul.msk.bf16.gmra.mxu0 %vm899_vm2, %v2170_v51  ;;  %5599 = vmatmul.msk.bf16.gmra.mxu2 %vm899_vm2, %v2170_v51  ;;  %v5684_v51 = vld [vmem:[%s9132_s4 + $0x370] sm:$0xf]  ;;  %v5738_v0 = vld [vmem:[#allocation2 + $0x88] sm:$0xf0] }
 0x3ae   :  { %v2798_v27 = vsel %vm936_vm1, %v5745_v3, 0 }
 0x3af   :  { %v2146_v37 = vpop.f32.mrf.mxu3  ;;  %2809 = vmatpush.bf16.msra.mxu0 %v2798_v27 }
 0x3b0   :  { %v2316_v48 = vpop.f32.mrf.mxu2  ;;  %v2147_v57 = vadd.f32 %v2146_v37, %v2077_v45 }
 0x3b1   :  { %v8447_v7 = vadd.f32 %v2316_v48, %v9196_v42  ;;  %v2079_v50 = vpop.f32.mrf.mxu1  ;;  %v5685_v48 = vor.u32 %v6427_v40, %v5684_v51  ;;  %v6437_v42 = vld [vmem:[#allocation2 + $0x84] sm:$0xf0] }
 0x3b2   :  { %v2249_v35 = vpop.f32.mrf.mxu0 }
 0x3b3   :  { %9197 = vst [vmem:[#allocation28_spill] sm:$0xff] %v8447_v7  ;;  %v8450_v53 = vadd.f32 %v2249_v35, %v9198_v43  ;;  %v6436_v35 = vld [vmem:[#allocation2 + $0x84] sm:$0xf]  ;;  %v5737_v7 = vor.u32 %v6437_v42, %v5736_v60 }
 0x3b4   :  { %v5741_v19 = vor.u32 %v6436_v35, %v5738_v0 }
 0x3b5   :  { %9199 = vst [vmem:[#allocation27_spill] sm:$0xff] %v8450_v53  ;;  %v5689_v53 = vor.u32 %v6426_v58, %v5686_v4  ;;  %2810 = vmatpush.bf16.msra.mxu0 %v5737_v7 }
 0x3b6   :  { %2879 = vmatpush.bf16.msra.mxu2 %v5741_v19 }
 0x3b7   :  { %v2148_v24 = vpop.f32.mrf.mxu3 }
 0x3b8   :  { %v2149_v29 = vadd.f32 %v2148_v24, %v2079_v50  ;;  %v2318_v43 = vpop.f32.mrf.mxu2 }
 0x3b9   :  { %v8466_v13 = vadd.f32 %v2318_v43, %v8120_v16  ;;  %v2082_v18 = vpop.f32.mrf.mxu1  ;;  %v6431_v43 = vld [vmem:[%s9132_s4 + $0x394] sm:$0xf0] }
 0x3ba   :  { %v2171_v49 = vpack.c.bf16 %v2149_v29, %v2147_v57  ;;  %v2252_v2 = vpop.f32.mrf.mxu0 }
 0x3bb   :  { %v8469_v3 = vadd.f32 %v2252_v2, %v8123_v32  ;;  %v5692_v32 = vld [vmem:[%s9132_s4 + $0x380] sm:$0xf]  ;;  %v6429_v2 = vld [vmem:[%s9132_s4 + $0x384] sm:$0xf0] }
 0x3bc   :  { %2631 = vmatmul.bf16.gmra.mxu1 %v5685_v48  ;;  %5729 = vmatmul.msk.bf16.gmra.mxu3 %vm366_vm0, %v5689_v53  ;;  %v5693_v40 = vor.u32 %v6429_v2, %v5692_v32 }
 0x3bd   :  { %5588 = vmatmul.msk.bf16.gmra.mxu0 %vm899_vm2, %v2171_v49  ;;  %5600 = vmatmul.msk.bf16.gmra.mxu2 %vm899_vm2, %v2171_v49  ;;  %v6428_v49 = vld [vmem:[%s9132_s4 + $0x384] sm:$0xf] }
 0x3bf   :  { %v2151_v45 = vpop.f32.mrf.mxu3 }
 0x3c0   :  { %v2321_v37 = vpop.f32.mrf.mxu2  ;;  %v2152_v53 = vadd.f32 %v2151_v45, %v2082_v18  ;;  %v6430_v45 = vld [vmem:[%s9132_s4 + $0x394] sm:$0xf] }
 0x3c1   :  { %v8475_v16 = vadd.f32 %v2321_v37, %v8131_v28  ;;  %v2084_v0 = vpop.f32.mrf.mxu1  ;;  %v5694_v28 = vld [vmem:[%s9132_s4 + $0x388] sm:$0xf0] }
 0x3c2   :  { %v2254_v50 = vpop.f32.mrf.mxu0  ;;  %v5697_v58 = vor.u32 %v6428_v49, %v5694_v28 }
 0x3c3   :  { %v8478_v7 = vadd.f32 %v2254_v50, %v8133_v59 }
 0x3c7   :  { %v2153_v19 = vpop.f32.mrf.mxu3 }
 0x3c8   :  { %v2154_v59 = vadd.f32 %v2153_v19, %v2084_v0  ;;  %v2323_v51 = vpop.f32.mrf.mxu2 }
 0x3c9   :  { %v8493_v4 = vadd.f32 %v2323_v51, %v8149_v47  ;;  %v2597_v27 = vpop.f32.mrf.mxu1 }
 0x3ca   :  { %v2172_v24 = vpack.c.bf16 %v2154_v59, %v2152_v53  ;;  %v2257_v48 = vpop.f32.mrf.mxu0 }
 0x3cb   :  { %v8496_v60 = vadd.f32 %v2257_v48, %v8152_v54  ;;  %v5700_v54 = vld [vmem:[%s9132_s4 + $0x390] sm:$0xf]  ;;  %v6433_v48 = vld [vmem:[%s9132_s4 + $0x3a4] sm:$0xf0] }
 0x3cc   :  { %2636 = vmatmul.bf16.gmra.mxu1 %v5693_v40  ;;  %5730 = vmatmul.msk.bf16.gmra.mxu3 %vm366_vm0, %v5697_v58  ;;  %v5701_v32 = vor.u32 %v6431_v43, %v5700_v54 }
 0x3cd   :  { %5589 = vmatmul.msk.bf16.gmra.mxu0 %vm899_vm2, %v2172_v24  ;;  %5601 = vmatmul.msk.bf16.gmra.mxu2 %vm899_vm2, %v2172_v24 }
 0x3cf   :  { %v2666_v18 = vpop.f32.mrf.mxu3 }
 0x3d0   :  { %v2326_v42 = vpop.f32.mrf.mxu2  ;;  %v2667_v0 = vadd.f32 %v2666_v18, %v2597_v27  ;;  %v6432_v18 = vld [vmem:[%s9132_s4 + $0x3a4] sm:$0xf] }
 0x3d1   :  { %v8502_v35 = vadd.f32 %v2326_v42, %v8160_v30  ;;  %v2599_v47 = vpop.f32.mrf.mxu1  ;;  %v5702_v30 = vld [vmem:[%s9132_s4 + $0x398] sm:$0xf0] }
 0x3d2   :  { %v2259_v57 = vpop.f32.mrf.mxu0  ;;  %v5705_v2 = vor.u32 %v6430_v45, %v5702_v30 }
 0x3d3   :  { %v8505_v29 = vadd.f32 %v2259_v57, %v8162_v55 }
 0x3d7   :  { %v2668_v37 = vpop.f32.mrf.mxu3 }
 0x3d8   :  { %v2328_v55 = vpop.f32.mrf.mxu2  ;;  %v2669_v50 = vadd.f32 %v2668_v37, %v2599_v47 }
 0x3d9   :  { %v8520_v49 = vadd.f32 %v2328_v55, %v8178_v62  ;;  %v2602_v28 = vpop.f32.mrf.mxu1 }
 0x3da   :  { %v2731_v19 = vpack.c.bf16 %v2669_v50, %v2667_v0  ;;  %v2262_v53 = vpop.f32.mrf.mxu0 }
 0x3db   :  { %v8523_v59 = vadd.f32 %v2262_v53, %v8181_v44  ;;  %v5708_v44 = vld [vmem:[%s9132_s4 + $0x3a0] sm:$0xf]  ;;  %v6435_v53 = vld [vmem:[%s9132_s4 + $0x3b4] sm:$0xf0] }
 0x3dc   :  { %2641 = vmatmul.bf16.gmra.mxu1 %v5701_v32  ;;  %5731 = vmatmul.msk.bf16.gmra.mxu3 %vm366_vm0, %v5705_v2  ;;  %v5709_v54 = vor.u32 %v6433_v48, %v5708_v44 }
 0x3dd   :  { %5750 = vmatmul.msk.bf16.vlgmr.msra.gmra.mxu0 %vm899_vm2, %v2731_v19  ;;  %5762 = vmatmul.msk.bf16.vlgmr.msra.gmra.mxu2 %vm899_vm2, %v2731_v19 }
 0x3df   :  { %v2671_v51 = vpop.f32.mrf.mxu3 }
 0x3e0   :  { %v2331_v40 = vpop.f32.mrf.mxu2  ;;  %v2672_v47 = vadd.f32 %v2671_v51, %v2602_v28  ;;  %v6434_v51 = vld [vmem:[%s9132_s4 + $0x3b4] sm:$0xf] }
 0x3e1   :  { %v8529_v58 = vadd.f32 %v2331_v40, %v8189_v21  ;;  %v2604_v62 = vpop.f32.mrf.mxu1  ;;  %v5710_v21 = vld [vmem:[%s9132_s4 + $0x3a8] sm:$0xf0] }
 0x3e2   :  { %v2264_v27 = vpop.f32.mrf.mxu0  ;;  %v5713_v43 = vor.u32 %v6432_v18, %v5710_v21 }
 0x3e3   :  { %v8532_v24 = vadd.f32 %v2264_v27, %v8191_v34 }
 0x3e7   :  { %v2673_v42 = vpop.f32.mrf.mxu3 }
 0x3e8   :  { %v2333_v34 = vpop.f32.mrf.mxu2  ;;  %v2674_v57 = vadd.f32 %v2673_v42, %v2604_v62 }
 0x3e9   :  { %v8547_v45 = vadd.f32 %v2333_v34, %v8207_v20  ;;  %v2607_v30 = vpop.f32.mrf.mxu1 }
 0x3ea   :  { %v2732_v37 = vpack.c.bf16 %v2674_v57, %v2672_v47  ;;  %v2267_v0 = vpop.f32.mrf.mxu0 }
 0x3eb   :  { %v8550_v55 = vadd.f32 %v2267_v0, %v8210_v6  ;;  %v5716_v6 = vld [vmem:[%s9132_s4 + $0x3b0] sm:$0xf] }
 0x3ec   :  { %2646 = vmatmul.bf16.gmra.mxu1 %v5709_v54  ;;  %5732 = vmatmul.msk.bf16.gmra.mxu3 %vm366_vm0, %v5713_v43  ;;  %v5717_v44 = vor.u32 %v6435_v53, %v5716_v6 }
 0x3ed   :  { %5751 = vmatmul.msk.bf16.gmra.mxu0 %vm899_vm2, %v2732_v37  ;;  %5763 = vmatmul.msk.bf16.gmra.mxu2 %vm899_vm2, %v2732_v37 }
 0x3ef   :  { %v2676_v50 = vpop.f32.mrf.mxu3 }
 0x3f0   :  { %v2336_v32 = vpop.f32.mrf.mxu2  ;;  %v2677_v62 = vadd.f32 %v2676_v50, %v2607_v30 }
 0x3f1   :  { %v8556_v2 = vadd.f32 %v2336_v32, %v8218_v23  ;;  %v2609_v20 = vpop.f32.mrf.mxu1  ;;  %v5718_v23 = vld [vmem:[%s9132_s4 + $0x3b8] sm:$0xf0] }
 0x3f2   :  { %v2269_v28 = vpop.f32.mrf.mxu0  ;;  %v5721_v48 = vor.u32 %v6434_v51, %v5718_v23 }
 0x3f3   :  { %v8559_v19 = vadd.f32 %v2269_v28, %v8220_v10 }
 0x3f7   :  { %v2678_v40 = vpop.f32.mrf.mxu3 }
 0x3f8   :  { %v2338_v10 = vpop.f32.mrf.mxu2  ;;  %v2679_v27 = vadd.f32 %v2678_v40, %v2609_v20 }
 0x3f9   :  { %v8574_v18 = vadd.f32 %v2338_v10, %v8236_v5  ;;  %v2612_v21 = vpop.f32.mrf.mxu1 }
 0x3fa   :  { %v2733_v42 = vpack.c.bf16 %v2679_v27, %v2677_v62  ;;  %v2272_v47 = vpop.f32.mrf.mxu0 }
 0x3fb   :  { %v8577_v34 = vadd.f32 %v2272_v47, %v8239_v8 }
 0x3fc   :  { %2651 = vmatmul.bf16.gmra.mxu1 %v5717_v44  ;;  %5733 = vmatmul.msk.bf16.gmra.mxu3 %vm366_vm0, %v5721_v48 }
 0x3fd   :  { %5752 = vmatmul.msk.bf16.gmra.mxu0 %vm899_vm2, %v2733_v42  ;;  %5764 = vmatmul.msk.bf16.gmra.mxu2 %vm899_vm2, %v2733_v42 }
 0x3ff   :  { %v2681_v57 = vpop.f32.mrf.mxu3 }
 0x400   :  { %v2341_v54 = vpop.f32.mrf.mxu2  ;;  %v2682_v8 = vadd.f32 %v2681_v57, %v2612_v21 }
 0x401   :  { %v8583_v43 = vadd.f32 %v2341_v54, %v8247_v1  ;;  %v2614_v5 = vpop.f32.mrf.mxu1 }
 0x402   :  { %v2274_v30 = vpop.f32.mrf.mxu0 }
 0x403   :  { %v8586_v37 = vadd.f32 %v2274_v30, %v8249_v56 }
 0x407   :  { %v2683_v0 = vpop.f32.mrf.mxu3 }
 0x408   :  { %v2343_v50 = vpop.f32.mrf.mxu2  ;;  %v2684_v32 = vadd.f32 %v2683_v0, %v2614_v5 }
 0x409   :  { %v8589_v20 = vadd.f32 %v2343_v50, %v8265_v17  ;;  %v2617_v28 = vpop.f32.mrf.mxu1 }
 0x40a   :  { %v2734_v6 = vpack.c.bf16 %v2684_v32, %v2682_v8  ;;  %v2277_v53 = vpop.f32.mrf.mxu0 }
 0x40b   :  { %v8592_v51 = vadd.f32 %v2277_v53, %v8268_v22 }
 0x40d   :  { %5753 = vmatmul.msk.bf16.gmra.mxu0 %vm899_vm2, %v2734_v6  ;;  %5765 = vmatmul.msk.bf16.gmra.mxu2 %vm899_vm2, %v2734_v6 }
 0x40f   :  { %v2686_v1 = vpop.f32.mrf.mxu3 }
 0x410   :  { %v2346_v56 = vpop.f32.mrf.mxu2  ;;  %v2687_v27 = vadd.f32 %v2686_v1, %v2617_v28 }
 0x411   :  { %v8597_v23 = vadd.f32 %v2346_v56, %v8276_v31  ;;  %v2619_v40 = vpop.f32.mrf.mxu1 }
 0x412   :  { %v2279_v62 = vpop.f32.mrf.mxu0 }
 0x413   :  { %v8600_v17 = vadd.f32 %v2279_v62, %v8278_v26 }
 0x417   :  { %v2688_v10 = vpop.f32.mrf.mxu3 }
 0x418   :  { %v2348_v44 = vpop.f32.mrf.mxu2  ;;  %v2689_v48 = vadd.f32 %v2688_v10, %v2619_v40 }
 0x419   :  { %v8603_v22 = vadd.f32 %v2348_v44, %v8294_v39  ;;  %v2622_v21 = vpop.f32.mrf.mxu1 }
 0x41a   :  { %v2735_v42 = vpack.c.bf16 %v2689_v48, %v2687_v27  ;;  %v2282_v47 = vpop.f32.mrf.mxu0 }
 0x41b   :  { %v8606_v57 = vadd.f32 %v2282_v47, %v8297_v14 }
 0x41d   :  { %5754 = vmatmul.msk.bf16.gmra.mxu0 %vm899_vm2, %v2735_v42  ;;  %5766 = vmatmul.msk.bf16.gmra.mxu2 %vm899_vm2, %v2735_v42 }
 0x41f   :  { %v2691_v31 = vpop.f32.mrf.mxu3 }
 0x420   :  { %v2351_v26 = vpop.f32.mrf.mxu2  ;;  %v2692_v8 = vadd.f32 %v2691_v31, %v2622_v21 }
 0x421   :  { %v8611_v54 = vadd.f32 %v2351_v26, %v8305_v63  ;;  %v2624_v5 = vpop.f32.mrf.mxu1 }
 0x422   :  { %v2284_v30 = vpop.f32.mrf.mxu0 }
 0x423   :  { %v8614_v39 = vadd.f32 %v2284_v30, %v8307_v38 }
 0x427   :  { %v2693_v0 = vpop.f32.mrf.mxu3 }
 0x428   :  { %v2353_v50 = vpop.f32.mrf.mxu2  ;;  %v2694_v32 = vadd.f32 %v2693_v0, %v2624_v5 }
 0x429   :  { %v8617_v14 = vadd.f32 %v2353_v50, %v8323_v36  ;;  %v2627_v28 = vpop.f32.mrf.mxu1 }
 0x42a   :  { %v2736_v6 = vpack.c.bf16 %v2694_v32, %v2692_v8  ;;  %v2287_v53 = vpop.f32.mrf.mxu0 }
 0x42b   :  { %v8620_v1 = vadd.f32 %v2287_v53, %v8326_v12 }
 0x42d   :  { %5755 = vmatmul.msk.bf16.gmra.mxu0 %vm899_vm2, %v2736_v6  ;;  %5767 = vmatmul.msk.bf16.gmra.mxu2 %vm899_vm2, %v2736_v6 }
 0x42f   :  { %v2696_v63 = vpop.f32.mrf.mxu3 }
 0x430   :  { %v2356_v38 = vpop.f32.mrf.mxu2  ;;  %v2697_v27 = vadd.f32 %v2696_v63, %v2627_v28 }
 0x431   :  { %v8625_v56 = vadd.f32 %v2356_v38, %v8334_v52  ;;  %v2629_v40 = vpop.f32.mrf.mxu1 }
 0x432   :  { %v2289_v62 = vpop.f32.mrf.mxu0 }
 0x433   :  { %v8628_v36 = vadd.f32 %v2289_v62, %v8336_v9 }
 0x437   :  { %v2698_v10 = vpop.f32.mrf.mxu3 }
 0x438   :  { %v2358_v44 = vpop.f32.mrf.mxu2  ;;  %v2699_v48 = vadd.f32 %v2698_v10, %v2629_v40  ;;  %v9201_v10 = vld [vmem:[#allocation23_spill] sm:$0xff] }
 0x439   :  { %v8631_v12 = vadd.f32 %v2358_v44, %v8352_v41  ;;  %v2632_v21 = vpop.f32.mrf.mxu1 }
 0x43a   :  { %v2737_v42 = vpack.c.bf16 %v2699_v48, %v2697_v27  ;;  %v2292_v47 = vpop.f32.mrf.mxu0 }
 0x43b   :  { %v8634_v31 = vadd.f32 %v2292_v47, %v8355_v15 }
 0x43d   :  { %5756 = vmatmul.msk.bf16.gmra.mxu0 %vm899_vm2, %v2737_v42  ;;  %5768 = vmatmul.msk.bf16.gmra.mxu2 %vm899_vm2, %v2737_v42 }
 0x43f   :  { %v2701_v52 = vpop.f32.mrf.mxu3 }
 0x440   :  { %v2361_v9 = vpop.f32.mrf.mxu2  ;;  %v2702_v8 = vadd.f32 %v2701_v52, %v2632_v21 }
 0x441   :  { %v8639_v26 = vadd.f32 %v2361_v9, %v8363_v11  ;;  %v2634_v5 = vpop.f32.mrf.mxu1 }
 0x442   :  { %v2294_v30 = vpop.f32.mrf.mxu0 }
 0x443   :  { %v8642_v41 = vadd.f32 %v2294_v30, %v8365_v33 }
 0x447   :  { %v2703_v0 = vpop.f32.mrf.mxu3 }
 0x448   :  { %v2363_v50 = vpop.f32.mrf.mxu2  ;;  %v2704_v32 = vadd.f32 %v2703_v0, %v2634_v5  ;;  %v9204_v5 = vld [vmem:[#allocation21_spill] sm:$0xff] }
 0x449   :  { %v8645_v15 = vadd.f32 %v2363_v50, %v8381_v46  ;;  %v2637_v28 = vpop.f32.mrf.mxu1 }
 0x44a   :  { %v2738_v6 = vpack.c.bf16 %v2704_v32, %v2702_v8  ;;  %v2297_v53 = vpop.f32.mrf.mxu0  ;;  %v9205_v32 = vld [vmem:[#allocation24_spill] sm:$0xff] }
 0x44b   :  { %v8648_v63 = vadd.f32 %v2297_v53, %v8384_v61  ;;  %v9202_v61 = vld [vmem:[#allocation22_spill] sm:$0xff] }
 0x44d   :  { %5757 = vmatmul.msk.bf16.gmra.mxu0 %vm899_vm2, %v2738_v6  ;;  %5769 = vmatmul.msk.bf16.gmra.mxu2 %vm899_vm2, %v2738_v6 }
 0x44f   :  { %v2706_v11 = vpop.f32.mrf.mxu3 }
 0x450   :  { %v2366_v33 = vpop.f32.mrf.mxu2  ;;  %v2707_v44 = vadd.f32 %v2706_v11, %v2637_v28 }
 0x451   :  { %v8653_v38 = vadd.f32 %v2366_v33, %v8392_v25  ;;  %v2639_v40 = vpop.f32.mrf.mxu1  ;;  %v2989_v25 = vld [vmem:[%s9107_s3] sm:$0x3]  ;;  %v9206_v33 = vld [vmem:[#allocation26_spill] sm:$0xff] }
 0x452   :  { %v2299_v62 = vpop.f32.mrf.mxu0  ;;  %v8667_v0 = vperm.slane %v2989_v25, 0 }
 0x453   :  { %9200 = vst [vmem:[#allocation30_spill] sm:$0xff] %v8653_v38  ;;  %v8656_v46 = vadd.f32 %v2299_v62, %v9201_v10  ;;  %v8672_v62 = vperm.slane %v2989_v25, 1 }
 0x457   :  { %v2708_v27 = vpop.f32.mrf.mxu3 }
 0x458   :  { %v2368_v48 = vpop.f32.mrf.mxu2  ;;  %v2709_v21 = vadd.f32 %v2708_v27, %v2639_v40 }
 0x459   :  { %v8659_v42 = vadd.f32 %v2368_v48, %v9202_v61  ;;  %v2642_v47 = vpop.f32.mrf.mxu1 }
 0x45a   :  { %v2739_v52 = vpack.c.bf16 %v2709_v21, %v2707_v44  ;;  %v2812_v9 = vpop.f32.mrf.mxu0 }
 0x45b   :  { %9203 = vst [vmem:[#allocation32_spill] sm:$0xff] %v8659_v42  ;;  %v2941_v30 = vadd.f32 %v2812_v9, %v9204_v5  ;;  %v9207_v5 = vld [vmem:[#allocation25_spill] sm:$0xff] }
 0x45d   :  { %5758 = vmatmul.msk.bf16.gmra.mxu0 %vm899_vm2, %v2739_v52  ;;  %5770 = vmatmul.msk.bf16.gmra.mxu2 %vm899_vm2, %v2739_v52  ;;  %v2995_v11 = vadd.f32 %v8667_v0, %v2941_v30 }
 0x45f   :  { %v2711_v8 = vpop.f32.mrf.mxu3  ;;  %v3043_v27 = vmax.f32 %v2995_v11, 0.0 }
 0x460   :  { %v2881_v50 = vpop.f32.mrf.mxu2  ;;  %v2712_v21 = vadd.f32 %v2711_v8, %v2642_v47 }
 0x461   :  { %v2942_v28 = vadd.f32 %v2881_v50, %v9205_v32  ;;  %v2644_v6 = vpop.f32.mrf.mxu1 }
 0x462   :  { %v2814_v53 = vpop.f32.mrf.mxu0 }
 0x463   :  { %v2943_v40 = vadd.f32 %v2814_v53, %v9206_v33  ;;  %v2996_v9 = vadd.f32 %v8672_v62, %v2942_v28  ;;  %v9208_v53 = vld [vmem:[#allocation29_spill] sm:$0xff] }
 0x465   :  { %v2997_v10 = vadd.f32 %v8667_v0, %v2943_v40  ;;  %v3044_v40 = vmax.f32 %v2996_v9, 0.0 }
 0x467   :  { %v3045_v44 = vmax.f32 %v2997_v10, 0.0  ;;  %v2713_v48 = vpop.f32.mrf.mxu3 }
 0x468   :  { %v2714_v61 = vadd.f32 %v2713_v48, %v2644_v6  ;;  %v2883_v52 = vpop.f32.mrf.mxu2  ;;  %v9209_v6 = vld [vmem:[#allocation28_spill] sm:$0xff] }
 0x469   :  { %v2944_v50 = vadd.f32 %v2883_v52, %v9207_v5  ;;  %v2647_v32 = vpop.f32.mrf.mxu1  ;;  %v8677_v42 = vpack.c.bf16 %v3045_v44, %v3043_v27 }
 0x46a   :  { %v2740_v30 = vpack.c.bf16 %v2714_v61, %v2712_v21  ;;  %v2817_v38 = vpop.f32.mrf.mxu0  ;;  %v9210_v21 = vld [vmem:[#allocation27_spill] sm:$0xff] }
 0x46b   :  { %v2998_v25 = vadd.f32 %v8672_v62, %v2944_v50  ;;  %v2945_v33 = vadd.f32 %v2817_v38, %v9208_v53 }
 0x46d   :  { %v3046_v11 = vmax.f32 %v2998_v25, 0.0  ;;  %5759 = vmatmul.msk.bf16.gmra.mxu0 %vm899_vm2, %v2740_v30  ;;  %5771 = vmatmul.msk.bf16.gmra.mxu2 %vm899_vm2, %v2740_v30  ;;  %v2999_v44 = vadd.f32 %v8667_v0, %v2945_v33 }
 0x46f   :  { %v2716_v47 = vpop.f32.mrf.mxu3  ;;  %v8683_v8 = vpack.c.bf16 %v3046_v11, %v3044_v40  ;;  %v3047_v52 = vmax.f32 %v2999_v44, 0.0 }
 0x470   :  { %v2886_v28 = vpop.f32.mrf.mxu2  ;;  %v2717_v50 = vadd.f32 %v2716_v47, %v2647_v32 }
 0x471   :  { %v2946_v10 = vadd.f32 %v2886_v28, %v9209_v6  ;;  %v2649_v48 = vpop.f32.mrf.mxu1 }
 0x472   :  { %v2819_v27 = vpop.f32.mrf.mxu0 }
 0x473   :  { %v2947_v61 = vadd.f32 %v2819_v27, %v9210_v21  ;;  %v3000_v53 = vadd.f32 %v8672_v62, %v2946_v10 }
 0x475   :  { %v3001_v38 = vadd.f32 %v8667_v0, %v2947_v61  ;;  %v3048_v21 = vmax.f32 %v3000_v53, 0.0 }
 0x477   :  { %v3049_v9 = vmax.f32 %v3001_v38, 0.0  ;;  %v2718_v5 = vpop.f32.mrf.mxu3 }
 0x478   :  { %v2719_v25 = vadd.f32 %v2718_v5, %v2649_v48  ;;  %v2888_v30 = vpop.f32.mrf.mxu2 }
 0x479   :  { %v2948_v40 = vadd.f32 %v2888_v30, %v8466_v13  ;;  %v8691_v11 = vpack.c.bf16 %v3049_v9, %v3047_v52  ;;  %v2652_v44 = vpop.f32.mrf.mxu1 }
 0x47a   :  { %v2741_v28 = vpack.c.bf16 %v2719_v25, %v2717_v50  ;;  %v2822_v6 = vpop.f32.mrf.mxu0 }
 0x47b   :  { %v3002_v33 = vadd.f32 %v8672_v62, %v2948_v40  ;;  %v2949_v27 = vadd.f32 %v2822_v6, %v8469_v3 }
 0x47d   :  { %v3050_v61 = vmax.f32 %v3002_v33, 0.0  ;;  %5760 = vmatmul.msk.bf16.gmra.mxu0 %vm899_vm2, %v2741_v28  ;;  %5772 = vmatmul.msk.bf16.gmra.mxu2 %vm899_vm2, %v2741_v28  ;;  %v3003_v38 = vadd.f32 %v8667_v0, %v2949_v27 }
 0x47f   :  { %v2721_v32 = vpop.f32.mrf.mxu3  ;;  %v8697_v47 = vpack.c.bf16 %v3050_v61, %v3048_v21  ;;  %v3051_v9 = vmax.f32 %v3003_v38, 0.0 }
 0x480   :  { %v2891_v10 = vpop.f32.mrf.mxu2  ;;  %v2722_v30 = vadd.f32 %v2721_v32, %v2652_v44 }
 0x481   :  { %v2950_v13 = vadd.f32 %v2891_v10, %v8475_v16  ;;  %v2654_v5 = vpop.f32.mrf.mxu1 }
 0x482   :  { %v2824_v48 = vpop.f32.mrf.mxu0 }
 0x483   :  { %v2951_v52 = vadd.f32 %v2824_v48, %v8478_v7  ;;  %v3004_v28 = vadd.f32 %v8672_v62, %v2950_v13 }
 0x485   :  { %v3005_v3 = vadd.f32 %v8667_v0, %v2951_v52  ;;  %v3052_v61 = vmax.f32 %v3004_v28, 0.0 }
 0x487   :  { %v3053_v50 = vmax.f32 %v3005_v3, 0.0  ;;  %v2723_v25 = vpop.f32.mrf.mxu3 }
 0x488   :  { %v2724_v53 = vadd.f32 %v2723_v25, %v2654_v5  ;;  %v2893_v40 = vpop.f32.mrf.mxu2 }
 0x489   :  { %v2952_v6 = vadd.f32 %v2893_v40, %v8493_v4  ;;  %v8705_v33 = vpack.c.bf16 %v3053_v50, %v3051_v9 }
 0x48a   :  { %v2742_v16 = vpack.c.bf16 %v2724_v53, %v2722_v30  ;;  %v2827_v21 = vpop.f32.mrf.mxu0 }
 0x48b   :  { %v3006_v27 = vadd.f32 %v8672_v62, %v2952_v6  ;;  %v2953_v7 = vadd.f32 %v2827_v21, %v8496_v60 }
 0x48d   :  { %v3054_v10 = vmax.f32 %v3006_v27, 0.0  ;;  %5761 = vmatmul.msk.bf16.gmra.mxu0 %vm899_vm2, %v2742_v16  ;;  %5773 = vmatmul.msk.bf16.gmra.mxu2 %vm899_vm2, %v2742_v16  ;;  %v3007_v48 = vadd.f32 %v8667_v0, %v2953_v7 }
 0x48f   :  { %v8711_v44 = vpack.c.bf16 %v3054_v10, %v3052_v61  ;;  %v3055_v3 = vmax.f32 %v3007_v48, 0.0 }
 0x490   :  { %v2896_v32 = vpop.f32.mrf.mxu2 }
 0x491   :  { %v2954_v13 = vadd.f32 %v2896_v32, %v8502_v35 }
 0x492   :  { %v2829_v4 = vpop.f32.mrf.mxu0 }
 0x493   :  { %v2955_v38 = vadd.f32 %v2829_v4, %v8505_v29  ;;  %v3008_v5 = vadd.f32 %v8672_v62, %v2954_v13 }
 0x495   :  { %v3009_v52 = vadd.f32 %v8667_v0, %v2955_v38  ;;  %v3056_v40 = vmax.f32 %v3008_v5, 0.0 }
 0x497   :  { %v3057_v60 = vmax.f32 %v3009_v52, 0.0 }
 0x498   :  { %v2898_v9 = vpop.f32.mrf.mxu2 }
 0x499   :  { %v2956_v50 = vadd.f32 %v2898_v9, %v8520_v49  ;;  %v8719_v25 = vpack.c.bf16 %v3057_v60, %v3055_v3 }
 0x49a   :  { %v2832_v30 = vpop.f32.mrf.mxu0 }
 0x49b   :  { %v3010_v53 = vadd.f32 %v8672_v62, %v2956_v50  ;;  %v2957_v35 = vadd.f32 %v2832_v30, %v8523_v59 }
 0x49d   :  { %v3058_v28 = vmax.f32 %v3010_v53, 0.0  ;;  %v3011_v27 = vadd.f32 %v8667_v0, %v2957_v35 }
 0x49f   :  { %v8723_v6 = vpack.c.bf16 %v3058_v28, %v3056_v40  ;;  %v3059_v61 = vmax.f32 %v3011_v27, 0.0 }
 0x4a0   :  { %v2901_v29 = vpop.f32.mrf.mxu2 }
 0x4a1   :  { %v2958_v16 = vadd.f32 %v2901_v29, %v8529_v58 }
 0x4a2   :  { %v2834_v21 = vpop.f32.mrf.mxu0 }
 0x4a3   :  { %v2959_v7 = vadd.f32 %v2834_v21, %v8532_v24  ;;  %v3012_v13 = vadd.f32 %v8672_v62, %v2958_v16 }
 0x4a5   :  { %v3013_v49 = vadd.f32 %v8667_v0, %v2959_v7  ;;  %v3060_v58 = vmax.f32 %v3012_v13, 0.0 }
 0x4a7   :  { %v3061_v10 = vmax.f32 %v3013_v49, 0.0 }
 0x4a8   :  { %v2903_v32 = vpop.f32.mrf.mxu2 }
 0x4a9   :  { %v2960_v59 = vadd.f32 %v2903_v32, %v8547_v45  ;;  %v8731_v4 = vpack.c.bf16 %v3061_v10, %v3059_v61 }
 0x4aa   :  { %v2837_v48 = vpop.f32.mrf.mxu0 }
 0x4ab   :  { %v3014_v38 = vadd.f32 %v8672_v62, %v2960_v59  ;;  %v2961_v3 = vadd.f32 %v2837_v48, %v8550_v55 }
 0x4ad   :  { %v3062_v52 = vmax.f32 %v3014_v38, 0.0  ;;  %v3015_v5 = vadd.f32 %v8667_v0, %v2961_v3 }
 0x4af   :  { %v8735_v60 = vpack.c.bf16 %v3062_v52, %v3060_v58  ;;  %v3063_v53 = vmax.f32 %v3015_v5, 0.0 }
 0x4b0   :  { %v2906_v24 = vpop.f32.mrf.mxu2 }
 0x4b1   :  { %v2962_v30 = vadd.f32 %v2906_v24, %v8556_v2 }
 0x4b2   :  { %v2839_v9 = vpop.f32.mrf.mxu0 }
 0x4b3   :  { %v2963_v50 = vadd.f32 %v2839_v9, %v8559_v19  ;;  %v3016_v28 = vadd.f32 %v8672_v62, %v2962_v30 }
 0x4b5   :  { %v3017_v45 = vadd.f32 %v8667_v0, %v2963_v50  ;;  %v3064_v27 = vmax.f32 %v3016_v28, 0.0 }
 0x4b7   :  { %v3065_v35 = vmax.f32 %v3017_v45, 0.0 }
 0x4b8   :  { %v2908_v40 = vpop.f32.mrf.mxu2 }
 0x4b9   :  { %v2964_v29 = vadd.f32 %v2908_v40, %v8574_v18  ;;  %v3113_v55 = vpack.c.bf16 %v3065_v35, %v3063_v53 }
 0x4ba   :  { %v2842_v16 = vpop.f32.mrf.mxu0 }
 0x4bb   :  { %v3018_v21 = vadd.f32 %v8672_v62, %v2964_v29  ;;  %v2965_v49 = vadd.f32 %v2842_v16, %v8577_v34 }
 0x4bd   :  { %v3066_v7 = vmax.f32 %v3018_v21, 0.0  ;;  %v3019_v10 = vadd.f32 %v8667_v0, %v2965_v49 }
 0x4bf   :  { %v3114_v19 = vpack.c.bf16 %v3066_v7, %v3064_v27  ;;  %v3067_v18 = vmax.f32 %v3019_v10, 0.0 }
 0x4c0   :  { %v2911_v61 = vpop.f32.mrf.mxu2 }
 0x4c1   :  { %v2966_v13 = vadd.f32 %v2911_v61, %v8583_v43 }
 0x4c2   :  { %v2844_v2 = vpop.f32.mrf.mxu0 }
 0x4c3   :  { %v2967_v32 = vadd.f32 %v2844_v2, %v8586_v37  ;;  %v3020_v58 = vadd.f32 %v8672_v62, %v2966_v13 }
 0x4c5   :  { %v3021_v59 = vadd.f32 %v8667_v0, %v2967_v32  ;;  %v3068_v9 = vmax.f32 %v3020_v58, 0.0 }
 0x4c7   :  { %v3069_v48 = vmax.f32 %v3021_v59, 0.0 }
 0x4c8   :  { %v2913_v38 = vpop.f32.mrf.mxu2 }
 0x4c9   :  { %v2968_v52 = vadd.f32 %v2913_v38, %v8589_v20  ;;  %v3115_v3 = vpack.c.bf16 %v3069_v48, %v3067_v18 }
 0x4ca   :  { %v2847_v34 = vpop.f32.mrf.mxu0 }
 0x4cb   :  { %v3022_v24 = vadd.f32 %v8672_v62, %v2968_v52  ;;  %v2969_v50 = vadd.f32 %v2847_v34, %v8592_v51 }
 0x4cd   :  { %v3070_v5 = vmax.f32 %v3022_v24, 0.0  ;;  %v3023_v45 = vadd.f32 %v8667_v0, %v2969_v50 }
 0x4cf   :  { %v3116_v37 = vpack.c.bf16 %v3070_v5, %v3068_v9  ;;  %v3071_v20 = vmax.f32 %v3023_v45, 0.0 }
 0x4d0   :  { %v2916_v30 = vpop.f32.mrf.mxu2 }
 0x4d1   :  { %v2970_v35 = vadd.f32 %v2916_v30, %v8597_v23 }
 0x4d2   :  { %v2849_v43 = vpop.f32.mrf.mxu0 }
 0x4d3   :  { %v2971_v53 = vadd.f32 %v2849_v43, %v8600_v17  ;;  %v3024_v16 = vadd.f32 %v8672_v62, %v2970_v35 }
 0x4d5   :  { %v3025_v40 = vadd.f32 %v8667_v0, %v2971_v53  ;;  %v3072_v61 = vmax.f32 %v3024_v16, 0.0 }
 0x4d7   :  { %v3073_v28 = vmax.f32 %v3025_v40, 0.0 }
 0x4d8   :  { %v2918_v29 = vpop.f32.mrf.mxu2 }
 0x4d9   :  { %v3117_v21 = vpack.c.bf16 %v3073_v28, %v3071_v20  ;;  %v2972_v27 = vadd.f32 %v2918_v29, %v8603_v22 }
 0x4da   :  { %v2852_v51 = vpop.f32.mrf.mxu0 }
 0x4db   :  { %v3026_v7 = vadd.f32 %v8672_v62, %v2972_v27  ;;  %v2973_v49 = vadd.f32 %v2852_v51, %v8606_v57  ;;  %3200 = vmatpush.bf16.msrb.mxu1 %v3117_v21  ;;  %v5776_v27 = vld [vmem:[#allocation4] sm:$0xf]  ;;  %v6441_v51 = vld [vmem:[#allocation4 + $0x4] sm:$0xf0] }
 0x4dd   :  { %v3074_v17 = vmax.f32 %v3026_v7, 0.0  ;;  %v3027_v13 = vadd.f32 %v8667_v0, %v2973_v49  ;;  %v5777_v7 = vor.u32 %v6441_v51, %v5776_v27  ;;  %v6453_v27 = vld [vmem:[#allocation6 + $0x8] sm:$0xff] }
 0x4df   :  { %v3118_v2 = vpack.c.bf16 %v3074_v17, %v3072_v61  ;;  %3201 = vmatpush.bf16.msrb.mxu1 %v3115_v3  ;;  %v3075_v18 = vmax.f32 %v3027_v13, 0.0 }
 0x4e0   :  { %v2921_v23 = vpop.f32.mrf.mxu2 }
 0x4e1   :  { %v2974_v10 = vadd.f32 %v2921_v23, %v8611_v54  ;;  %3278 = vmatpush.bf16.msrb.mxu0 %v3118_v2 }
 0x4e2   :  { %v2854_v32 = vpop.f32.mrf.mxu0 }
 0x4e3   :  { %v2975_v59 = vadd.f32 %v2854_v32, %v8614_v39  ;;  %3202 = vmatpush.bf16.msrb.mxu1 %v3113_v55  ;;  %v3028_v38 = vadd.f32 %v8672_v62, %v2974_v10  ;;  %v9211_v10 = vld [vmem:[#allocation30_spill] sm:$0xff] }
 0x4e5   :  { %v3029_v22 = vadd.f32 %v8667_v0, %v2975_v59  ;;  %3279 = vmatpush.bf16.msrb.mxu0 %v3116_v37  ;;  %v3076_v39 = vmax.f32 %v3028_v38, 0.0  ;;  %v9212_v38 = vld [vmem:[#allocation32_spill] sm:$0xff] }
 0x4e7   :  { %v3077_v57 = vmax.f32 %v3029_v22, 0.0  ;;  %3203 = vmatpush.bf16.msrb.mxu1 %v8731_v4 }
 0x4e8   :  { %v2923_v48 = vpop.f32.mrf.mxu2 }
 0x4e9   :  { %v2976_v58 = vadd.f32 %v2923_v48, %v8617_v14  ;;  %3280 = vmatpush.bf16.msrb.mxu0 %v3114_v19  ;;  %v8768_v54 = vpack.c.bf16 %v3077_v57, %v3075_v18 }
 0x4ea   :  { %v2857_v52 = vpop.f32.mrf.mxu0 }
 0x4eb   :  { %v3030_v3 = vadd.f32 %v8672_v62, %v2976_v58  ;;  %3204 = vmatpush.bf16.msrb.mxu1 %v8719_v25  ;;  %v2977_v34 = vadd.f32 %v2857_v52, %v8620_v1  ;;  %v5784_v52 = vld [vmem:[#allocation4 + $0x10] sm:$0xf] }
 0x4ed   :  { %v3078_v55 = vmax.f32 %v3030_v3, 0.0  ;;  %3281 = vmatpush.bf16.msrb.mxu0 %v8735_v60  ;;  %v3031_v19 = vadd.f32 %v8667_v0, %v2977_v34  ;;  %v6443_v3 = vld [vmem:[#allocation4 + $0x14] sm:$0xf0] }
 0x4ef   :  { %3205 = vmatpush.bf16.msrb.mxu1 %v8705_v33  ;;  %v8775_v4 = vpack.c.bf16 %v3078_v55, %v3076_v39  ;;  %v3079_v1 = vmax.f32 %v3031_v19, 0.0  ;;  %v5785_v39 = vor.u32 %v6443_v3, %v5784_v52  ;;  %v6445_v19 = vld [vmem:[#allocation4 + $0x24] sm:$0xf0] }
 0x4f0   :  { %v2926_v24 = vpop.f32.mrf.mxu2 }
 0x4f1   :  { %3282 = vmatpush.bf16.msrb.mxu0 %v8723_v6  ;;  %v2978_v25 = vadd.f32 %v2926_v24, %v8625_v56  ;;  %v5778_v24 = vld [vmem:[#allocation4 + $0x8] sm:$0xf0] }
 0x4f2   :  { %v2859_v14 = vpop.f32.mrf.mxu0 }
 0x4f3   :  { %v2979_v9 = vadd.f32 %v2859_v14, %v8628_v36  ;;  %3206 = vmatpush.bf16.msrb.mxu1 %v8691_v11  ;;  %v3032_v6 = vadd.f32 %v8672_v62, %v2978_v25  ;;  %v6442_v25 = vld [vmem:[#allocation4 + $0x14] sm:$0xf] }
 0x4f5   :  { %v3033_v60 = vadd.f32 %v8667_v0, %v2979_v9  ;;  %3283 = vmatpush.bf16.msrb.mxu0 %v8711_v44  ;;  %v3080_v56 = vmax.f32 %v3032_v6, 0.0  ;;  %v6444_v6 = vld [vmem:[#allocation4 + $0x24] sm:$0xf] }
 0x4f7   :  { %v3081_v33 = vmax.f32 %v3033_v60, 0.0  ;;  %3207 = vmatpush.bf16.msrb.mxu1 %v8677_v42  ;;  %v5786_v60 = vld [vmem:[#allocation4 + $0x18] sm:$0xf0] }
 0x4f8   :  { %v2928_v5 = vpop.f32.mrf.mxu2 }
 0x4f9   :  { %v2980_v50 = vadd.f32 %v2928_v5, %v8631_v12  ;;  %3284 = vmatpush.bf16.msrb.mxu0 %v8697_v47  ;;  %v3121_v36 = vpack.c.bf16 %v3081_v33, %v3079_v1  ;;  %v5789_v1 = vor.u32 %v6442_v25, %v5786_v60  ;;  %v5800_v33 = vld [vmem:[#allocation4 + $0x30] sm:$0xf] }
 0x4fa   :  { %v2862_v37 = vpop.f32.mrf.mxu0  ;;  %3208 = vmatmul.bf16.vlgmr.msrb.gmra.mxu1 %v5777_v7 }
 0x4fb   :  { %v3034_v11 = vadd.f32 %v8672_v62, %v2980_v50  ;;  %v2981_v44 = vadd.f32 %v2862_v37, %v8634_v31  ;;  %v5794_v50 = vld [vmem:[#allocation4 + $0x28] sm:$0xf0]  ;;  %v6449_v37 = vld [vmem:[#allocation4 + $0x44] sm:$0xf0] }
 0x4fd   :  { %v3082_v30 = vmax.f32 %v3034_v11, 0.0  ;;  %3285 = vmatpush.bf16.msrb.mxu0 %v8683_v8  ;;  %v3035_v53 = vadd.f32 %v8667_v0, %v2981_v44 }
 0x4ff   :  { %v3122_v43 = vpack.c.bf16 %v3082_v30, %v3080_v56  ;;  %v3083_v40 = vmax.f32 %v3035_v53, 0.0  ;;  %v6446_v56 = vld [vmem:[#allocation4 + $0x34] sm:$0xf]  ;;  %v5802_v30 = vld [vmem:[#allocation4 + $0x38] sm:$0xf0] }
 0x500   :  { %v2931_v45 = vpop.f32.mrf.mxu2  ;;  %3286 = vmatmul.bf16.vlgmr.msrb.gmra.mxu0 %v5777_v7  ;;  %v5805_v44 = vor.u32 %v6446_v56, %v5802_v30  ;;  %v6459_v53 = vld [vmem:[#allocation6 + $0x38] sm:$0xff]  ;;  %v6452_v7 = vld [vmem:[#allocation6] sm:$0xff] }
 0x501   :  { %v2982_v12 = vadd.f32 %v2931_v45, %v8639_v26  ;;  %v6451_v45 = vld [vmem:[#allocation4 + $0x54] sm:$0xf0]  ;;  %3459 = vmatpush.bf16.msra.mxu1 %v6459_v53 }
 0x502   :  { %v2864_v42 = vpop.f32.mrf.mxu0 }
 0x503   :  { %v2983_v35 = vadd.f32 %v2864_v42, %v8642_v41  ;;  %v3036_v29 = vadd.f32 %v8672_v62, %v2982_v12  ;;  %v6448_v12 = vld [vmem:[#allocation4 + $0x44] sm:$0xf] }
 0x505   :  { %v3037_v47 = vadd.f32 %v8667_v0, %v2983_v35  ;;  %v3084_v49 = vmax.f32 %v3036_v29, 0.0  ;;  %v6458_v35 = vld [vmem:[#allocation6 + $0x30] sm:$0xff]  ;;  %v5818_v29 = vld [vmem:[#allocation4 + $0x58] sm:$0xf0] }
 0x506   :  { %3460 = vmatpush.bf16.msra.mxu1 %v6458_v35 }
 0x507   :  { %v3085_v20 = vmax.f32 %v3037_v47, 0.0  ;;  %v5810_v47 = vld [vmem:[#allocation4 + $0x48] sm:$0xf0] }
 0x508   :  { %v2933_v28 = vpop.f32.mrf.mxu2 }
 0x509   :  { %v2984_v8 = vadd.f32 %v2933_v28, %v8645_v15  ;;  %v3123_v16 = vpack.c.bf16 %v3085_v20, %v3083_v40  ;;  %v5813_v40 = vor.u32 %v6448_v12, %v5810_v47  ;;  %v6457_v20 = vld [vmem:[#allocation6 + $0x28] sm:$0xff]  ;;  %v6450_v28 = vld [vmem:[#allocation4 + $0x54] sm:$0xf] }
 0x50a   :  { %v2867_v31 = vpop.f32.mrf.mxu0  ;;  %3213 = vmatmul.bf16.gmra.mxu1 %v5785_v39 }
 0x50b   :  { %v3038_v21 = vadd.f32 %v8672_v62, %v2984_v8  ;;  %v2985_v26 = vadd.f32 %v2867_v31, %v8648_v63  ;;  %3461 = vmatpush.bf16.msra.mxu1 %v6457_v20  ;;  %v5821_v8 = vor.u32 %v6450_v28, %v5818_v29  ;;  %v6455_v31 = vld [vmem:[#allocation6 + $0x18] sm:$0xff] }
 0x50d   :  { %v3086_v41 = vmax.f32 %v3038_v21, 0.0  ;;  %v3039_v23 = vadd.f32 %v8667_v0, %v2985_v26  ;;  %v6454_v21 = vld [vmem:[#allocation6 + $0x10] sm:$0xff] }
 0x50f   :  { %v3124_v61 = vpack.c.bf16 %v3086_v41, %v3084_v49  ;;  %v3087_v59 = vmax.f32 %v3039_v23, 0.0  ;;  %v6460_v49 = vld [vmem:[#allocation6 + $0x40] sm:$0xff] }
 0x510   :  { %v2936_v17 = vpop.f32.mrf.mxu2  ;;  %3291 = vmatmul.bf16.gmra.mxu0 %v5785_v39 }
 0x511   :  { %v2986_v32 = vadd.f32 %v2936_v17, %v9211_v10 }
 0x512   :  { %v2869_v2 = vpop.f32.mrf.mxu0 }
 0x513   :  { %v2987_v15 = vadd.f32 %v2869_v2, %v8656_v46  ;;  %v3040_v57 = vadd.f32 %v8672_v62, %v2986_v32 }
 0x515   :  { %v3041_v13 = vadd.f32 %v8667_v0, %v2987_v15  ;;  %v3088_v55 = vmax.f32 %v3040_v57, 0.0  ;;  %v6440_v0 = vld [vmem:[#allocation4 + $0x4] sm:$0xf] }
 0x516   :  { %v5781_v14 = vor.u32 %v6440_v0, %v5778_v24 }
 0x517   :  { %v3089_v22 = vmax.f32 %v3041_v13, 0.0 }
 0x518   :  { %v2938_v18 = vpop.f32.mrf.mxu2 }
 0x519   :  { %v3125_v48 = vpack.c.bf16 %v3089_v22, %v3087_v59  ;;  %v2988_v58 = vadd.f32 %v2938_v18, %v9212_v38 }
 0x51b   :  { %v3042_v63 = vadd.f32 %v8672_v62, %v2988_v58  ;;  %3243 = vmatpush.bf16.msrb.mxu3 %v3125_v48  ;;  %v5792_v62 = vld [vmem:[#allocation4 + $0x20] sm:$0xf] }
 0x51c   :  { %v5793_v9 = vor.u32 %v6445_v19, %v5792_v62 }
 0x51d   :  { %v3090_v46 = vmax.f32 %v3042_v63, 0.0 }
 0x51e   :  { %3218 = vmatmul.bf16.gmra.mxu1 %v5793_v9 }
 0x51f   :  { %v3126_v34 = vpack.c.bf16 %v3090_v46, %v3088_v55  ;;  %3244 = vmatpush.bf16.msrb.mxu3 %v3123_v16  ;;  %v6456_v16 = vld [vmem:[#allocation6 + $0x20] sm:$0xff] }
 0x520   :  { %3296 = vmatmul.bf16.gmra.mxu0 %v5793_v9  ;;  %3462 = vmatpush.bf16.msra.mxu1 %v6456_v16 }
 0x521   :  { %3321 = vmatpush.bf16.msrb.mxu2 %v3126_v34 }
 0x523   :  { %3245 = vmatpush.bf16.msrb.mxu3 %v3121_v36  ;;  %v5797_v36 = vor.u32 %v6444_v6, %v5794_v50 }
 0x524   :  { %3463 = vmatpush.bf16.msra.mxu1 %v6455_v31 }
 0x525   :  { %3322 = vmatpush.bf16.msrb.mxu2 %v3124_v61 }
 0x527   :  { %3246 = vmatpush.bf16.msrb.mxu3 %v8768_v54  ;;  %v6447_v54 = vld [vmem:[#allocation4 + $0x34] sm:$0xf0] }
 0x528   :  { %v5801_v5 = vor.u32 %v6447_v54, %v5800_v33  ;;  %3464 = vmatpush.bf16.msra.mxu1 %v6454_v21 }
 0x529   :  { %3323 = vmatpush.bf16.msrb.mxu2 %v3122_v43  ;;  %v5816_v43 = vld [vmem:[#allocation4 + $0x50] sm:$0xf] }
 0x52a   :  { %5822 = vmatmul.msk.bf16.vlgmr.msrb.gmra.mxu3 %vm3181_vm3, %v5781_v14  ;;  %v5817_v42 = vor.u32 %v6451_v45, %v5816_v43 }
 0x52b   :  { %3505 = vmatpush.bf16.msra.mxu3 %v6460_v49 }
 0x52c   :  { %3465 = vmatpush.bf16.msra.mxu1 %v6453_v27 }
 0x52d   :  { %3324 = vmatpush.bf16.msrb.mxu2 %v8775_v4  ;;  %v5808_v4 = vld [vmem:[#allocation4 + $0x40] sm:$0xf] }
 0x52e   :  { %3223 = vmatmul.bf16.gmra.mxu1 %v5801_v5  ;;  %v5809_v11 = vor.u32 %v6449_v37, %v5808_v4 }
 0x530   :  { %5828 = vmatmul.msk.bf16.vlgmr.msrb.gmra.mxu2 %vm3181_vm3, %v5781_v14  ;;  %3301 = vmatmul.bf16.gmra.mxu0 %v5801_v5 }
 0x531   :  { %3466 = vmatpush.bf16.msra.mxu1 %v6452_v7 }
 0x53a   :  { %5823 = vmatmul.msk.bf16.gmra.mxu3 %vm3181_vm3, %v5789_v1 }
 0x53e   :  { %3228 = vmatmul.bf16.gmra.mxu1 %v5809_v11 }
 0x540   :  { %5829 = vmatmul.msk.bf16.gmra.mxu2 %vm3181_vm3, %v5789_v1  ;;  %3306 = vmatmul.bf16.gmra.mxu0 %v5809_v11 }
 0x54a   :  { %5824 = vmatmul.msk.bf16.gmra.mxu3 %vm3181_vm3, %v5797_v36 }
 0x54e   :  { %3233 = vmatmul.bf16.gmra.mxu1 %v5817_v42 }
 0x550   :  { %5830 = vmatmul.msk.bf16.gmra.mxu2 %vm3181_vm3, %v5797_v36  ;;  %3311 = vmatmul.bf16.gmra.mxu0 %v5817_v42 }
 0x55a   :  { %5825 = vmatmul.msk.bf16.gmra.mxu3 %vm3181_vm3, %v5805_v44 }
 0x560   :  { %5831 = vmatmul.msk.bf16.gmra.mxu2 %vm3181_vm3, %v5805_v44 }
 0x56a   :  { %5826 = vmatmul.msk.bf16.gmra.mxu3 %vm3181_vm3, %v5813_v40 }
 0x570   :  { %5832 = vmatmul.msk.bf16.gmra.mxu2 %vm3181_vm3, %v5813_v40 }
 0x577   :  { %v3209_v51 = vpop.f32.mrf.mxu1 }
 0x57a   :  { %5827 = vmatmul.msk.bf16.gmra.mxu3 %vm3181_vm3, %v5821_v8 }
 0x57d   :  { %v3287_v41 = vpop.f32.mrf.mxu0 }
 0x57f   :  { %v3211_v26 = vpop.f32.mrf.mxu1 }
 0x580   :  { %5833 = vmatmul.msk.bf16.gmra.mxu2 %vm3181_vm3, %v5821_v8 }
 0x585   :  { %v3289_v61 = vpop.f32.mrf.mxu0 }
 0x587   :  { %v3214_v17 = vpop.f32.mrf.mxu1 }
 0x58d   :  { %v3292_v23 = vpop.f32.mrf.mxu0 }
 0x58f   :  { %v3216_v10 = vpop.f32.mrf.mxu1 }
 0x595   :  { %v3294_v57 = vpop.f32.mrf.mxu0 }
 0x59b   :  { %v3219_v63 = vpop.f32.mrf.mxu1 }
 0x59d   :  { %v3297_v46 = vpop.f32.mrf.mxu0 }
 0x5a3   :  { %v3221_v0 = vpop.f32.mrf.mxu1 }
 0x5a5   :  { %v3299_v60 = vpop.f32.mrf.mxu0 }
 0x5ab   :  { %v3224_v1 = vpop.f32.mrf.mxu1 }
 0x5ad   :  { %v3248_v2 = vpop.f32.mrf.mxu3  ;;  %v3302_v36 = vpop.f32.mrf.mxu0 }
 0x5ae   :  { %v3249_v32 = vadd.f32 %v3248_v2, %v3209_v51 }
 0x5b3   :  { %v3326_v15 = vpop.f32.mrf.mxu2  ;;  %v3226_v37 = vpop.f32.mrf.mxu1 }
 0x5b4   :  { %v3327_v48 = vadd.f32 %v3326_v15, %v3287_v41 }
 0x5b5   :  { %v3250_v13 = vpop.f32.mrf.mxu3  ;;  %v3304_v45 = vpop.f32.mrf.mxu0 }
 0x5b6   :  { %v3251_v59 = vadd.f32 %v3250_v13, %v3211_v26 }
 0x5b8   :  { %v3374_v22 = vpack.c.bf16 %v3251_v59, %v3249_v32 }
 0x5ba   :  { %3467 = vmatmul.bf16.vlgmr.msra.gmra.mxu1 %v3374_v22 }
 0x5bb   :  { %v3328_v18 = vpop.f32.mrf.mxu2  ;;  %v3229_v35 = vpop.f32.mrf.mxu1 }
 0x5bc   :  { %v3329_v38 = vadd.f32 %v3328_v18, %v3289_v61 }
 0x5bd   :  { %v3253_v58 = vpop.f32.mrf.mxu3  ;;  %v3307_v29 = vpop.f32.mrf.mxu0 }
 0x5be   :  { %v3375_v52 = vpack.c.bf16 %v3329_v38, %v3327_v48  ;;  %v3254_v39 = vadd.f32 %v3253_v58, %v3214_v17 }
 0x5c0   :  { %5870 = vmatmul.msk.bf16.vlgmr.msra.gmra.mxu3 %vm3440_vm4, %v3375_v52 }
 0x5c3   :  { %v3331_v3 = vpop.f32.mrf.mxu2  ;;  %v3231_v31 = vpop.f32.mrf.mxu1 }
 0x5c4   :  { %v3332_v62 = vadd.f32 %v3331_v3, %v3292_v23 }
 0x5c5   :  { %v3255_v55 = vpop.f32.mrf.mxu3  ;;  %v3309_v49 = vpop.f32.mrf.mxu0 }
 0x5c6   :  { %v3256_v34 = vadd.f32 %v3255_v55, %v3216_v10 }
 0x5c8   :  { %v3376_v24 = vpack.c.bf16 %v3256_v34, %v3254_v39 }
 0x5ca   :  { %3472 = vmatmul.bf16.gmra.mxu1 %v3376_v24 }
 0x5cb   :  { %v3333_v14 = vpop.f32.mrf.mxu2  ;;  %v3234_v26 = vpop.f32.mrf.mxu1 }
 0x5cc   :  { %v3334_v19 = vadd.f32 %v3333_v14, %v3294_v57 }
 0x5cd   :  { %v3258_v9 = vpop.f32.mrf.mxu3  ;;  %v3312_v10 = vpop.f32.mrf.mxu0 }
 0x5ce   :  { %v3377_v25 = vpack.c.bf16 %v3334_v19, %v3332_v62  ;;  %v3259_v54 = vadd.f32 %v3258_v9, %v3219_v63 }
 0x5d0   :  { %5871 = vmatmul.msk.bf16.gmra.mxu3 %vm3440_vm4, %v3377_v25 }
 0x5d3   :  { %v3336_v33 = vpop.f32.mrf.mxu2  ;;  %v3236_v13 = vpop.f32.mrf.mxu1 }
 0x5d4   :  { %v3337_v11 = vadd.f32 %v3336_v33, %v3297_v46 }
 0x5d5   :  { %v3260_v5 = vpop.f32.mrf.mxu3  ;;  %v3314_v48 = vpop.f32.mrf.mxu0 }
 0x5d6   :  { %v3261_v6 = vadd.f32 %v3260_v5, %v3221_v0 }
 0x5d8   :  { %v3378_v50 = vpack.c.bf16 %v3261_v6, %v3259_v54 }
 0x5da   :  { %3477 = vmatmul.bf16.gmra.mxu1 %v3378_v50 }
 0x5db   :  { %v3338_v4 = vpop.f32.mrf.mxu2 }
 0x5dc   :  { %v3339_v56 = vadd.f32 %v3338_v4, %v3299_v60 }
 0x5dd   :  { %v3263_v30 = vpop.f32.mrf.mxu3 }
 0x5de   :  { %v3379_v44 = vpack.c.bf16 %v3339_v56, %v3337_v11  ;;  %v3264_v42 = vadd.f32 %v3263_v30, %v3224_v1 }
 0x5e0   :  { %5872 = vmatmul.msk.bf16.gmra.mxu3 %vm3440_vm4, %v3379_v44 }
 0x5e3   :  { %v3341_v43 = vpop.f32.mrf.mxu2 }
 0x5e4   :  { %v3342_v20 = vadd.f32 %v3341_v43, %v3302_v36 }
 0x5e5   :  { %v3265_v53 = vpop.f32.mrf.mxu3 }
 0x5e6   :  { %v3266_v12 = vadd.f32 %v3265_v53, %v3226_v37 }
 0x5e8   :  { %v3380_v47 = vpack.c.bf16 %v3266_v12, %v3264_v42 }
 0x5ea   :  { %3482 = vmatmul.bf16.gmra.mxu1 %v3380_v47 }
 0x5eb   :  { %v3343_v40 = vpop.f32.mrf.mxu2 }
 0x5ec   :  { %v3344_v28 = vadd.f32 %v3343_v40, %v3304_v45 }
 0x5ed   :  { %v3268_v8 = vpop.f32.mrf.mxu3 }
 0x5ee   :  { %v3381_v16 = vpack.c.bf16 %v3344_v28, %v3342_v20  ;;  %v3269_v27 = vadd.f32 %v3268_v8, %v3229_v35  ;;  %v5924_v8 = vld [vmem:[%s9111_s7 + $0x44] sm:$0xf] }
 0x5f0   :  { %5873 = vmatmul.msk.bf16.gmra.mxu3 %vm3440_vm4, %v3381_v16 }
 0x5f3   :  { %v3346_v21 = vpop.f32.mrf.mxu2 }
 0x5f4   :  { %v3347_v17 = vadd.f32 %v3346_v21, %v3307_v29  ;;  %v3726_v21 = vunpack.c.l.b16 %v5924_v8 }
 0x5f5   :  { %v3270_v51 = vpop.f32.mrf.mxu3 }
 0x5f6   :  { %v3271_v7 = vadd.f32 %v3270_v51, %v3231_v31 }
 0x5f8   :  { %v3382_v41 = vpack.c.bf16 %v3271_v7, %v3269_v27  ;;  %v3731_v7 = vpack.c.b16 %v3726_v21, %v3726_v21 }
 0x5fa   :  { %3487 = vmatmul.bf16.gmra.mxu1 %v3382_v41  ;;  %v3751_v41 = vsel %vm3749_vm5, %v3731_v7, 0 }
 0x5fb   :  { %v3348_v61 = vpop.f32.mrf.mxu2 }
 0x5fc   :  { %v3349_v2 = vadd.f32 %v3348_v61, %v3309_v49  ;;  %v6461_v61 = vld [vmem:[#allocation7] sm:$0xff] }
 0x5fd   :  { %v3273_v23 = vpop.f32.mrf.mxu3 }
 0x5fe   :  { %v3383_v15 = vpack.c.bf16 %v3349_v2, %v3347_v17  ;;  %v3274_v59 = vadd.f32 %v3273_v23, %v3234_v26  ;;  %v6469_v26 = vld [vmem:[#allocation7 + $0x20] sm:$0xff]  ;;  %v6476_v2 = vld [vmem:[%s9111_s7 + $0x3c] sm:$0xff]  ;;  %v6475_v23 = vld [vmem:[%s9111_s7 + $0x34] sm:$0xff] }
 0x5ff   :  { %v6477_v17 = vld [vmem:[#allocation7 + $0x40] sm:$0xff] }
 0x600   :  { %5874 = vmatmul.msk.bf16.gmra.mxu3 %vm3440_vm4, %v3383_v15  ;;  %v6474_v15 = vld [vmem:[%s9111_s7 + $0x2c] sm:$0xff] }
 0x603   :  { %v3351_v32 = vpop.f32.mrf.mxu2 }
 0x604   :  { %v3352_v58 = vadd.f32 %v3351_v32, %v3312_v10  ;;  %v6473_v10 = vld [vmem:[%s9111_s7 + $0x24] sm:$0xff]  ;;  %v6470_v32 = vld [vmem:[#allocation7 + $0x28] sm:$0xff] }
 0x605   :  { %v3275_v22 = vpop.f32.mrf.mxu3 }
 0x606   :  { %v3276_v18 = vadd.f32 %v3275_v22, %v3236_v13  ;;  %v6462_v13 = vld [vmem:[#allocation7 + $0x8] sm:$0xff]  ;;  %v6471_v22 = vld [vmem:[#allocation7 + $0x30] sm:$0xff] }
 0x608   :  { %v3384_v57 = vpack.c.bf16 %v3276_v18, %v3274_v59  ;;  %v6478_v59 = vld [vmem:[#allocation7 + $0x48] sm:$0xff]  ;;  %v6463_v18 = vld [vmem:[#allocation7 + $0x10] sm:$0xff] }
 0x60a   :  { %3492 = vmatmul.bf16.gmra.mxu1 %v3384_v57  ;;  %v6479_v57 = vld [vmem:[#allocation7 + $0x50] sm:$0xff] }
 0x60b   :  { %v3353_v38 = vpop.f32.mrf.mxu2 }
 0x60c   :  { %v3354_v63 = vadd.f32 %v3353_v38, %v3314_v48  ;;  %v6472_v48 = vld [vmem:[#allocation7 + $0x38] sm:$0xff] }
 0x60d   :  { %v6464_v38 = vld [vmem:[#allocation7 + $0x18] sm:$0xff] }
 0x60e   :  { %v3385_v52 = vpack.c.bf16 %v3354_v63, %v3352_v58  ;;  %v6480_v58 = vld [vmem:[#allocation7 + $0x58] sm:$0xff] }
 0x60f   :  { %v3620_v63 = vld [vmem:[%s9111_s7 + $0x20] sm:$0xf] }
 0x610   :  { %5875 = vmatmul.msk.bf16.gmra.mxu3 %vm3440_vm4, %v3385_v52  ;;  %v3799_v52 = vunpack.c.l.b16 %v3620_v63 }
 0x637   :  { %v3468_v3 = vpop.f32.mrf.mxu1 }
 0x63f   :  { %v3470_v39 = vpop.f32.mrf.mxu1 }
 0x643   :  { %v3507_v55 = vpop.f32.mrf.mxu3 }
 0x644   :  { %v3508_v46 = vadd.f32 %v3507_v55, %v3468_v3  ;;  %v5993_v3 = vld [vmem:[%s9111_s7 + $0x68] sm:$0xf] }
 0x645   :  { %v3954_v55 = vunpack.c.l.b16 %v5993_v3 }
 0x647   :  { %v3473_v34 = vpop.f32.mrf.mxu1 }
 0x64b   :  { %v3509_v0 = vpop.f32.mrf.mxu3 }
 0x64c   :  { %v3510_v27 = vadd.f32 %v3509_v0, %v3470_v39  ;;  %v3804_v39 = vpack.c.b16 %v3799_v52, %v3799_v52  ;;  %v6091_v52 = vld [vmem:[%s9111_s7 + $0xb0] sm:$0xf] }
 0x64d   :  { %v4280_v3 = vunpack.c.l.b16 %v6091_v52 }
 0x64e   :  { %v3545_v49 = vpack.c.bf16 %v3510_v27, %v3508_v46  ;;  %v3822_v46 = vsel %vm3749_vm5, %v3804_v39, 0 }
 0x64f   :  { %v3475_v24 = vpop.f32.mrf.mxu1 }
 0x653   :  { %v3512_v14 = vpop.f32.mrf.mxu3 }
 0x654   :  { %v3513_v62 = vadd.f32 %v3512_v14, %v3473_v34  ;;  %v3959_v34 = vpack.c.b16 %v3954_v55, %v3954_v55  ;;  %v6484_v14 = vld [vmem:[%s9111_s7 + $0x60] sm:$0xff]  ;;  %v4285_v55 = vpack.c.b16 %v4280_v3, %v4280_v3 }
 0x656   :  { %v3977_v0 = vsel %vm3749_vm5, %v3959_v34, 0 }
 0x657   :  { %v3478_v19 = vpop.f32.mrf.mxu1  ;;  %3982 = vmatpush.bf16.msrb.mxu3 %v3977_v0 }
 0x65b   :  { %v3514_v9 = vpop.f32.mrf.mxu3  ;;  %3983 = vmatpush.bf16.msrb.mxu3 %v6484_v14 }
 0x65c   :  { %v3515_v16 = vadd.f32 %v3514_v9, %v3475_v24  ;;  %v6468_v24 = vld [vmem:[%s9111_s7 + $0x18] sm:$0xff]  ;;  %v6466_v9 = vld [vmem:[%s9111_s7 + $0x8] sm:$0xff] }
 0x65e   :  { %v3546_v51 = vpack.c.bf16 %v3515_v16, %v3513_v62  ;;  %v6467_v62 = vld [vmem:[%s9111_s7 + $0x10] sm:$0xff] }
 0x65f   :  { %v3480_v25 = vpop.f32.mrf.mxu1 }
 0x663   :  { %v3517_v60 = vpop.f32.mrf.mxu3 }
 0x664   :  { %v3518_v1 = vadd.f32 %v3517_v60, %v3478_v19  ;;  %v6483_v19 = vld [vmem:[%s9111_s7 + $0x58] sm:$0xff]  ;;  %v6465_v60 = vld [vmem:[%s9111_s7] sm:$0xff] }
 0x665   :  { %3984 = vmatpush.bf16.msrb.mxu3 %v6483_v19 }
 0x667   :  { %v3483_v33 = vpop.f32.mrf.mxu1 }
 0x66b   :  { %v3519_v54 = vpop.f32.mrf.mxu3 }
 0x66c   :  { %v3520_v28 = vadd.f32 %v3519_v54, %v3480_v25  ;;  %v6482_v25 = vld [vmem:[%s9111_s7 + $0x50] sm:$0xff] }
 0x66d   :  { %3985 = vmatpush.bf16.msrb.mxu3 %v6482_v25  ;;  %v6499_v25 = vld [vmem:[%s9111_s7 + $0xa0] sm:$0xff] }
 0x66e   :  { %v3547_v31 = vpack.c.bf16 %v3520_v28, %v3518_v1  ;;  %v6481_v1 = vld [vmem:[%s9111_s7 + $0x48] sm:$0xff] }
 0x66f   :  { %v3485_v6 = vpop.f32.mrf.mxu1 }
 0x671   :  { %3986 = vmatpush.bf16.msrb.mxu3 %v6481_v1 }
 0x673   :  { %v3522_v5 = vpop.f32.mrf.mxu3 }
 0x674   :  { %v3523_v20 = vadd.f32 %v3522_v5, %v3483_v33 }
 0x677   :  { %v3488_v36 = vpop.f32.mrf.mxu1 }
 0x67b   :  { %v3524_v50 = vpop.f32.mrf.mxu3 }
 0x67c   :  { %v3525_v47 = vadd.f32 %v3524_v50, %v3485_v6 }
 0x67e   :  { %v3548_v29 = vpack.c.bf16 %v3525_v47, %v3523_v20  ;;  %v6493_v20 = vld [vmem:[#allocation7 + $0x80] sm:$0xff] }
 0x67f   :  { %v3490_v37 = vpop.f32.mrf.mxu1 }
 0x683   :  { %v3527_v4 = vpop.f32.mrf.mxu3 }
 0x684   :  { %v3528_v12 = vadd.f32 %v3527_v4, %v3488_v36 }
 0x687   :  { %v3493_v56 = vpop.f32.mrf.mxu1 }
 0x68b   :  { %v3529_v11 = vpop.f32.mrf.mxu3 }
 0x68c   :  { %v3530_v53 = vadd.f32 %v3529_v11, %v3490_v37 }
 0x68e   :  { %v3549_v40 = vpack.c.bf16 %v3530_v53, %v3528_v12 }
 0x68f   :  { %v3495_v44 = vpop.f32.mrf.mxu1 }
 0x693   :  { %v3532_v30 = vpop.f32.mrf.mxu3 }
 0x694   :  { %v3533_v45 = vadd.f32 %v3532_v30, %v3493_v56 }
 0x69b   :  { %v3534_v43 = vpop.f32.mrf.mxu3 }
 0x69c   :  { %v3535_v42 = vadd.f32 %v3534_v43, %v3495_v44 }
 0x69e   :  { %v3550_v35 = vpack.c.bf16 %v3535_v42, %v3533_v45 }
 0x6a0   :  { %3585 = vmatpush.bf16.msra.mxu0 %v3550_v35  ;;  %3668 = vmatpush.bf16.msra.mxu2 %v3550_v35 }
 0x6a1   :  { %3896 = vmatpush.bf16.msrb.mxu1 %v3550_v35 }
 0x6a4   :  { %3586 = vmatpush.bf16.msra.mxu0 %v3549_v40  ;;  %3669 = vmatpush.bf16.msra.mxu2 %v3549_v40 }
 0x6a5   :  { %3897 = vmatpush.bf16.msrb.mxu1 %v3549_v40 }
 0x6a8   :  { %3587 = vmatpush.bf16.msra.mxu0 %v3548_v29  ;;  %3670 = vmatpush.bf16.msra.mxu2 %v3548_v29 }
 0x6a9   :  { %3898 = vmatpush.bf16.msrb.mxu1 %v3548_v29 }
 0x6ac   :  { %3588 = vmatpush.bf16.msra.mxu0 %v3547_v31  ;;  %3671 = vmatpush.bf16.msra.mxu2 %v3547_v31 }
 0x6ad   :  { %3899 = vmatpush.bf16.msrb.mxu1 %v3547_v31 }
 0x6b0   :  { %3589 = vmatpush.bf16.msra.mxu0 %v3546_v51  ;;  %3672 = vmatpush.bf16.msra.mxu2 %v3546_v51 }
 0x6b1   :  { %3900 = vmatpush.bf16.msrb.mxu1 %v3546_v51 }
 0x6b4   :  { %3590 = vmatpush.bf16.msra.mxu0 %v3545_v49  ;;  %3673 = vmatpush.bf16.msra.mxu2 %v3545_v49 }
 0x6b5   :  { %3901 = vmatpush.bf16.msrb.mxu1 %v3545_v49 }
 0x6b7   :  { %5912 = vmatmul.msk.bf16.vlgmr.msra.gmra.mxu2 %vm366_vm0, %v6469_v26  ;;  %5892 = vmatmul.msk.bf16.vlgmr.msra.gmra.mxu0 %vm366_vm0, %v6461_v61 }
 0x6b8   :  { %3756 = vmatpush.bf16.msrb.mxu0 %v3751_v41  ;;  %5981 = vmatmul.msk.bf16.vlgmr.msrb.gmra.mxu1 %vm366_vm0, %v6477_v17 }
 0x6b9   :  { %4222 = vmatpush.bf16.msra.mxu1 %v3550_v35  ;;  %3827 = vmatpush.bf16.msrb.mxu2 %v3822_v46 }
 0x6bc   :  { %3757 = vmatpush.bf16.msrb.mxu0 %v6476_v2 }
 0x6bd   :  { %4223 = vmatpush.bf16.msra.mxu1 %v3549_v40  ;;  %3828 = vmatpush.bf16.msrb.mxu2 %v6468_v24  ;;  %v4303_v24 = vsel %vm3749_vm5, %v4285_v55, 0 }
 0x6be   :  { %4308 = vmatpush.bf16.msra.mxu3 %v4303_v24 }
 0x6c0   :  { %3758 = vmatpush.bf16.msrb.mxu0 %v6475_v23 }
 0x6c1   :  { %4224 = vmatpush.bf16.msra.mxu1 %v3548_v29  ;;  %3829 = vmatpush.bf16.msrb.mxu2 %v6467_v62  ;;  %v6500_v62 = vld [vmem:[%s9111_s7 + $0xa8] sm:$0xff] }
 0x6c2   :  { %4309 = vmatpush.bf16.msra.mxu3 %v6500_v62 }
 0x6c4   :  { %3759 = vmatpush.bf16.msrb.mxu0 %v6474_v15 }
 0x6c5   :  { %4225 = vmatpush.bf16.msra.mxu1 %v3547_v31  ;;  %3830 = vmatpush.bf16.msrb.mxu2 %v6466_v9 }
 0x6c6   :  { %4310 = vmatpush.bf16.msra.mxu3 %v6499_v25 }
 0x6c7   :  { %5913 = vmatmul.msk.bf16.gmra.mxu2 %vm366_vm0, %v6470_v32  ;;  %5893 = vmatmul.msk.bf16.gmra.mxu0 %vm366_vm0, %v6462_v13  ;;  %v6485_v32 = vld [vmem:[#allocation7 + $0x60] sm:$0xff]  ;;  %v6496_v13 = vld [vmem:[#allocation7 + $0x98] sm:$0xff] }
 0x6c8   :  { %3760 = vmatpush.bf16.msrb.mxu0 %v6473_v10  ;;  %5982 = vmatmul.msk.bf16.gmra.mxu1 %vm366_vm0, %v6478_v59  ;;  %v6495_v10 = vld [vmem:[#allocation7 + $0x90] sm:$0xff]  ;;  %v6486_v59 = vld [vmem:[#allocation7 + $0x68] sm:$0xff] }
 0x6c9   :  { %4226 = vmatpush.bf16.msra.mxu1 %v3546_v51  ;;  %3831 = vmatpush.bf16.msrb.mxu2 %v6465_v60 }
 0x6cc   :  { %4059 = vmatpush.bf16.msra.mxu0 %v3550_v35 }
 0x6cd   :  { %4227 = vmatpush.bf16.msra.mxu1 %v3545_v49 }
 0x6d0   :  { %4060 = vmatpush.bf16.msra.mxu0 %v3549_v40 }
 0x6d4   :  { %4061 = vmatpush.bf16.msra.mxu0 %v3548_v29 }
 0x6d7   :  { %5914 = vmatmul.msk.bf16.gmra.mxu2 %vm366_vm0, %v6471_v22  ;;  %5894 = vmatmul.msk.bf16.gmra.mxu0 %vm366_vm0, %v6463_v18  ;;  %v6487_v22 = vld [vmem:[#allocation7 + $0x70] sm:$0xff]  ;;  %v6488_v18 = vld [vmem:[#allocation7 + $0x78] sm:$0xff] }
 0x6d8   :  { %4062 = vmatpush.bf16.msra.mxu0 %v3547_v31  ;;  %5983 = vmatmul.msk.bf16.gmra.mxu1 %vm366_vm0, %v6479_v57 }
 0x6dc   :  { %4063 = vmatpush.bf16.msra.mxu0 %v3546_v51 }
 0x6e0   :  { %4064 = vmatpush.bf16.msra.mxu0 %v3545_v49  ;;  %v6494_v49 = vld [vmem:[#allocation7 + $0x88] sm:$0xff] }
 0x6e7   :  { %5915 = vmatmul.msk.bf16.gmra.mxu2 %vm366_vm0, %v6472_v48  ;;  %5895 = vmatmul.msk.bf16.gmra.mxu0 %vm366_vm0, %v6464_v38 }
 0x6e8   :  { %5984 = vmatmul.msk.bf16.gmra.mxu1 %vm366_vm0, %v6480_v58 }
 0x6f8   :  { %6079 = vmatmul.msk.bf16.vlgmr.msra.gmra.mxu1 %vm366_vm0, %v6493_v20 }
 0x708   :  { %6080 = vmatmul.msk.bf16.gmra.mxu1 %vm366_vm0, %v6494_v49 }
 0x718   :  { %6081 = vmatmul.msk.bf16.gmra.mxu1 %vm366_vm0, %v6495_v10 }
 0x728   :  { %6082 = vmatmul.msk.bf16.gmra.mxu1 %vm366_vm0, %v6496_v13 }
 0x734   :  { %v3592_v33 = vpop.f32.mrf.mxu0 }
 0x735   :  { %v3903_v54 = vpop.f32.mrf.mxu1 }
 0x73a   :  { %v3675_v5 = vpop.f32.mrf.mxu2 }
 0x73c   :  { %v3594_v6 = vpop.f32.mrf.mxu0 }
 0x73d   :  { %v3621_v50 = vpack.c.bf16 %v3594_v6, %v3592_v33  ;;  %v3905_v36 = vpop.f32.mrf.mxu1  ;;  %v6042_v33 = vld [vmem:[%s9111_s7 + $0x8c] sm:$0xf] }
 0x73e   :  { %v3933_v4 = vpack.c.bf16 %v3905_v36, %v3903_v54  ;;  %v4117_v6 = vunpack.c.l.b16 %v6042_v33 }
 0x73f   :  { %5961 = vmatmul.msk.bf16.vlgmr.msrb.gmra.mxu2 %vm3736_vm6, %v3621_v50  ;;  %v6498_v50 = vld [vmem:[%s9111_s7 + $0x98] sm:$0xff] }
 0x740   :  { %6010 = vmatmul.msk.bf16.vlgmr.msrb.gmra.mxu3 %vm3736_vm6, %v3933_v4  ;;  %v4122_v36 = vpack.c.b16 %v4117_v6, %v4117_v6 }
 0x741   :  { %4311 = vmatpush.bf16.msra.mxu3 %v6498_v50 }
 0x742   :  { %v3677_v37 = vpop.f32.mrf.mxu2 }
 0x743   :  { %v3705_v11 = vpack.c.bf16 %v3677_v37, %v3675_v5  ;;  %v4140_v37 = vsel %vm3749_vm5, %v4122_v36, 0 }
 0x744   :  { %v3597_v56 = vpop.f32.mrf.mxu0  ;;  %4145 = vmatpush.bf16.msra.mxu2 %v4140_v37 }
 0x745   :  { %5941 = vmatmul.msk.bf16.vlgmr.msrb.gmra.mxu0 %vm3736_vm6, %v3705_v11  ;;  %v3908_v30 = vpop.f32.mrf.mxu1 }
 0x74a   :  { %v3680_v44 = vpop.f32.mrf.mxu2 }
 0x74c   :  { %v3599_v43 = vpop.f32.mrf.mxu0 }
 0x74d   :  { %v3622_v45 = vpack.c.bf16 %v3599_v43, %v3597_v56  ;;  %v3910_v42 = vpop.f32.mrf.mxu1  ;;  %v6492_v56 = vld [vmem:[%s9111_s7 + $0x84] sm:$0xff] }
 0x74e   :  { %v3934_v53 = vpack.c.bf16 %v3910_v42, %v3908_v30  ;;  %v6497_v30 = vld [vmem:[%s9111_s7 + $0x90] sm:$0xff]  ;;  %4146 = vmatpush.bf16.msra.mxu2 %v6492_v56 }
 0x74f   :  { %5962 = vmatmul.msk.bf16.gmra.mxu2 %vm3736_vm6, %v3622_v45  ;;  %4312 = vmatpush.bf16.msra.mxu3 %v6497_v30 }
 0x750   :  { %6011 = vmatmul.msk.bf16.gmra.mxu3 %vm3736_vm6, %v3934_v53 }
 0x752   :  { %v3682_v35 = vpop.f32.mrf.mxu2 }
 0x753   :  { %v3706_v12 = vpack.c.bf16 %v3682_v35, %v3680_v44  ;;  %v6491_v35 = vld [vmem:[%s9111_s7 + $0x7c] sm:$0xff] }
 0x754   :  { %v3602_v47 = vpop.f32.mrf.mxu0  ;;  %4147 = vmatpush.bf16.msra.mxu2 %v6491_v35 }
 0x755   :  { %5942 = vmatmul.msk.bf16.gmra.mxu0 %vm3736_vm6, %v3706_v12  ;;  %v3913_v40 = vpop.f32.mrf.mxu1 }
 0x75a   :  { %v3685_v28 = vpop.f32.mrf.mxu2 }
 0x75c   :  { %v3604_v29 = vpop.f32.mrf.mxu0 }
 0x75d   :  { %v3623_v8 = vpack.c.bf16 %v3604_v29, %v3602_v47  ;;  %v3915_v16 = vpop.f32.mrf.mxu1 }
 0x75e   :  { %v3935_v31 = vpack.c.bf16 %v3915_v16, %v3913_v40  ;;  %v6490_v40 = vld [vmem:[%s9111_s7 + $0x74] sm:$0xff]  ;;  %v6489_v16 = vld [vmem:[%s9111_s7 + $0x6c] sm:$0xff] }
 0x75f   :  { %5963 = vmatmul.msk.bf16.gmra.mxu2 %vm3736_vm6, %v3623_v8 }
 0x760   :  { %6012 = vmatmul.msk.bf16.gmra.mxu3 %vm3736_vm6, %v3935_v31  ;;  %4148 = vmatpush.bf16.msra.mxu2 %v6490_v40 }
 0x762   :  { %v3687_v21 = vpop.f32.mrf.mxu2 }
 0x763   :  { %v3707_v27 = vpack.c.bf16 %v3687_v21, %v3685_v28 }
 0x764   :  { %v3607_v51 = vpop.f32.mrf.mxu0  ;;  %4149 = vmatpush.bf16.msra.mxu2 %v6489_v16 }
 0x765   :  { %5943 = vmatmul.msk.bf16.gmra.mxu0 %vm3736_vm6, %v3707_v27  ;;  %v3918_v7 = vpop.f32.mrf.mxu1 }
 0x76a   :  { %v3690_v41 = vpop.f32.mrf.mxu2 }
 0x76c   :  { %v3609_v26 = vpop.f32.mrf.mxu0 }
 0x76d   :  { %v3624_v61 = vpack.c.bf16 %v3609_v26, %v3607_v51  ;;  %v3920_v17 = vpop.f32.mrf.mxu1 }
 0x76e   :  { %v3936_v2 = vpack.c.bf16 %v3920_v17, %v3918_v7 }
 0x76f   :  { %5964 = vmatmul.msk.bf16.gmra.mxu2 %vm3736_vm6, %v3624_v61 }
 0x770   :  { %6013 = vmatmul.msk.bf16.gmra.mxu3 %vm3736_vm6, %v3936_v2 }
 0x772   :  { %v3692_v23 = vpop.f32.mrf.mxu2 }
 0x773   :  { %v3708_v15 = vpack.c.bf16 %v3692_v23, %v3690_v41 }
 0x775   :  { %5944 = vmatmul.msk.bf16.gmra.mxu0 %vm3736_vm6, %v3708_v15  ;;  %v4229_v54 = vpop.f32.mrf.mxu1 }
 0x77d   :  { %v4231_v45 = vpop.f32.mrf.mxu1 }
 0x77e   :  { %v4259_v53 = vpack.c.bf16 %v4231_v45, %v4229_v54  ;;  %v6552_v54 = vld [vmem:[#allocation9] ss:$0 sm:$0xff] }
 0x780   :  { %6108 = vmatmul.msk.bf16.vlgmr.msra.gmra.mxu3 %vm3736_vm6, %v4259_v53 }
 0x785   :  { %6030 = vmatmul.msk.bf16.vlgmr.msra.gmra.mxu0 %vm366_vm0, %v6485_v32  ;;  %v4234_v29 = vpop.f32.mrf.mxu1 }
 0x78d   :  { %v4236_v7 = vpop.f32.mrf.mxu1 }
 0x78e   :  { %v4260_v41 = vpack.c.bf16 %v4236_v7, %v4234_v29 }
 0x790   :  { %6109 = vmatmul.msk.bf16.gmra.mxu3 %vm3736_vm6, %v4260_v41 }
 0x795   :  { %6031 = vmatmul.msk.bf16.gmra.mxu0 %vm366_vm0, %v6486_v59  ;;  %v4239_v23 = vpop.f32.mrf.mxu1 }
 0x79d   :  { %v4241_v32 = vpop.f32.mrf.mxu1 }
 0x79e   :  { %v4261_v13 = vpack.c.bf16 %v4241_v32, %v4239_v23 }
 0x7a0   :  { %6110 = vmatmul.msk.bf16.gmra.mxu3 %vm3736_vm6, %v4261_v13 }
 0x7a5   :  { %6032 = vmatmul.msk.bf16.gmra.mxu0 %vm366_vm0, %v6487_v22  ;;  %v4244_v22 = vpop.f32.mrf.mxu1 }
 0x7b5   :  { %6033 = vmatmul.msk.bf16.gmra.mxu0 %vm366_vm0, %v6488_v18 }
 0x7c2   :  { %v3762_v57 = vpop.f32.mrf.mxu0  ;;  %v3833_v48 = vpop.f32.mrf.mxu2 }
 0x7c3   :  { %v3834_v38 = vadd.f32 %v3833_v48, %v3762_v57  ;;  %v3988_v58 = vpop.f32.mrf.mxu3  ;;  %v4246_v48 = vpop.f32.mrf.mxu1 }
 0x7c5   :  { %v8906_v63 = vadd.f32 %v3988_v58, %v3834_v38  ;;  %v4262_v38 = vpack.c.bf16 %v4246_v48, %v4244_v22 }
 0x7c7   :  { %6111 = vmatmul.msk.bf16.gmra.mxu3 %vm3736_vm6, %v4262_v38 }
 0x7ca   :  { %v3764_v39 = vpop.f32.mrf.mxu0  ;;  %v3835_v46 = vpop.f32.mrf.mxu2 }
 0x7cb   :  { %v3836_v34 = vadd.f32 %v3835_v46, %v3764_v39  ;;  %v3990_v0 = vpop.f32.mrf.mxu3 }
 0x7cd   :  { %v8912_v14 = vadd.f32 %v3990_v0, %v3836_v34 }
 0x7d2   :  { %v3767_v19 = vpop.f32.mrf.mxu0  ;;  %v3838_v9 = vpop.f32.mrf.mxu2 }
 0x7d3   :  { %v3839_v60 = vadd.f32 %v3838_v9, %v3767_v19  ;;  %v3993_v1 = vpop.f32.mrf.mxu3 }
 0x7d5   :  { %v8923_v5 = vadd.f32 %v3993_v1, %v3839_v60 }
 0x7da   :  { %v3769_v4 = vpop.f32.mrf.mxu0  ;;  %v3840_v11 = vpop.f32.mrf.mxu2 }
 0x7db   :  { %v3841_v44 = vadd.f32 %v3840_v11, %v3769_v4  ;;  %v3995_v43 = vpop.f32.mrf.mxu3 }
 0x7dd   :  { %v8935_v42 = vadd.f32 %v3995_v43, %v3841_v44 }
 0x7e2   :  { %v3772_v12 = vpop.f32.mrf.mxu0  ;;  %v3843_v47 = vpop.f32.mrf.mxu2 }
 0x7e3   :  { %v3844_v20 = vadd.f32 %v3843_v47, %v3772_v12  ;;  %v3998_v28 = vpop.f32.mrf.mxu3 }
 0x7e5   :  { %v8944_v8 = vadd.f32 %v3998_v28, %v3844_v20 }
 0x7ea   :  { %v3774_v31 = vpop.f32.mrf.mxu0  ;;  %v3845_v21 = vpop.f32.mrf.mxu2 }
 0x7eb   :  { %v3846_v27 = vadd.f32 %v3845_v21, %v3774_v31  ;;  %v4000_v51 = vpop.f32.mrf.mxu3 }
 0x7ed   :  { %v8949_v49 = vadd.f32 %v4000_v51, %v3846_v27 }
 0x7f2   :  { %v3777_v26 = vpop.f32.mrf.mxu0  ;;  %v3848_v61 = vpop.f32.mrf.mxu2 }
 0x7f3   :  { %v3849_v17 = vadd.f32 %v3848_v61, %v3777_v26  ;;  %v4003_v2 = vpop.f32.mrf.mxu3 }
 0x7f5   :  { %v8952_v15 = vadd.f32 %v4003_v2, %v3849_v17 }
 0x7fa   :  { %v8954_v10 = vpop.f32.mrf.mxu0  ;;  %v3850_v9 = vpop.f32.mrf.mxu2 }
 0x7fb   :  { %v4005_v62 = vpop.f32.mrf.mxu3  ;;  %v3851_v13 = vadd.f32 %v3850_v9, %v8954_v10  ;;  %v6508_v10 = vld [vmem:[%s9114_s10 + $0x28] sm:$0xff]  ;;  %v6503_v9 = vld [vmem:[%s9114_s10] sm:$0xff] }
 0x7fd   :  { %v4015_v22 = vadd.f32 %v4005_v62, %v3851_v13  ;;  %v6505_v62 = vld [vmem:[%s9114_s10 + $0x10] sm:$0xff]  ;;  %v4785_v13 = vld [vmem:[%s9118_s14 + $0x38] sm:$0xf] }
 0x802   :  { %v4066_v59 = vpop.f32.mrf.mxu0 }
 0x803   :  { %v4314_v19 = vpop.f32.mrf.mxu3 }
 0x80a   :  { %v4068_v18 = vpop.f32.mrf.mxu0 }
 0x80b   :  { %v4096_v57 = vpack.c.bf16 %v4068_v18, %v4066_v59  ;;  %v4316_v25 = vpop.f32.mrf.mxu3 }
 0x80d   :  { %6059 = vmatmul.msk.bf16.vlgmr.msra.gmra.mxu2 %vm3736_vm6, %v4096_v57 }
 0x812   :  { %v4071_v58 = vpop.f32.mrf.mxu0 }
 0x813   :  { %v4319_v50 = vpop.f32.mrf.mxu3 }
 0x81a   :  { %v4073_v52 = vpop.f32.mrf.mxu0 }
 0x81b   :  { %v4097_v3 = vpack.c.bf16 %v4073_v52, %v4071_v58  ;;  %v4321_v45 = vpop.f32.mrf.mxu3 }
 0x81d   :  { %6060 = vmatmul.msk.bf16.gmra.mxu2 %vm3736_vm6, %v4097_v3 }
 0x822   :  { %v4076_v39 = vpop.f32.mrf.mxu0 }
 0x823   :  { %v4324_v20 = vpop.f32.mrf.mxu3 }
 0x82a   :  { %v4078_v55 = vpop.f32.mrf.mxu0 }
 0x82b   :  { %v4098_v46 = vpack.c.bf16 %v4078_v55, %v4076_v39  ;;  %v4326_v27 = vpop.f32.mrf.mxu3  ;;  %v6510_v55 = vld [vmem:[%s9114_s10 + $0x38] sm:$0xff] }
 0x82c   :  { %4471 = vmatpush.bf16.msrb.mxu2 %v6510_v55 }
 0x82d   :  { %6061 = vmatmul.msk.bf16.gmra.mxu2 %vm3736_vm6, %v4098_v46  ;;  %v6507_v46 = vld [vmem:[%s9114_s10 + $0x20] sm:$0xff] }
 0x832   :  { %v4081_v34 = vpop.f32.mrf.mxu0 }
 0x83a   :  { %v4083_v0 = vpop.f32.mrf.mxu0 }
 0x83b   :  { %v4099_v24 = vpack.c.bf16 %v4083_v0, %v4081_v34  ;;  %v6501_v34 = vld [vmem:[%s9113_s9] sm:$0xff]  ;;  %v6506_v0 = vld [vmem:[%s9114_s10 + $0x18] sm:$0xff] }
 0x83d   :  { %6062 = vmatmul.msk.bf16.gmra.mxu2 %vm3736_vm6, %v4099_v24  ;;  %v6502_v24 = vld [vmem:[%s9113_s9 + $0x8] sm:$0xff] }
 0x84a   :  { %v4329_v23 = vpop.f32.mrf.mxu3 }
 0x852   :  { %v4331_v48 = vpop.f32.mrf.mxu3 }
 0x890   :  { %v4151_v60 = vpop.f32.mrf.mxu2 }
 0x891   :  { %v4171_v1 = vadd.f32 %v4151_v60, %v8906_v63 }
 0x893   :  { %v4334_v33 = vadd.f32 %v4314_v19, %v4171_v1  ;;  %v6504_v19 = vld [vmem:[%s9114_s10 + $0x8] sm:$0xff] }
 0x895   :  { %v4346_v4 = vadd.f32 %v6552_v54, %v4334_v33 }
 0x897   :  { %v4354_v56 = vmax.f32 %v4346_v4, 0.0 }
 0x898   :  { %v4153_v6 = vpop.f32.mrf.mxu2 }
 0x899   :  { %v4172_v36 = vadd.f32 %v4153_v6, %v8912_v14 }
 0x89b   :  { %v4335_v37 = vadd.f32 %v4316_v25, %v4172_v36 }
 0x89d   :  { %v4347_v11 = vadd.f32 %v6552_v54, %v4335_v37 }
 0x89f   :  { %v4355_v30 = vmax.f32 %v4347_v11, 0.0 }
 0x8a0   :  { %v4156_v44 = vpop.f32.mrf.mxu2 }
 0x8a1   :  { %v4366_v43 = vpack.c.bf16 %v4355_v30, %v4354_v56  ;;  %v4173_v53 = vadd.f32 %v4156_v44, %v8923_v5  ;;  %v6518_v56 = vld [vmem:[%s9116_s12 + $0x38] sm:$0xff]  ;;  %v4520_v44 = vld [vmem:[#allocation10 + $0x4] sm:$0xf] }
 0x8a3   :  { %v4336_v35 = vadd.f32 %v4319_v50, %v4173_v53  ;;  %v4628_v53 = vld [vmem:[#allocation10 + $0x8] sm:$0xf] }
 0x8a5   :  { %v4348_v47 = vadd.f32 %v6552_v54, %v4336_v35  ;;  %v6516_v35 = vld [vmem:[%s9116_s12 + $0x28] sm:$0xff] }
 0x8a7   :  { %v4356_v29 = vmax.f32 %v4348_v47, 0.0  ;;  %v6522_v47 = vld [vmem:[%s9116_s12 + $0x58] sm:$0xff] }
 0x8a8   :  { %v4158_v12 = vpop.f32.mrf.mxu2 }
 0x8a9   :  { %v4174_v63 = vadd.f32 %v4158_v12, %v8935_v42  ;;  %v6515_v12 = vld [vmem:[%s9116_s12 + $0x20] sm:$0xff] }
 0x8ab   :  { %v4337_v40 = vadd.f32 %v4321_v45, %v4174_v63  ;;  %v6517_v45 = vld [vmem:[%s9116_s12 + $0x30] sm:$0xff]  ;;  %v6514_v63 = vld [vmem:[%s9116_s12 + $0x18] sm:$0xff] }
 0x8ad   :  { %v4349_v28 = vadd.f32 %v6552_v54, %v4337_v40  ;;  %v6513_v40 = vld [vmem:[%s9116_s12 + $0x10] sm:$0xff] }
 0x8af   :  { %v4357_v14 = vmax.f32 %v4349_v28, 0.0  ;;  %v6512_v28 = vld [vmem:[%s9116_s12 + $0x8] sm:$0xff] }
 0x8b0   :  { %v4161_v16 = vpop.f32.mrf.mxu2 }
 0x8b1   :  { %v4367_v31 = vpack.c.bf16 %v4357_v14, %v4356_v29  ;;  %v4175_v21 = vadd.f32 %v4161_v16, %v8944_v8  ;;  %v6520_v29 = vld [vmem:[%s9116_s12 + $0x48] sm:$0xff]  ;;  %v6511_v14 = vld [vmem:[%s9116_s12] sm:$0xff] }
 0x8b2   :  { %v6519_v16 = vld [vmem:[%s9116_s12 + $0x40] sm:$0xff] }
 0x8b3   :  { %v4338_v51 = vadd.f32 %v4324_v20, %v4175_v21  ;;  %v6521_v20 = vld [vmem:[%s9116_s12 + $0x50] sm:$0xff] }
 0x8b5   :  { %v4350_v5 = vadd.f32 %v6552_v54, %v4338_v51 }
 0x8b7   :  { %v4358_v17 = vmax.f32 %v4350_v5, 0.0 }
 0x8b8   :  { %v4163_v7 = vpop.f32.mrf.mxu2 }
 0x8b9   :  { %v4176_v41 = vadd.f32 %v4163_v7, %v8949_v49 }
 0x8bb   :  { %v4339_v26 = vadd.f32 %v4326_v27, %v4176_v41 }
 0x8bd   :  { %v4351_v61 = vadd.f32 %v6552_v54, %v4339_v26 }
 0x8bf   :  { %v4359_v42 = vmax.f32 %v4351_v61, 0.0 }
 0x8c0   :  { %v4166_v2 = vpop.f32.mrf.mxu2 }
 0x8c1   :  { %v4368_v32 = vpack.c.bf16 %v4359_v42, %v4358_v17  ;;  %v4177_v59 = vadd.f32 %v4166_v2, %v8952_v15  ;;  %v6509_v15 = vld [vmem:[%s9114_s10 + $0x30] sm:$0xff]  ;;  %v6526_v42 = vld [vmem:[%s9116_s12 + $0x78] sm:$0xff] }
 0x8c2   :  { %4472 = vmatpush.bf16.msrb.mxu2 %v6509_v15  ;;  %v4697_v17 = vld [vmem:[#allocation10 + $0xc] sm:$0xf] }
 0x8c3   :  { %v4340_v18 = vadd.f32 %v4329_v23, %v4177_v59  ;;  %v6525_v2 = vld [vmem:[%s9116_s12 + $0x70] sm:$0xff]  ;;  %v6524_v23 = vld [vmem:[%s9116_s12 + $0x68] sm:$0xff]  ;;  %v4820_v59 = vunpack.c.l.b16 %v4785_v13 }
 0x8c5   :  { %v4352_v38 = vadd.f32 %v6552_v54, %v4340_v18 }
 0x8c6   :  { %4473 = vmatpush.bf16.msrb.mxu2 %v6508_v10  ;;  %v6529_v10 = vld [vmem:[%s9118_s14 + $0x10] sm:$0xff] }
 0x8c7   :  { %v4360_v52 = vmax.f32 %v4352_v38, 0.0 }
 0x8c8   :  { %v4168_v8 = vpop.f32.mrf.mxu2 }
 0x8c9   :  { %v4178_v57 = vadd.f32 %v4168_v8, %v4015_v22  ;;  %v4828_v22 = vpack.c.b16 %v4820_v59, %v4820_v59  ;;  %v6533_v8 = vld [vmem:[%s9118_s14 + $0x30] sm:$0xff] }
 0x8ca   :  { %4474 = vmatpush.bf16.msrb.mxu2 %v6507_v46 }
 0x8cb   :  { %v4341_v58 = vadd.f32 %v4331_v48, %v4178_v57  ;;  %v4841_v18 = vsel %vm3749_vm5, %v4828_v22, 0  ;;  %v6532_v57 = vld [vmem:[%s9118_s14 + $0x28] sm:$0xff] }
 0x8cd   :  { %v4353_v49 = vadd.f32 %v6552_v54, %v4341_v58 }
 0x8ce   :  { %4475 = vmatpush.bf16.msrb.mxu2 %v6506_v0 }
 0x8cf   :  { %v4361_v3 = vmax.f32 %v4353_v49, 0.0  ;;  %v6531_v49 = vld [vmem:[%s9118_s14 + $0x20] sm:$0xff] }
 0x8d1   :  { %v4369_v39 = vpack.c.bf16 %v4361_v3, %v4360_v52 }
 0x8d2   :  { %4476 = vmatpush.bf16.msrb.mxu2 %v6505_v62  ;;  %v6528_v62 = vld [vmem:[%s9118_s14 + $0x8] sm:$0xff] }
 0x8d3   :  { %4390 = vmatpush.bf16.msrb.mxu0 %v4369_v39  ;;  %v6530_v39 = vld [vmem:[%s9118_s14 + $0x18] sm:$0xff] }
 0x8d6   :  { %4477 = vmatpush.bf16.msrb.mxu2 %v6504_v19  ;;  %v6527_v19 = vld [vmem:[%s9118_s14] sm:$0xff] }
 0x8d7   :  { %4391 = vmatpush.bf16.msrb.mxu0 %v4368_v32  ;;  %v6523_v32 = vld [vmem:[%s9116_s12 + $0x60] sm:$0xff] }
 0x8da   :  { %4478 = vmatpush.bf16.msrb.mxu2 %v6503_v9  ;;  %v4867_v9 = vld [vmem:[%s9120_s16 + $0x28] sm:$0x3] }
 0x8db   :  { %4392 = vmatpush.bf16.msrb.mxu0 %v4367_v31 }
 0x8de   :  { %4618 = vmatpush.bf16.msra.mxu2 %v6514_v63 }
 0x8df   :  { %4393 = vmatpush.bf16.msrb.mxu0 %v4366_v43  ;;  %v4490_v43 = vld [vmem:[#allocation10] sm:$0xf] }
 0x8e2   :  { %6120 = vmatmul.msk.bf16.vlgmr.msrb.gmra.mxu0 %vm3181_vm3, %v6501_v34  ;;  %4619 = vmatpush.bf16.msra.mxu2 %v6513_v40  ;;  %v6555_v40 = vld [vmem:[#allocation15] ss:$0 sm:$0xff] }
 0x8e6   :  { %4620 = vmatpush.bf16.msra.mxu2 %v6512_v28 }
 0x8ea   :  { %4621 = vmatpush.bf16.msra.mxu2 %v6511_v14 }
 0x8f2   :  { %6121 = vmatmul.msk.bf16.gmra.mxu0 %vm3181_vm3, %v6502_v24 }
 0x95f   :  { %v4395_v25 = vpop.f32.mrf.mxu0 }
 0x967   :  { %v4397_v60 = vpop.f32.mrf.mxu0 }
 0x968   :  { %v4421_v1 = vpack.c.bf16 %v4397_v60, %v4395_v25  ;;  %v4894_v25 = vunpack.c.l.b16 %v4867_v9 }
 0x96a   :  { %4479 = vmatmul.bf16.vlgmr.msrb.gmra.mxu2 %v4421_v1  ;;  %v4900_v60 = vpack.c.b16 %v4894_v25, %v4894_v25 }
 0x96b   :  { %4755 = vmatpush.bf16.msrb.mxu2 %v6526_v42 }
 0x96c   :  { %v4912_v1 = vsel %vm4910_vm8, %v4900_v60, 0 }
 0x96f   :  { %v4400_v33 = vpop.f32.mrf.mxu0  ;;  %4756 = vmatpush.bf16.msrb.mxu2 %v6525_v2 }
 0x973   :  { %4757 = vmatpush.bf16.msrb.mxu2 %v6524_v23 }
 0x977   :  { %v4402_v54 = vpop.f32.mrf.mxu0  ;;  %4758 = vmatpush.bf16.msrb.mxu2 %v6523_v32 }
 0x978   :  { %v4422_v6 = vpack.c.bf16 %v4402_v54, %v4400_v33  ;;  %v6538_v33 = vld [vmem:[%s9120_s16 + $0x20] sm:$0xff]  ;;  %v6537_v54 = vld [vmem:[%s9120_s16 + $0x18] sm:$0xff] }
 0x97a   :  { %4484 = vmatmul.bf16.gmra.mxu2 %v4422_v6  ;;  %v6536_v6 = vld [vmem:[%s9120_s16 + $0x10] sm:$0xff] }
 0x9ed   :  { %v4480_v50 = vpop.f32.mrf.mxu2 }
 0x9f5   :  { %v4482_v36 = vpop.f32.mrf.mxu2 }
 0x9f6   :  { %v4491_v30 = vpack.c.bf16 %v4482_v36, %v4480_v50  ;;  %v6553_v50 = vld [vmem:[#allocation12] ss:$0 sm:$0xff] }
 0x9fd   :  { %v4485_v4 = vpop.f32.mrf.mxu2 }
 0xa05   :  { %v4487_v37 = vpop.f32.mrf.mxu2 }
 0xa06   :  { %v4492_v11 = vpack.c.bf16 %v4487_v37, %v4485_v4 }
 0xa08   :  { %4530 = vmatpush.bf16.msrb.mxu3 %v4492_v11  ;;  %4503 = vmatpush.bf16.msra.mxu0 %v4492_v11 }
 0xa09   :  { %4638 = vmatpush.bf16.msrb.mxu1 %v4492_v11 }
 0xa0c   :  { %4531 = vmatpush.bf16.msrb.mxu3 %v4491_v30  ;;  %4504 = vmatpush.bf16.msra.mxu0 %v4491_v30 }
 0xa0d   :  { %4639 = vmatpush.bf16.msrb.mxu1 %v4491_v30 }
 0xa0f   :  { %6155 = vmatmul.msk.bf16.vlgmr.msrb.gmra.mxu3 %vm4493_vm7, %v4520_v44  ;;  %6154 = vmatmul.msk.bf16.vlgmr.msra.gmra.mxu0 %vm4493_vm7, %v4490_v43  ;;  %v6535_v44 = vld [vmem:[%s9120_s16 + $0x8] sm:$0xff]  ;;  %v6534_v43 = vld [vmem:[%s9120_s16] sm:$0xff] }
 0xa10   :  { %4578 = vmatpush.bf16.msrb.mxu0 %v6518_v56  ;;  %6198 = vmatmul.msk.bf16.vlgmr.msrb.gmra.mxu1 %vm4493_vm7, %v4628_v53 }
 0xa11   :  { %4686 = vmatpush.bf16.msra.mxu3 %v6522_v47  ;;  %4843 = vmatpush.bf16.msra.mxu1 %v4841_v18 }
 0xa14   :  { %4579 = vmatpush.bf16.msrb.mxu0 %v6517_v45  ;;  %v6554_v45 = vld [vmem:[#allocation13] ss:$0 sm:$0xff] }
 0xa15   :  { %4687 = vmatpush.bf16.msra.mxu3 %v6521_v20  ;;  %4844 = vmatpush.bf16.msra.mxu1 %v6533_v8 }
 0xa18   :  { %4580 = vmatpush.bf16.msrb.mxu0 %v6516_v35 }
 0xa19   :  { %4688 = vmatpush.bf16.msra.mxu3 %v6520_v29  ;;  %4845 = vmatpush.bf16.msra.mxu1 %v6532_v57 }
 0xa1c   :  { %4581 = vmatpush.bf16.msrb.mxu0 %v6515_v12 }
 0xa1d   :  { %4689 = vmatpush.bf16.msra.mxu3 %v6519_v16  ;;  %4846 = vmatpush.bf16.msra.mxu1 %v6531_v49 }
 0xa20   :  { %4707 = vmatpush.bf16.msra.mxu0 %v4492_v11 }
 0xa21   :  { %4847 = vmatpush.bf16.msra.mxu1 %v6530_v39  ;;  %4916 = vmatpush.bf16.msrb.mxu3 %v4912_v1 }
 0xa24   :  { %4708 = vmatpush.bf16.msra.mxu0 %v4491_v30 }
 0xa25   :  { %4848 = vmatpush.bf16.msra.mxu1 %v6529_v10  ;;  %4917 = vmatpush.bf16.msrb.mxu3 %v6538_v33 }
 0xa29   :  { %4849 = vmatpush.bf16.msra.mxu1 %v6528_v62  ;;  %4918 = vmatpush.bf16.msrb.mxu3 %v6537_v54 }
 0xa2d   :  { %4850 = vmatpush.bf16.msra.mxu1 %v6527_v19  ;;  %4919 = vmatpush.bf16.msrb.mxu3 %v6536_v6 }
 0xa31   :  { %4920 = vmatpush.bf16.msrb.mxu3 %v6535_v44 }
 0xa35   :  { %4921 = vmatpush.bf16.msrb.mxu3 %v6534_v43 }
 0xa8c   :  { %v4506_v31 = vpop.f32.mrf.mxu0 }
 0xa8d   :  { %v4518_v21 = vpack.c.bf16 %v4506_v31, %v4506_v31  ;;  %v4641_v27 = vpop.f32.mrf.mxu1 }
 0xa8e   :  { %v4654_v51 = vpack.c.bf16 %v4641_v27, %v4641_v27 }
 0xa8f   :  { %6197 = vmatmul.msk.bf16.vlgmr.msra.gmra.mxu2 %vm3181_vm3, %v4518_v21 }
 0xa90   :  { %6223 = vmatmul.msk.bf16.vlgmr.msra.gmra.mxu3 %vm3181_vm3, %v4654_v51 }
 0xa92   :  { %v4533_v7 = vpop.f32.mrf.mxu3 }
 0xa93   :  { %v4546_v41 = vpack.c.bf16 %v4533_v7, %v4533_v7 }
 0xa94   :  { %v4508_v5 = vpop.f32.mrf.mxu0 }
 0xa95   :  { %6180 = vmatmul.msk.bf16.vlgmr.msrb.gmra.mxu0 %vm3181_vm3, %v4546_v41  ;;  %v4643_v26 = vpop.f32.mrf.mxu1 }
 0xa9a   :  { %v4535_v61 = vpop.f32.mrf.mxu3 }
 0xaa5   :  { %6224 = vmatmul.msk.bf16.vlgmr.msra.gmra.mxu0 %vm4493_vm7, %v4697_v17 }
 0xb12   :  { %v4583_v48 = vpop.f32.mrf.mxu0  ;;  %v4623_v38 = vpop.f32.mrf.mxu2 }
 0xb13   :  { %v4624_v58 = vadd.f32 %v4623_v38, %v4583_v48  ;;  %v4691_v52 = vpop.f32.mrf.mxu3 }
 0xb15   :  { %v4695_v3 = vadd.f32 %v4691_v52, %v4624_v58 }
 0xb1a   :  { %v4585_v55 = vpop.f32.mrf.mxu0  ;;  %v4625_v15 = vpop.f32.mrf.mxu2 }
 0xb1b   :  { %v4693_v46 = vpop.f32.mrf.mxu3 }
 0xb22   :  { %v4710_v34 = vpop.f32.mrf.mxu0 }
 0xb23   :  { %v4723_v0 = vpack.c.bf16 %v4710_v34, %v4710_v34 }
 0xb25   :  { %6249 = vmatmul.msk.bf16.vlgmr.msrb.gmra.mxu2 %vm3181_vm3, %v4723_v0 }
 0xb2a   :  { %v4712_v24 = vpop.f32.mrf.mxu0 }
 0xba8   :  { %v4760_v36 = vpop.f32.mrf.mxu2 }
 0xba9   :  { %v4764_v4 = vadd.f32 %v4760_v36, %v4695_v3 }
 0xbab   :  { %v4769_v37 = vadd.f32 %v6553_v50, %v4764_v4 }
 0xbad   :  { %v4770_v11 = vmax.f32 %v4769_v37, 0.0 }
 0xbaf   :  { %v4786_v56 = vpack.c.bf16 %v4770_v11, %v4770_v11 }
 0xbb0   :  { %v4762_v30 = vpop.f32.mrf.mxu2 }
 0xbb1   :  { %6278 = vmatmul.msk.bf16.vlgmr.msra.gmra.mxu1 %vm4836_vm9, %v4786_v56 }
 0xc2e   :  { %v4852_v53 = vpop.f32.mrf.mxu1 }
 0xc2f   :  { %v4853_v35 = vadd.f32 %v6554_v45, %v4852_v53 }
 0xc31   :  { %v4856_v12 = vmax.f32 %v4853_v35, 0.0 }
 0xc33   :  { %v4868_v63 = vpack.c.bf16 %v4856_v12, %v4856_v12 }
 0xc35   :  { %6299 = vmatmul.msk.bf16.vlgmr.msrb.gmra.mxu3 %vm4906_vm10, %v4868_v63 }
 0xc36   :  { %v4854_v47 = vpop.f32.mrf.mxu1 }
 0xcb8   :  { %v4923_v20 = vpop.f32.mrf.mxu3 }
 0xcb9   :  { %v4924_v28 = vadd.f32 %v6555_v40, %v4923_v20 }
 0xcbb   :  { %4928 = vst.msk [vmem:[%s9122_s18] sm:$0xff] %vm4927_vm11, %v4924_v28 }
 0xcc0   :  { %v4925_v29 = vpop.f32.mrf.mxu3 }
 0xcc1   :  { %4933 = vsyncpa [#allocation3], 1 }
 0xcc2   :  { %4934 = vsyncpa [#allocation5], 1 }
 0xcc3   :  { %4935 = vsyncpa [#allocation8], 1 }
 0xcc4   :  { %4936 = vsyncpa [#allocation11], 1 }
 0xcc5   :  { %4937 = vsyncpa [#allocation14], 1 }

</bundles_post_ra>
